<compile_context>
chip_gen: v7x
topology: tpu7x:2x2x1
jax: 0.10.0
libtpu: 0.0.40
codegen_flags: <defaults>
</compile_context>

<pallas_src>
import math
import jax
import jax.numpy as jnp
from jax.experimental import pallas as pl
from jax.experimental.pallas import tpu as pltpu

F32 = jnp.float32
BF16 = jnp.bfloat16
OUT_PAD = 128                       # lane-dense padded width of kernel-2 output
_VMEM_LIMIT = 64 * 1024 * 1024      # raise scoped VMEM above 16/32 MiB defaults
                                    # (re-derive / leave headroom on v7x's 64 MiB)


# ---------------------------------------------------------------------------
# In-kernel building blocks (f32 elementwise, bf16 MXU inputs, f32 accumulate)
# ---------------------------------------------------------------------------
def _layer_norm(h, g, b, eps):
    mu = jnp.mean(h, axis=-1, keepdims=True)
    var = jnp.mean(jnp.square(h - mu), axis=-1, keepdims=True)
    return (h - mu) * jax.lax.rsqrt(var + eps) * g + b


def _linear2d(h2d, w, b):
    # h2d: (N, D) f32, w: (D, E) bf16, b: (1, E) f32
    return jnp.dot(h2d.astype(BF16), w.astype(BF16),
                   preferred_element_type=F32) + b


def _attention(h, key_bias, wqkv, bqkv, wo, bo, num_heads, head_dim):
    """h: (G, S, D) f32.  key_bias: (G, S) additive bias over keys, or None.

    All heads are processed by ONE batched score matmul / softmax / value
    matmul (heads stacked on the leading batch axis), then a single K=D
    output projection.  The 1/sqrt(head_dim) scale is pre-folded into the
    Q columns of wqkv / bqkv at parameter-init time.
    """
    G, S, D = h.shape
    qkv = _linear2d(h.reshape(G * S, D), wqkv, bqkv).reshape(G, S, 3 * D)

    def split_heads(base):
        # lane slices per head, stacked along the leading (batch) axis
        return jnp.concatenate(
            [qkv[:, :, base + i * head_dim: base + (i + 1) * head_dim]
             for i in range(num_heads)], axis=0)              # (nh*G, S, hd)

    q = split_heads(0)
    k = split_heads(D)
    v = split_heads(2 * D)

    s = jnp.einsum('bqd,bkd->bqk', q.astype(BF16), k.astype(BF16),
                   preferred_element_type=F32)                # (nh*G, S, S)
    if key_bias is not None:
        bias_b = jnp.concatenate([key_bias] * num_heads, axis=0)  # (nh*G, S)
        s = s + bias_b[:, None, :]
    s = s - jnp.max(s, axis=-1, keepdims=True)
    p = jnp.exp(s)
    # exact (non-approx) reciprocal of the small (.,S,1) denominator, then a
    # broadcast multiply -- keeps parity with torch softmax at negligible cost.
    p = p * (1.0 / jnp.sum(p, axis=-1, keepdims=True))
    o = jnp.einsum('bqk,bkd->bqd', p.astype(BF16), v.astype(BF16),
                   preferred_element_type=F32)                # (nh*G, S, hd)

    # merge heads back into the lane dim (head-major, matches wo row order)
    o = jnp.concatenate([o[i * G:(i + 1) * G] for i in range(num_heads)],
                        axis=-1)                              # (G, S, D)
    # ONE K=D output projection for all heads.
    out = jnp.dot(o.reshape(G * S, D).astype(BF16), wo.astype(BF16),
                  preferred_element_type=F32) + bo
    return out.reshape(G, S, D)


def _ffn(h, w1, b1, w2, b2):
    G, S, D = h.shape
    h1 = jnp.maximum(_linear2d(h.reshape(G * S, D), w1, b1), 0.0)
    return _linear2d(h1, w2, b2).reshape(G, S, D)


# ---------------------------------------------------------------------------
# Kernel 1: custom trs_encoder (pre-LN blocks, key mask, final LayerNorm)
#           grid = (batch_tiles [parallel], num_blocks [arbitrary])
#           residual stream accumulates directly in o_ref (VMEM-resident)
# ---------------------------------------------------------------------------
def make_trs_encoder_kernel(num_heads, head_dim, ln_eps, final_eps):
    def kernel(x_ref, bias_ref,
               wqkv_ref, bqkv_ref, wo_ref, bo_ref,
               ln1g_ref, ln1b_ref, ln2g_ref, ln2b_ref,
               w1_ref, b1_ref, w2_ref, b2_ref,
               fing_ref, finb_ref,
               o_ref):
        l = pl.program_id(1)
        n_layers = pl.num_programs(1)

        @pl.when(l == 0)
        def _():
            o_ref[...] = x_ref[...]

        h = o_ref[...]                             # (bt, L, D), VMEM-resident
        bias = bias_ref[...]                       # (bt, L) additive key bias

        # pre-LN sublayers: x + sublayer(LN(x))
        hn = _layer_norm(h, ln1g_ref[0], ln1b_ref[0], ln_eps)
        h = h + _attention(hn, bias, wqkv_ref[0], bqkv_ref[0],
                           wo_ref[0], bo_ref[0], num_heads, head_dim)
        hn = _layer_norm(h, ln2g_ref[0], ln2b_ref[0], ln_eps)
        h = h + _ffn(hn, w1_ref[0], b1_ref[0], w2_ref[0], b2_ref[0])

        @pl.when(l < n_layers - 1)
        def _():
            o_ref[...] = h

        @pl.when(l == n_layers - 1)
        def _():
            o_ref[...] = _layer_norm(h, fing_ref[...], finb_ref[...], final_eps)

    return kernel


def trs_encoder_pallas(x, key_bias, lw, final_g, final_b, *, num_heads,
                       batch_tile=None):
    B, L, D = x.shape
    NB = lw["wqkv"].shape[0]
    assert D % num_heads == 0
    head_dim = D // num_heads
    bt = B if batch_tile is None else batch_tile
    assert B % bt == 0
    stacked = [lw[k] for k in ("wqkv", "bqkv", "wo", "bo",
                               "ln1g", "ln1b", "ln2g", "ln2b",
                               "w1", "b1", "w2", "b2")]
    inv = pl.Buffered(1)   # layer-invariant inputs: single buffer (VMEM saving)
    lspec = lambda a: pl.BlockSpec((1,) + a.shape[1:], lambda b, l: (l, 0, 0))
    cspec = lambda a: pl.BlockSpec(a.shape, lambda b, l: (0,) * a.ndim,
                                   pipeline_mode=inv)
    return pl.pallas_call(
        make_trs_encoder_kernel(num_heads, head_dim, 1e-6, 1e-6),
        out_shape=jax.ShapeDtypeStruct((B, L, D), F32),
        grid=(B // bt, NB),
        in_specs=[pl.BlockSpec((bt, L, D), lambda b, l: (b, 0, 0),
                               pipeline_mode=inv),
                  pl.BlockSpec((bt, L), lambda b, l: (b, 0),
                               pipeline_mode=inv)]
                 + [lspec(a) for a in stacked]
                 + [cspec(final_g), cspec(final_b)],
        out_specs=pl.BlockSpec((bt, L, D), lambda b, l: (b, 0, 0)),
        compiler_params=pltpu.CompilerParams(
            dimension_semantics=("parallel", "arbitrary"),
            vmem_limit_bytes=_VMEM_LIMIT),
    )(x, key_bias, *stacked, final_g, final_b)


# ---------------------------------------------------------------------------
# Kernel 2: torch.nn.TransformerEncoder (post-LN, no mask) + head epilogue
#           (last_layernorm2 -> zero-padded fc -> sigmoid -> * scale)
#           grid = (row_tiles [parallel], num_blocks [arbitrary])
# ---------------------------------------------------------------------------
def make_torch_encoder_kernel(num_heads, head_dim, ln_eps, head_eps):
    def kernel(x_ref,
               wqkv_ref, bqkv_ref, wo_ref, bo_ref,
               ln1g_ref, ln1b_ref, ln2g_ref, ln2b_ref,
               w1_ref, b1_ref, w2_ref, b2_ref,
               hng_ref, hnb_ref, fcw_ref, fcb_ref, scale_ref,
               o_ref, h_sc):
        l = pl.program_id(1)
        n_layers = pl.num_programs(1)
        G, S, D = x_ref.shape

        @pl.when(l == 0)
        def _():
            h_sc[...] = x_ref[...]

        h = h_sc[...]                              # (gt, S, D)
        # torch default post-LN, ReLU, no mask
        a = _attention(h, None, wqkv_ref[0], bqkv_ref[0],
                       wo_ref[0], bo_ref[0], num_heads, head_dim)
        h = _layer_norm(h + a, ln1g_ref[0], ln1b_ref[0], ln_eps)
        f = _ffn(h, w1_ref[0], b1_ref[0], w2_ref[0], b2_ref[0])
        h = _layer_norm(h + f, ln2g_ref[0], ln2b_ref[0], ln_eps)
        h_sc[...] = h

        @pl.when(l == n_layers - 1)
        def _():
            xn = _layer_norm(h, hng_ref[...], hnb_ref[...], head_eps)
            # fc weight is zero-padded to (D, OUT_PAD): full-width, lane-dense
            # matmul + store instead of an unaligned 3-lane slice/store.
            y = jnp.dot(xn.reshape(G * S, D), fcw_ref[...],
                        preferred_element_type=F32) + fcb_ref[...]
            y = jax.nn.sigmoid(y) * scale_ref[...]
            o_ref[...] = y.reshape(G, S, OUT_PAD)

    return kernel


def torch_encoder_head_pallas(x, lw, hn_g, hn_b, fc_w, fc_b, scale, *,
                              num_heads, row_tile=None):
    G, S, D = x.shape
    NB = lw["wqkv"].shape[0]
    assert D % num_heads == 0
    head_dim = D // num_heads
    gt = G if row_tile is None else row_tile
    assert G % gt == 0
    stacked = [lw[k] for k in ("wqkv", "bqkv", "wo", "bo",
                               "ln1g", "ln1b", "ln2g", "ln2b",
                               "w1", "b1", "w2", "b2")]
    consts = [hn_g, hn_b, fc_w, fc_b, scale]
    inv = pl.Buffered(1)
    lspec = lambda a: pl.BlockSpec((1,) + a.shape[1:], lambda g, l: (l, 0, 0))
    cspec = lambda a: pl.BlockSpec(a.shape, lambda g, l: (0,) * a.ndim,
                                   pipeline_mode=inv)
    return pl.pallas_call(
        make_torch_encoder_kernel(num_heads, head_dim, 1e-5, 1e-8),
        out_shape=jax.ShapeDtypeStruct((G, S, OUT_PAD), F32),
        grid=(G // gt, NB),
        in_specs=[pl.BlockSpec((gt, S, D), lambda g, l: (g, 0, 0),
                               pipeline_mode=inv)]
                 + [lspec(a) for a in stacked]
                 + [cspec(a) for a in consts],
        out_specs=pl.BlockSpec((gt, S, OUT_PAD), lambda g, l: (g, 0, 0)),
        scratch_shapes=[pltpu.VMEM((gt, S, D), F32)],
        compiler_params=pltpu.CompilerParams(
            dimension_semantics=("parallel", "arbitrary"),
            vmem_limit_bytes=_VMEM_LIMIT),
    )(x, *stacked, *consts)


# ---------------------------------------------------------------------------
# Parameters (per-layer weights pre-stacked along a leading layer axis)
# ---------------------------------------------------------------------------
def init_params(key, cfg):
    H, T1, T2 = cfg["hidden"], cfg["t1"], cfg["t2"]
    L = cfg["maxlen"]
    D = H + T1 + 2 * T2
    NB = cfg["num_blocks"]
    nh = cfg["num_heads"]
    qscale = 1.0 / math.sqrt(D // nh)
    keys = iter(jax.random.split(key, 64))

    def nrm(shape, dtype=F32, s=0.02):
        return (jax.random.normal(next(keys), shape, F32) * s).astype(dtype)

    def stacked_layer_params(d_model, d_ff):
        # The 1/sqrt(head_dim) attention scale is folded into the Q columns of
        # wqkv / bqkv, removing the per-layer (G,S,S) score multiply in-kernel.
        wqkv = nrm((NB, d_model, 3 * d_model), F32)
        wqkv = wqkv.at[:, :, :d_model].multiply(qscale).astype(BF16)
        bqkv = jnp.zeros((NB, 1, 3 * d_model), F32)
        bqkv = bqkv.at[:, :, :d_model].multiply(qscale)
        return dict(
            wqkv=wqkv,                                        # fused Q/K/V
            bqkv=bqkv,
            wo=nrm((NB, d_model, d_model), BF16),
            bo=jnp.zeros((NB, 1, d_model), F32),
            ln1g=jnp.ones((NB, 1, d_model), F32),
            ln1b=jnp.zeros((NB, 1, d_model), F32),
            ln2g=jnp.ones((NB, 1, d_model), F32),
            ln2b=jnp.zeros((NB, 1, d_model), F32),
            w1=nrm((NB, d_model, d_ff), BF16),
            b1=jnp.zeros((NB, 1, d_ff), F32),
            w2=nrm((NB, d_ff, d_model), BF16),
            b2=jnp.zeros((NB, 1, d_model), F32))

    item_emb = nrm((cfg["itemnum"] + 1, H)).at[0].set(0.0)    # padding_idx=0
    # fc acts only on the time channels [H, D); zero-pad to (D, OUT_PAD) so
    # the head kernel does a full-width, lane-dense matmul/store.
    fc_w = jnp.zeros((D, OUT_PAD), F32).at[H:, :3].set(nrm((T1 + 2 * T2, 3)))
    return dict(
        item_emb=item_emb,
        trs_pos_emb=nrm((L, H)),
        hour_emb=nrm((24, T1)),
        minute_emb=nrm((60, T2)),
        second_emb=nrm((60, T2)),
        time_pos_emb=nrm((L, T1 + 2 * T2)),
        trs_layers=stacked_layer_params(D, D * cfg["exp_factor"]),
        trs_final_g=jnp.ones((1, D), F32),
        trs_final_b=jnp.zeros((1, D), F32),
        torch_layers=stacked_layer_params(D, 2 * D),
        ln2_g=jnp.ones((1, D), F32),
        ln2_b=jnp.zeros((1, D), F32),
        fc_w=fc_w,
        fc_b=jnp.zeros((1, OUT_PAD), F32))


# ---------------------------------------------------------------------------
# Forward glue (embedding gathers / concats / transposes in plain JAX)
# ---------------------------------------------------------------------------
def bert4rec_forward(params, x_ids, pos_ids, neg_ids, hms, cfg):
    B, L = x_ids.shape
    H = cfg["hidden"]

    # (B, L) additive key-mask bias: 0 where item id > 0, -1e9 at padding.
    key_bias = jnp.where(x_ids > 0, 0.0, -1e9).astype(F32)

    def trs_emb(ids):   # item embedding + learned positional (dropout = eval)
        return params["item_emb"][ids] + params["trs_pos_emb"][None, :, :]

    x = trs_emb(x_ids)                                        # (B, L, H)

    emb_h = params["hour_emb"][hms[..., 0]]                   # (B, L, T1)
    emb_m = params["minute_emb"][hms[..., 1]]                 # (B, L, T2)
    emb_s = params["second_emb"][hms[..., 2]]                 # (B, L, T2)
    emb_time = jnp.concatenate([emb_h, emb_m, emb_s], axis=-1)
    emb_time = emb_time + params["time_pos_emb"][None, :, :]

    seqs = jnp.concatenate([x, emb_time], axis=-1)            # (B, L, D)

    # Fused masked pre-LN encoder stack + final LayerNorm (one pallas_call).
    h = trs_encoder_pallas(seqs, key_bias, params["trs_layers"],
                           params["trs_final_g"], params["trs_final_b"],
                           num_heads=cfg["num_heads"])

    # pos/neg logits: tiny dot-reduce, cheaper in plain XLA than a pallas_call.
    out_poi = h[:, :, :H]
    pos_logits = jnp.sum(out_poi * trs_emb(pos_ids), axis=-1)
    neg_logits = jnp.sum(out_poi * trs_emb(neg_ids), axis=-1)

    # torch.nn.TransformerEncoder fed a (B, L, D) tensor with default
    # (seq, batch, D) layout -> attention runs across the batch axis.
    # (Transpose kept in XLA: folding it into kernel 1's epilogue would need a
    # sublane permute of the resident accumulator; left as a future v7x opt.)
    ht = jnp.transpose(h, (1, 0, 2))                          # (L, B, D)
    # scale_factors / shifts: the randn values are fully overwritten by
    # constants [23, 59, 59] / [0, 0, 0] in the original code.
    scale = jnp.zeros((1, OUT_PAD), F32).at[0, :3].set(
        jnp.array([23.0, 59.0, 59.0], F32))
    out_t = torch_encoder_head_pallas(ht, params["torch_layers"],
                                      params["ln2_g"], params["ln2_b"],
                                      params["fc_w"], params["fc_b"], scale,
                                      num_heads=cfg["num_heads"])
    out_time = jnp.transpose(out_t[:, :, :3], (1, 0, 2))      # (B, L, 3)

    return pos_logits, neg_logits, out_time


if __name__ == "__main__":
    cfg = dict(itemnum=50, maxlen=8, hidden=32, t1=16, t2=8,
               num_heads=2, num_blocks=2, exp_factor=2)
    B, L = 2, cfg["maxlen"]

    key = jax.random.PRNGKey(0)
    kp, kx, kpos, kneg, kh, km, ks = jax.random.split(key, 7)
    params = init_params(kp, cfg)

    x_ids = jax.random.randint(kx, (B, L), 0, cfg["itemnum"] + 1)
    pos_ids = jax.random.randint(kpos, (B, L), 1, cfg["itemnum"] + 1)
    neg_ids = jax.random.randint(kneg, (B, L), 1, cfg["itemnum"] + 1)
    # TODO(synk): host-side timestamp -> datetime.hour/minute/second conversion
    # has no Pallas equivalent; we supply the (hour, minute, second) integer
    # triples directly instead of UNIX timestamps.
    hms = jnp.stack([jax.random.randint(kh, (B, L), 0, 24),
                     jax.random.randint(km, (B, L), 0, 60),
                     jax.random.randint(ks, (B, L), 0, 60)], axis=-1)

    fwd = jax.jit(lambda p, a, b, c, d: bert4rec_forward(p, a, b, c, d, cfg))
    pos_logits, neg_logits, out_time = fwd(params, x_ids, pos_ids, neg_ids, hms)
    jax.block_until_ready((pos_logits, neg_logits, out_time))

    assert pos_logits.shape == (B, L)
    assert neg_logits.shape == (B, L)
    assert out_time.shape == (B, L, 3)
    print("KERNEL_OK")
</pallas_src>

<mosaic_0001>
module attributes {stable_mosaic.version = 11 : i64} {
  func.func @kernel(%arg0: i32, %arg1: i32, %arg2: memref<2x8x64xf32, #tpu.memory_space<vmem>>, %arg3: memref<2x8xf32, #tpu.memory_space<vmem>>, %arg4: memref<1x64x192xbf16, #tpu.memory_space<vmem>>, %arg5: memref<1x1x192xf32, #tpu.memory_space<vmem>>, %arg6: memref<1x64x64xbf16, #tpu.memory_space<vmem>>, %arg7: memref<1x1x64xf32, #tpu.memory_space<vmem>>, %arg8: memref<1x1x64xf32, #tpu.memory_space<vmem>>, %arg9: memref<1x1x64xf32, #tpu.memory_space<vmem>>, %arg10: memref<1x1x64xf32, #tpu.memory_space<vmem>>, %arg11: memref<1x1x64xf32, #tpu.memory_space<vmem>>, %arg12: memref<1x64x128xbf16, #tpu.memory_space<vmem>>, %arg13: memref<1x1x128xf32, #tpu.memory_space<vmem>>, %arg14: memref<1x128x64xbf16, #tpu.memory_space<vmem>>, %arg15: memref<1x1x64xf32, #tpu.memory_space<vmem>>, %arg16: memref<1x64xf32, #tpu.memory_space<vmem>>, %arg17: memref<1x64xf32, #tpu.memory_space<vmem>>, %arg18: memref<2x8x64xf32, #tpu.memory_space<vmem>>) attributes {dimension_semantics = [#tpu.dimension_semantics<parallel>, #tpu.dimension_semantics<arbitrary>], iteration_bounds = array<i64: 1, 2>, scalar_prefetch = 0 : i64, scratch_operands = 0 : i64, tpu.core_type = #tpu.core_type<tc>, window_params = [{pipeline_mode = #tpu.pipeline_mode<synchronous>, transform_indices = @transform_0, window_bounds = array<i64: 2, 8, 64>}, {pipeline_mode = #tpu.pipeline_mode<synchronous>, transform_indices = @transform_1, window_bounds = array<i64: 2, 8>}, {transform_indices = @transform_2, window_bounds = array<i64: 1, 64, 192>}, {transform_indices = @transform_3, window_bounds = array<i64: 1, 1, 192>}, {transform_indices = @transform_4, window_bounds = array<i64: 1, 64, 64>}, {transform_indices = @transform_5, window_bounds = array<i64: 1, 1, 64>}, {transform_indices = @transform_6, window_bounds = array<i64: 1, 1, 64>}, {transform_indices = @transform_7, window_bounds = array<i64: 1, 1, 64>}, {transform_indices = @transform_8, window_bounds = array<i64: 1, 1, 64>}, {transform_indices = @transform_9, window_bounds = array<i64: 1, 1, 64>}, {transform_indices = @transform_10, window_bounds = array<i64: 1, 64, 128>}, {transform_indices = @transform_11, window_bounds = array<i64: 1, 1, 128>}, {transform_indices = @transform_12, window_bounds = array<i64: 1, 128, 64>}, {transform_indices = @transform_13, window_bounds = array<i64: 1, 1, 64>}, {pipeline_mode = #tpu.pipeline_mode<synchronous>, transform_indices = @transform_14, window_bounds = array<i64: 1, 64>}, {pipeline_mode = #tpu.pipeline_mode<synchronous>, transform_indices = @transform_15, window_bounds = array<i64: 1, 64>}, {transform_indices = @transform_16, window_bounds = array<i64: 2, 8, 64>}]} {
    %c0_i32 = arith.constant 0 : i32
    %0 = arith.cmpi eq, %arg1, %c0_i32 : i32
    %1 = arith.extui %0 : i1 to i32
    %c0_i32_0 = arith.constant 0 : i32
    %2 = arith.cmpi ne, %1, %c0_i32_0 : i32
    scf.if %2 {
      %c0_63 = arith.constant 0 : index
      %c0_64 = arith.constant 0 : index
      %c0_65 = arith.constant 0 : index
      %142 = vector.load %arg2[%c0_63, %c0_64, %c0_65] : memref<2x8x64xf32, #tpu.memory_space<vmem>>, vector<2x8x64xf32>
      %c0_66 = arith.constant 0 : index
      %c0_67 = arith.constant 0 : index
      %c0_68 = arith.constant 0 : index
      %143 = vector.load %arg18[%c0_66, %c0_67, %c0_68] : memref<2x8x64xf32, #tpu.memory_space<vmem>>, vector<2x8x64xf32>
      tpu.vector_store %arg18[%c0_66, %c0_67, %c0_68], %142 {strides = array<i32>} : memref<2x8x64xf32, #tpu.memory_space<vmem>>, vector<2x8x64xf32>,
    } else {
    }
    %c0 = arith.constant 0 : index
    %c0_1 = arith.constant 0 : index
    %c0_2 = arith.constant 0 : index
    %3 = vector.load %arg18[%c0, %c0_1, %c0_2] : memref<2x8x64xf32, #tpu.memory_space<vmem>>, vector<2x8x64xf32>
    %c0_3 = arith.constant 0 : index
    %c0_4 = arith.constant 0 : index
    %4 = vector.load %arg3[%c0_3, %c0_4] : memref<2x8xf32, #tpu.memory_space<vmem>>, vector<2x8xf32>
    %c0_5 = arith.constant 0 : index
    %c0_6 = arith.constant 0 : index
    %c0_7 = arith.constant 0 : index
    %5 = vector.load %arg8[%c0_5, %c0_6, %c0_7] : memref<1x1x64xf32, #tpu.memory_space<vmem>>, vector<1x1x64xf32>
    %6 = vector.shape_cast %5 : vector<1x1x64xf32> to vector<1x64xf32>
    %c0_8 = arith.constant 0 : index
    %c0_9 = arith.constant 0 : index
    %c0_10 = arith.constant 0 : index
    %7 = vector.load %arg9[%c0_8, %c0_9, %c0_10] : memref<1x1x64xf32, #tpu.memory_space<vmem>>, vector<1x1x64xf32>
    %8 = vector.shape_cast %7 : vector<1x1x64xf32> to vector<1x64xf32>
    %cst = arith.constant dense<0.000000e+00> : vector<2x8xf32>
    %9 = vector.multi_reduction <add>, %3, %cst [2] : vector<2x8x64xf32> to vector<2x8xf32>
    %10 = vector.shape_cast %9 : vector<2x8xf32> to vector<2x8x1xf32>
    %cst_11 = arith.constant 6.400000e+01 : f32
    %11 = vector.broadcast %cst_11 : f32 to vector<2x8x1xf32>
    %12 = arith.divf %10, %11 : vector<2x8x1xf32>
    %13 = vector.broadcast %12 : vector<2x8x1xf32> to vector<2x8x64xf32>
    %14 = arith.subf %3, %13 : vector<2x8x64xf32>
    %15 = arith.mulf %14, %14 : vector<2x8x64xf32>
    %cst_12 = arith.constant dense<0.000000e+00> : vector<2x8xf32>
    %16 = vector.multi_reduction <add>, %15, %cst_12 [2] : vector<2x8x64xf32> to vector<2x8xf32>
    %17 = vector.shape_cast %16 : vector<2x8xf32> to vector<2x8x1xf32>
    %cst_13 = arith.constant 6.400000e+01 : f32
    %18 = vector.broadcast %cst_13 : f32 to vector<2x8x1xf32>
    %19 = arith.divf %17, %18 : vector<2x8x1xf32>
    %20 = vector.broadcast %12 : vector<2x8x1xf32> to vector<2x8x64xf32>
    %21 = arith.subf %3, %20 : vector<2x8x64xf32>
    %cst_14 = arith.constant 9.99999997E-7 : f32
    %22 = vector.broadcast %cst_14 : f32 to vector<2x8x1xf32>
    %23 = arith.addf %19, %22 : vector<2x8x1xf32>
    %24 = math.rsqrt %23 : vector<2x8x1xf32>
    %25 = vector.broadcast %24 : vector<2x8x1xf32> to vector<2x8x64xf32>
    %26 = arith.mulf %21, %25 : vector<2x8x64xf32>
    %27 = vector.shape_cast %6 : vector<1x64xf32> to vector<1x1x64xf32>
    %28 = vector.broadcast %27 : vector<1x1x64xf32> to vector<2x8x64xf32>
    %29 = arith.mulf %26, %28 : vector<2x8x64xf32>
    %30 = vector.shape_cast %8 : vector<1x64xf32> to vector<1x1x64xf32>
    %31 = vector.broadcast %30 : vector<1x1x64xf32> to vector<2x8x64xf32>
    %32 = arith.addf %29, %31 : vector<2x8x64xf32>
    %c0_15 = arith.constant 0 : index
    %c0_16 = arith.constant 0 : index
    %c0_17 = arith.constant 0 : index
    %33 = vector.load %arg4[%c0_15, %c0_16, %c0_17] : memref<1x64x192xbf16, #tpu.memory_space<vmem>>, vector<1x64x192xbf16>
    %34 = vector.shape_cast %33 : vector<1x64x192xbf16> to vector<64x192xbf16>
    %c0_18 = arith.constant 0 : index
    %c0_19 = arith.constant 0 : index
    %c0_20 = arith.constant 0 : index
    %35 = vector.load %arg5[%c0_18, %c0_19, %c0_20] : memref<1x1x192xf32, #tpu.memory_space<vmem>>, vector<1x1x192xf32>
    %36 = vector.shape_cast %35 : vector<1x1x192xf32> to vector<1x192xf32>
    %c0_21 = arith.constant 0 : index
    %c0_22 = arith.constant 0 : index
    %c0_23 = arith.constant 0 : index
    %37 = vector.load %arg6[%c0_21, %c0_22, %c0_23] : memref<1x64x64xbf16, #tpu.memory_space<vmem>>, vector<1x64x64xbf16>
    %38 = vector.shape_cast %37 : vector<1x64x64xbf16> to vector<64x64xbf16>
    %c0_24 = arith.constant 0 : index
    %c0_25 = arith.constant 0 : index
    %c0_26 = arith.constant 0 : index
    %39 = vector.load %arg7[%c0_24, %c0_25, %c0_26] : memref<1x1x64xf32, #tpu.memory_space<vmem>>, vector<1x1x64xf32>
    %40 = vector.shape_cast %39 : vector<1x1x64xf32> to vector<1x64xf32>
    %41 = vector.shape_cast %32 : vector<2x8x64xf32> to vector<16x64xf32>
    %42 = arith.truncf %41 : vector<16x64xf32> to vector<16x64xbf16>
    %cst_27 = arith.constant dense<0.000000e+00> : vector<16x192xf32>
    %43 = tpu.matmul %42, %34, %cst_27 {dimension_numbers = #tpu.dot_dimension_numbers<[1], [0], [0], [1], [0, 0, 1, 1], [], []>} : vector<16x64xbf16>, vector<64x192xbf16>, vector<16x192xf32> -> vector<16x192xf32>
    %44 = vector.broadcast %36 : vector<1x192xf32> to vector<16x192xf32>
    %45 = arith.addf %43, %44 : vector<16x192xf32>
    %46 = vector.shape_cast %45 : vector<16x192xf32> to vector<2x8x192xf32>
    %47 = vector.extract_strided_slice %46 {offsets = [0, 0, 0], sizes = [2, 8, 32], strides = [1, 1, 1]} : vector<2x8x192xf32> to vector<2x8x32xf32>
    %48 = vector.extract_strided_slice %46 {offsets = [0, 0, 32], sizes = [2, 8, 32], strides = [1, 1, 1]} : vector<2x8x192xf32> to vector<2x8x32xf32>
    %49 = tpu.concatenate %47, %48 in 0 : vector<2x8x32xf32>, vector<2x8x32xf32> -> vector<4x8x32xf32>
    %50 = vector.extract_strided_slice %46 {offsets = [0, 0, 64], sizes = [2, 8, 32], strides = [1, 1, 1]} : vector<2x8x192xf32> to vector<2x8x32xf32>
    %51 = vector.extract_strided_slice %46 {offsets = [0, 0, 96], sizes = [2, 8, 32], strides = [1, 1, 1]} : vector<2x8x192xf32> to vector<2x8x32xf32>
    %52 = tpu.concatenate %50, %51 in 0 : vector<2x8x32xf32>, vector<2x8x32xf32> -> vector<4x8x32xf32>
    %53 = vector.extract_strided_slice %46 {offsets = [0, 0, 128], sizes = [2, 8, 32], strides = [1, 1, 1]} : vector<2x8x192xf32> to vector<2x8x32xf32>
    %54 = vector.extract_strided_slice %46 {offsets = [0, 0, 160], sizes = [2, 8, 32], strides = [1, 1, 1]} : vector<2x8x192xf32> to vector<2x8x32xf32>
    %55 = tpu.concatenate %53, %54 in 0 : vector<2x8x32xf32>, vector<2x8x32xf32> -> vector<4x8x32xf32>
    %56 = arith.truncf %49 : vector<4x8x32xf32> to vector<4x8x32xbf16>
    %57 = arith.truncf %52 : vector<4x8x32xf32> to vector<4x8x32xbf16>
    "tpu.trace_start"() <{level = 10 : i32, message = "bqd,bkd->bqk"}> : () -> ()
    %cst_28 = arith.constant dense<0.000000e+00> : vector<4x8x8xf32>
    %58 = tpu.matmul %56, %57, %cst_28 {dimension_numbers = #tpu.dot_dimension_numbers<[2], [2], [1], [1], [0, 0, 0, 1, 1, 1], [0], [0]>} : vector<4x8x32xbf16>, vector<4x8x32xbf16>, vector<4x8x8xf32> -> vector<4x8x8xf32>
    "tpu.trace_stop"() : () -> ()
    %59 = tpu.concatenate %4, %4 in 0 : vector<2x8xf32>, vector<2x8xf32> -> vector<4x8xf32>
    %60 = vector.shape_cast %59 : vector<4x8xf32> to vector<4x1x8xf32>
    %61 = vector.broadcast %60 : vector<4x1x8xf32> to vector<4x8x8xf32>
    %62 = arith.addf %58, %61 : vector<4x8x8xf32>
    %cst_29 = arith.constant dense<0xFF800000> : vector<4x8xf32>
    %63 = vector.multi_reduction <maximumf>, %62, %cst_29 [2] : vector<4x8x8xf32> to vector<4x8xf32>
    %64 = vector.shape_cast %63 : vector<4x8xf32> to vector<4x8x1xf32>
    %65 = vector.broadcast %64 : vector<4x8x1xf32> to vector<4x8x8xf32>
    %66 = arith.subf %62, %65 : vector<4x8x8xf32>
    %67 = math.exp %66 : vector<4x8x8xf32>
    %cst_30 = arith.constant dense<0.000000e+00> : vector<4x8xf32>
    %68 = vector.multi_reduction <add>, %67, %cst_30 [2] : vector<4x8x8xf32> to vector<4x8xf32>
    %69 = vector.shape_cast %68 : vector<4x8xf32> to vector<4x8x1xf32>
    %cst_31 = arith.constant 1.000000e+00 : f32
    %70 = vector.broadcast %cst_31 : f32 to vector<4x8x1xf32>
    %71 = arith.divf %70, %69 : vector<4x8x1xf32>
    %72 = vector.broadcast %71 : vector<4x8x1xf32> to vector<4x8x8xf32>
    %73 = arith.mulf %67, %72 : vector<4x8x8xf32>
    %74 = arith.truncf %73 : vector<4x8x8xf32> to vector<4x8x8xbf16>
    %75 = arith.truncf %55 : vector<4x8x32xf32> to vector<4x8x32xbf16>
    "tpu.trace_start"() <{level = 10 : i32, message = "bqk,bkd->bqd"}> : () -> ()
    %cst_32 = arith.constant dense<0.000000e+00> : vector<4x8x32xf32>
    %76 = tpu.matmul %74, %75, %cst_32 {dimension_numbers = #tpu.dot_dimension_numbers<[2], [1], [1], [2], [0, 0, 0, 1, 1, 2], [0], [0]>} : vector<4x8x8xbf16>, vector<4x8x32xbf16>, vector<4x8x32xf32> -> vector<4x8x32xf32>
    "tpu.trace_stop"() : () -> ()
    %77 = vector.extract_strided_slice %76 {offsets = [0, 0, 0], sizes = [2, 8, 32], strides = [1, 1, 1]} : vector<4x8x32xf32> to vector<2x8x32xf32>
    %78 = vector.extract_strided_slice %76 {offsets = [2, 0, 0], sizes = [2, 8, 32], strides = [1, 1, 1]} : vector<4x8x32xf32> to vector<2x8x32xf32>
    %79 = tpu.concatenate %77, %78 in 2 : vector<2x8x32xf32>, vector<2x8x32xf32> -> vector<2x8x64xf32>
    %80 = vector.shape_cast %79 : vector<2x8x64xf32> to vector<16x64xf32>
    %81 = arith.truncf %80 : vector<16x64xf32> to vector<16x64xbf16>
    %cst_33 = arith.constant dense<0.000000e+00> : vector<16x64xf32>
    %82 = tpu.matmul %81, %38, %cst_33 {dimension_numbers = #tpu.dot_dimension_numbers<[1], [0], [0], [1], [0, 0, 1, 1], [], []>} : vector<16x64xbf16>, vector<64x64xbf16>, vector<16x64xf32> -> vector<16x64xf32>
    %83 = vector.broadcast %40 : vector<1x64xf32> to vector<16x64xf32>
    %84 = arith.addf %82, %83 : vector<16x64xf32>
    %85 = vector.shape_cast %84 : vector<16x64xf32> to vector<2x8x64xf32>
    %86 = arith.addf %3, %85 : vector<2x8x64xf32>
    %c0_34 = arith.constant 0 : index
    %c0_35 = arith.constant 0 : index
    %c0_36 = arith.constant 0 : index
    %87 = vector.load %arg10[%c0_34, %c0_35, %c0_36] : memref<1x1x64xf32, #tpu.memory_space<vmem>>, vector<1x1x64xf32>
    %88 = vector.shape_cast %87 : vector<1x1x64xf32> to vector<1x64xf32>
    %c0_37 = arith.constant 0 : index
    %c0_38 = arith.constant 0 : index
    %c0_39 = arith.constant 0 : index
    %89 = vector.load %arg11[%c0_37, %c0_38, %c0_39] : memref<1x1x64xf32, #tpu.memory_space<vmem>>, vector<1x1x64xf32>
    %90 = vector.shape_cast %89 : vector<1x1x64xf32> to vector<1x64xf32>
    %cst_40 = arith.constant dense<0.000000e+00> : vector<2x8xf32>
    %91 = vector.multi_reduction <add>, %86, %cst_40 [2] : vector<2x8x64xf32> to vector<2x8xf32>
    %92 = vector.shape_cast %91 : vector<2x8xf32> to vector<2x8x1xf32>
    %cst_41 = arith.constant 6.400000e+01 : f32
    %93 = vector.broadcast %cst_41 : f32 to vector<2x8x1xf32>
    %94 = arith.divf %92, %93 : vector<2x8x1xf32>
    %95 = vector.broadcast %94 : vector<2x8x1xf32> to vector<2x8x64xf32>
    %96 = arith.subf %86, %95 : vector<2x8x64xf32>
    %97 = arith.mulf %96, %96 : vector<2x8x64xf32>
    %cst_42 = arith.constant dense<0.000000e+00> : vector<2x8xf32>
    %98 = vector.multi_reduction <add>, %97, %cst_42 [2] : vector<2x8x64xf32> to vector<2x8xf32>
    %99 = vector.shape_cast %98 : vector<2x8xf32> to vector<2x8x1xf32>
    %cst_43 = arith.constant 6.400000e+01 : f32
    %100 = vector.broadcast %cst_43 : f32 to vector<2x8x1xf32>
    %101 = arith.divf %99, %100 : vector<2x8x1xf32>
    %102 = vector.broadcast %94 : vector<2x8x1xf32> to vector<2x8x64xf32>
    %103 = arith.subf %86, %102 : vector<2x8x64xf32>
    %cst_44 = arith.constant 9.99999997E-7 : f32
    %104 = vector.broadcast %cst_44 : f32 to vector<2x8x1xf32>
    %105 = arith.addf %101, %104 : vector<2x8x1xf32>
    %106 = math.rsqrt %105 : vector<2x8x1xf32>
    %107 = vector.broadcast %106 : vector<2x8x1xf32> to vector<2x8x64xf32>
    %108 = arith.mulf %103, %107 : vector<2x8x64xf32>
    %109 = vector.shape_cast %88 : vector<1x64xf32> to vector<1x1x64xf32>
    %110 = vector.broadcast %109 : vector<1x1x64xf32> to vector<2x8x64xf32>
    %111 = arith.mulf %108, %110 : vector<2x8x64xf32>
    %112 = vector.shape_cast %90 : vector<1x64xf32> to vector<1x1x64xf32>
    %113 = vector.broadcast %112 : vector<1x1x64xf32> to vector<2x8x64xf32>
    %114 = arith.addf %111, %113 : vector<2x8x64xf32>
    %c0_45 = arith.constant 0 : index
    %c0_46 = arith.constant 0 : index
    %c0_47 = arith.constant 0 : index
    %115 = vector.load %arg12[%c0_45, %c0_46, %c0_47] : memref<1x64x128xbf16, #tpu.memory_space<vmem>>, vector<1x64x128xbf16>
    %116 = vector.shape_cast %115 : vector<1x64x128xbf16> to vector<64x128xbf16>
    %c0_48 = arith.constant 0 : index
    %c0_49 = arith.constant 0 : index
    %c0_50 = arith.constant 0 : index
    %117 = vector.load %arg13[%c0_48, %c0_49, %c0_50] : memref<1x1x128xf32, #tpu.memory_space<vmem>>, vector<1x1x128xf32>
    %118 = vector.shape_cast %117 : vector<1x1x128xf32> to vector<1x128xf32>
    %c0_51 = arith.constant 0 : index
    %c0_52 = arith.constant 0 : index
    %c0_53 = arith.constant 0 : index
    %119 = vector.load %arg14[%c0_51, %c0_52, %c0_53] : memref<1x128x64xbf16, #tpu.memory_space<vmem>>, vector<1x128x64xbf16>
    %120 = vector.shape_cast %119 : vector<1x128x64xbf16> to vector<128x64xbf16>
    %c0_54 = arith.constant 0 : index
    %c0_55 = arith.constant 0 : index
    %c0_56 = arith.constant 0 : index
    %121 = vector.load %arg15[%c0_54, %c0_55, %c0_56] : memref<1x1x64xf32, #tpu.memory_space<vmem>>, vector<1x1x64xf32>
    %122 = vector.shape_cast %121 : vector<1x1x64xf32> to vector<1x64xf32>
    %123 = vector.shape_cast %114 : vector<2x8x64xf32> to vector<16x64xf32>
    %124 = arith.truncf %123 : vector<16x64xf32> to vector<16x64xbf16>
    %cst_57 = arith.constant dense<0.000000e+00> : vector<16x128xf32>
    %125 = tpu.matmul %124, %116, %cst_57 {dimension_numbers = #tpu.dot_dimension_numbers<[1], [0], [0], [1], [0, 0, 1, 1], [], []>} : vector<16x64xbf16>, vector<64x128xbf16>, vector<16x128xf32> -> vector<16x128xf32>
    %126 = vector.broadcast %118 : vector<1x128xf32> to vector<16x128xf32>
    %127 = arith.addf %125, %126 : vector<16x128xf32>
    %cst_58 = arith.constant 0.000000e+00 : f32
    %128 = vector.broadcast %cst_58 : f32 to vector<16x128xf32>
    %129 = arith.maximumf %127, %128 : vector<16x128xf32>
    %130 = arith.truncf %129 : vector<16x128xf32> to vector<16x128xbf16>
    %cst_59 = arith.constant dense<0.000000e+00> : vector<16x64xf32>
    %131 = tpu.matmul %130, %120, %cst_59 {dimension_numbers = #tpu.dot_dimension_numbers<[1], [0], [0], [1], [0, 0, 1, 1], [], []>} : vector<16x128xbf16>, vector<128x64xbf16>, vector<16x64xf32> -> vector<16x64xf32>
    %132 = vector.broadcast %122 : vector<1x64xf32> to vector<16x64xf32>
    %133 = arith.addf %131, %132 : vector<16x64xf32>
    %134 = vector.shape_cast %133 : vector<16x64xf32> to vector<2x8x64xf32>
    %135 = arith.addf %86, %134 : vector<2x8x64xf32>
    %c1_i32 = arith.constant 1 : i32
    %136 = arith.cmpi slt, %arg1, %c1_i32 : i32
    %137 = arith.extui %136 : i1 to i32
    %c0_i32_60 = arith.constant 0 : i32
    %138 = arith.cmpi ne, %137, %c0_i32_60 : i32
    scf.if %138 {
      %c0_63 = arith.constant 0 : index
      %c0_64 = arith.constant 0 : index
      %c0_65 = arith.constant 0 : index
      %142 = vector.load %arg18[%c0_63, %c0_64, %c0_65] : memref<2x8x64xf32, #tpu.memory_space<vmem>>, vector<2x8x64xf32>
      tpu.vector_store %arg18[%c0_63, %c0_64, %c0_65], %135 {strides = array<i32>} : memref<2x8x64xf32, #tpu.memory_space<vmem>>, vector<2x8x64xf32>,
    } else {
    }
    %c1_i32_61 = arith.constant 1 : i32
    %139 = arith.cmpi eq, %arg1, %c1_i32_61 : i32
    %140 = arith.extui %139 : i1 to i32
    %c0_i32_62 = arith.constant 0 : i32
    %141 = arith.cmpi ne, %140, %c0_i32_62 : i32
    scf.if %141 {
      %c0_63 = arith.constant 0 : index
      %c0_64 = arith.constant 0 : index
      %142 = vector.load %arg16[%c0_63, %c0_64] : memref<1x64xf32, #tpu.memory_space<vmem>>, vector<1x64xf32>
      %c0_65 = arith.constant 0 : index
      %c0_66 = arith.constant 0 : index
      %143 = vector.load %arg17[%c0_65, %c0_66] : memref<1x64xf32, #tpu.memory_space<vmem>>, vector<1x64xf32>
      %cst_67 = arith.constant dense<0.000000e+00> : vector<2x8xf32>
      %144 = vector.multi_reduction <add>, %135, %cst_67 [2] : vector<2x8x64xf32> to vector<2x8xf32>
      %145 = vector.shape_cast %144 : vector<2x8xf32> to vector<2x8x1xf32>
      %cst_68 = arith.constant 6.400000e+01 : f32
      %146 = vector.broadcast %cst_68 : f32 to vector<2x8x1xf32>
      %147 = arith.divf %145, %146 : vector<2x8x1xf32>
      %148 = vector.broadcast %147 : vector<2x8x1xf32> to vector<2x8x64xf32>
      %149 = arith.subf %135, %148 : vector<2x8x64xf32>
      %150 = arith.mulf %149, %149 : vector<2x8x64xf32>
      %cst_69 = arith.constant dense<0.000000e+00> : vector<2x8xf32>
      %151 = vector.multi_reduction <add>, %150, %cst_69 [2] : vector<2x8x64xf32> to vector<2x8xf32>
      %152 = vector.shape_cast %151 : vector<2x8xf32> to vector<2x8x1xf32>
      %cst_70 = arith.constant 6.400000e+01 : f32
      %153 = vector.broadcast %cst_70 : f32 to vector<2x8x1xf32>
      %154 = arith.divf %152, %153 : vector<2x8x1xf32>
      %155 = vector.broadcast %147 : vector<2x8x1xf32> to vector<2x8x64xf32>
      %156 = arith.subf %135, %155 : vector<2x8x64xf32>
      %cst_71 = arith.constant 9.99999997E-7 : f32
      %157 = vector.broadcast %cst_71 : f32 to vector<2x8x1xf32>
      %158 = arith.addf %154, %157 : vector<2x8x1xf32>
      %159 = math.rsqrt %158 : vector<2x8x1xf32>
      %160 = vector.broadcast %159 : vector<2x8x1xf32> to vector<2x8x64xf32>
      %161 = arith.mulf %156, %160 : vector<2x8x64xf32>
      %162 = vector.shape_cast %142 : vector<1x64xf32> to vector<1x1x64xf32>
      %163 = vector.broadcast %162 : vector<1x1x64xf32> to vector<2x8x64xf32>
      %164 = arith.mulf %161, %163 : vector<2x8x64xf32>
      %165 = vector.shape_cast %143 : vector<1x64xf32> to vector<1x1x64xf32>
      %166 = vector.broadcast %165 : vector<1x1x64xf32> to vector<2x8x64xf32>
      %167 = arith.addf %164, %166 : vector<2x8x64xf32>
      %c0_72 = arith.constant 0 : index
      %c0_73 = arith.constant 0 : index
      %c0_74 = arith.constant 0 : index
      %168 = vector.load %arg18[%c0_72, %c0_73, %c0_74] : memref<2x8x64xf32, #tpu.memory_space<vmem>>, vector<2x8x64xf32>
      tpu.vector_store %arg18[%c0_72, %c0_73, %c0_74], %167 {strides = array<i32>} : memref<2x8x64xf32, #tpu.memory_space<vmem>>, vector<2x8x64xf32>,
    } else {
    }
    return
  }
  func.func @transform_0(%arg0: i32, %arg1: i32) -> (i32, i32, i32) {
    %c0_i32 = arith.constant 0 : i32
    %c0_i32_0 = arith.constant 0 : i32
    %c0_i32_1 = arith.constant 0 : i32
    return %arg0, %c0_i32, %c0_i32_0 : i32, i32, i32
  }
  func.func @transform_1(%arg0: i32, %arg1: i32) -> (i32, i32) {
    %c0_i32 = arith.constant 0 : i32
    %c0_i32_0 = arith.constant 0 : i32
    return %arg0, %c0_i32 : i32, i32
  }
  func.func @transform_2(%arg0: i32, %arg1: i32) -> (i32, i32, i32) {
    %c0_i32 = arith.constant 0 : i32
    %c0_i32_0 = arith.constant 0 : i32
    %c0_i32_1 = arith.constant 0 : i32
    return %arg1, %c0_i32, %c0_i32_0 : i32, i32, i32
  }
  func.func @transform_3(%arg0: i32, %arg1: i32) -> (i32, i32, i32) {
    %c0_i32 = arith.constant 0 : i32
    %c0_i32_0 = arith.constant 0 : i32
    %c0_i32_1 = arith.constant 0 : i32
    return %arg1, %c0_i32, %c0_i32_0 : i32, i32, i32
  }
  func.func @transform_4(%arg0: i32, %arg1: i32) -> (i32, i32, i32) {
    %c0_i32 = arith.constant 0 : i32
    %c0_i32_0 = arith.constant 0 : i32
    %c0_i32_1 = arith.constant 0 : i32
    return %arg1, %c0_i32, %c0_i32_0 : i32, i32, i32
  }
  func.func @transform_5(%arg0: i32, %arg1: i32) -> (i32, i32, i32) {
    %c0_i32 = arith.constant 0 : i32
    %c0_i32_0 = arith.constant 0 : i32
    %c0_i32_1 = arith.constant 0 : i32
    return %arg1, %c0_i32, %c0_i32_0 : i32, i32, i32
  }
  func.func @transform_6(%arg0: i32, %arg1: i32) -> (i32, i32, i32) {
    %c0_i32 = arith.constant 0 : i32
    %c0_i32_0 = arith.constant 0 : i32
    %c0_i32_1 = arith.constant 0 : i32
    return %arg1, %c0_i32, %c0_i32_0 : i32, i32, i32
  }
  func.func @transform_7(%arg0: i32, %arg1: i32) -> (i32, i32, i32) {
    %c0_i32 = arith.constant 0 : i32
    %c0_i32_0 = arith.constant 0 : i32
    %c0_i32_1 = arith.constant 0 : i32
    return %arg1, %c0_i32, %c0_i32_0 : i32, i32, i32
  }
  func.func @transform_8(%arg0: i32, %arg1: i32) -> (i32, i32, i32) {
    %c0_i32 = arith.constant 0 : i32
    %c0_i32_0 = arith.constant 0 : i32
    %c0_i32_1 = arith.constant 0 : i32
    return %arg1, %c0_i32, %c0_i32_0 : i32, i32, i32
  }
  func.func @transform_9(%arg0: i32, %arg1: i32) -> (i32, i32, i32) {
    %c0_i32 = arith.constant 0 : i32
    %c0_i32_0 = arith.constant 0 : i32
    %c0_i32_1 = arith.constant 0 : i32
    return %arg1, %c0_i32, %c0_i32_0 : i32, i32, i32
  }
  func.func @transform_10(%arg0: i32, %arg1: i32) -> (i32, i32, i32) {
    %c0_i32 = arith.constant 0 : i32
    %c0_i32_0 = arith.constant 0 : i32
    %c0_i32_1 = arith.constant 0 : i32
    return %arg1, %c0_i32, %c0_i32_0 : i32, i32, i32
  }
  func.func @transform_11(%arg0: i32, %arg1: i32) -> (i32, i32, i32) {
    %c0_i32 = arith.constant 0 : i32
    %c0_i32_0 = arith.constant 0 : i32
    %c0_i32_1 = arith.constant 0 : i32
    return %arg1, %c0_i32, %c0_i32_0 : i32, i32, i32
  }
  func.func @transform_12(%arg0: i32, %arg1: i32) -> (i32, i32, i32) {
    %c0_i32 = arith.constant 0 : i32
    %c0_i32_0 = arith.constant 0 : i32
    %c0_i32_1 = arith.constant 0 : i32
    return %arg1, %c0_i32, %c0_i32_0 : i32, i32, i32
  }
  func.func @transform_13(%arg0: i32, %arg1: i32) -> (i32, i32, i32) {
    %c0_i32 = arith.constant 0 : i32
    %c0_i32_0 = arith.constant 0 : i32
    %c0_i32_1 = arith.constant 0 : i32
    return %arg1, %c0_i32, %c0_i32_0 : i32, i32, i32
  }
  func.func @transform_14(%arg0: i32, %arg1: i32) -> (i32, i32) {
    %c0_i32 = arith.constant 0 : i32
    %c0_i32_0 = arith.constant 0 : i32
    %c0_i32_1 = arith.constant 0 : i32
    return %c0_i32, %c0_i32_0 : i32, i32
  }
  func.func @transform_15(%arg0: i32, %arg1: i32) -> (i32, i32) {
    %c0_i32 = arith.constant 0 : i32
    %c0_i32_0 = arith.constant 0 : i32
    %c0_i32_1 = arith.constant 0 : i32
    return %c0_i32, %c0_i32_0 : i32, i32
  }
  func.func @transform_16(%arg0: i32, %arg1: i32) -> (i32, i32, i32) {
    %c0_i32 = arith.constant 0 : i32
    %c0_i32_0 = arith.constant 0 : i32
    %c0_i32_1 = arith.constant 0 : i32
    return %arg0, %c0_i32, %c0_i32_0 : i32, i32, i32
  }
}

module attributes {stable_mosaic.version = 11 : i64} {
  func.func @kernel(%arg0: i32, %arg1: i32, %arg2: memref<8x2x64xf32, #tpu.memory_space<vmem>>, %arg3: memref<1x64x192xbf16, #tpu.memory_space<vmem>>, %arg4: memref<1x1x192xf32, #tpu.memory_space<vmem>>, %arg5: memref<1x64x64xbf16, #tpu.memory_space<vmem>>, %arg6: memref<1x1x64xf32, #tpu.memory_space<vmem>>, %arg7: memref<1x1x64xf32, #tpu.memory_space<vmem>>, %arg8: memref<1x1x64xf32, #tpu.memory_space<vmem>>, %arg9: memref<1x1x64xf32, #tpu.memory_space<vmem>>, %arg10: memref<1x1x64xf32, #tpu.memory_space<vmem>>, %arg11: memref<1x64x128xbf16, #tpu.memory_space<vmem>>, %arg12: memref<1x1x128xf32, #tpu.memory_space<vmem>>, %arg13: memref<1x128x64xbf16, #tpu.memory_space<vmem>>, %arg14: memref<1x1x64xf32, #tpu.memory_space<vmem>>, %arg15: memref<1x64xf32, #tpu.memory_space<vmem>>, %arg16: memref<1x64xf32, #tpu.memory_space<vmem>>, %arg17: memref<64x128xf32, #tpu.memory_space<vmem>>, %arg18: memref<1x128xf32, #tpu.memory_space<vmem>>, %arg19: memref<1x128xf32, #tpu.memory_space<vmem>>, %arg20: memref<8x2x128xf32, #tpu.memory_space<vmem>>, %arg21: memref<8x2x64xf32, #tpu.memory_space<vmem>>) attributes {dimension_semantics = [#tpu.dimension_semantics<parallel>, #tpu.dimension_semantics<arbitrary>], iteration_bounds = array<i64: 1, 2>, scalar_prefetch = 0 : i64, scratch_operands = 1 : i64, tpu.core_type = #tpu.core_type<tc>, window_params = [{pipeline_mode = #tpu.pipeline_mode<synchronous>, transform_indices = @transform_0, window_bounds = array<i64: 8, 2, 64>}, {transform_indices = @transform_1, window_bounds = array<i64: 1, 64, 192>}, {transform_indices = @transform_2, window_bounds = array<i64: 1, 1, 192>}, {transform_indices = @transform_3, window_bounds = array<i64: 1, 64, 64>}, {transform_indices = @transform_4, window_bounds = array<i64: 1, 1, 64>}, {transform_indices = @transform_5, window_bounds = array<i64: 1, 1, 64>}, {transform_indices = @transform_6, window_bounds = array<i64: 1, 1, 64>}, {transform_indices = @transform_7, window_bounds = array<i64: 1, 1, 64>}, {transform_indices = @transform_8, window_bounds = array<i64: 1, 1, 64>}, {transform_indices = @transform_9, window_bounds = array<i64: 1, 64, 128>}, {transform_indices = @transform_10, window_bounds = array<i64: 1, 1, 128>}, {transform_indices = @transform_11, window_bounds = array<i64: 1, 128, 64>}, {transform_indices = @transform_12, window_bounds = array<i64: 1, 1, 64>}, {pipeline_mode = #tpu.pipeline_mode<synchronous>, transform_indices = @transform_13, window_bounds = array<i64: 1, 64>}, {pipeline_mode = #tpu.pipeline_mode<synchronous>, transform_indices = @transform_14, window_bounds = array<i64: 1, 64>}, {pipeline_mode = #tpu.pipeline_mode<synchronous>, transform_indices = @transform_15, window_bounds = array<i64: 64, 128>}, {pipeline_mode = #tpu.pipeline_mode<synchronous>, transform_indices = @transform_16, window_bounds = array<i64: 1, 128>}, {pipeline_mode = #tpu.pipeline_mode<synchronous>, transform_indices = @transform_17, window_bounds = array<i64: 1, 128>}, {transform_indices = @transform_18, window_bounds = array<i64: 8, 2, 128>}]} {
    %c0_i32 = arith.constant 0 : i32
    %0 = arith.cmpi eq, %arg1, %c0_i32 : i32
    %1 = arith.extui %0 : i1 to i32
    %c0_i32_0 = arith.constant 0 : i32
    %2 = arith.cmpi ne, %1, %c0_i32_0 : i32
    scf.if %2 {
      %c0_62 = arith.constant 0 : index
      %c0_63 = arith.constant 0 : index
      %c0_64 = arith.constant 0 : index
      %135 = vector.load %arg2[%c0_62, %c0_63, %c0_64] : memref<8x2x64xf32, #tpu.memory_space<vmem>>, vector<8x2x64xf32>
      %c0_65 = arith.constant 0 : index
      %c0_66 = arith.constant 0 : index
      %c0_67 = arith.constant 0 : index
      %136 = vector.load %arg21[%c0_65, %c0_66, %c0_67] : memref<8x2x64xf32, #tpu.memory_space<vmem>>, vector<8x2x64xf32>
      tpu.vector_store %arg21[%c0_65, %c0_66, %c0_67], %135 {strides = array<i32>} : memref<8x2x64xf32, #tpu.memory_space<vmem>>, vector<8x2x64xf32>,
    } else {
    }
    %c0 = arith.constant 0 : index
    %c0_1 = arith.constant 0 : index
    %c0_2 = arith.constant 0 : index
    %3 = vector.load %arg21[%c0, %c0_1, %c0_2] : memref<8x2x64xf32, #tpu.memory_space<vmem>>, vector<8x2x64xf32>
    %c0_3 = arith.constant 0 : index
    %c0_4 = arith.constant 0 : index
    %c0_5 = arith.constant 0 : index
    %4 = vector.load %arg3[%c0_3, %c0_4, %c0_5] : memref<1x64x192xbf16, #tpu.memory_space<vmem>>, vector<1x64x192xbf16>
    %5 = vector.shape_cast %4 : vector<1x64x192xbf16> to vector<64x192xbf16>
    %c0_6 = arith.constant 0 : index
    %c0_7 = arith.constant 0 : index
    %c0_8 = arith.constant 0 : index
    %6 = vector.load %arg4[%c0_6, %c0_7, %c0_8] : memref<1x1x192xf32, #tpu.memory_space<vmem>>, vector<1x1x192xf32>
    %7 = vector.shape_cast %6 : vector<1x1x192xf32> to vector<1x192xf32>
    %c0_9 = arith.constant 0 : index
    %c0_10 = arith.constant 0 : index
    %c0_11 = arith.constant 0 : index
    %8 = vector.load %arg5[%c0_9, %c0_10, %c0_11] : memref<1x64x64xbf16, #tpu.memory_space<vmem>>, vector<1x64x64xbf16>
    %9 = vector.shape_cast %8 : vector<1x64x64xbf16> to vector<64x64xbf16>
    %c0_12 = arith.constant 0 : index
    %c0_13 = arith.constant 0 : index
    %c0_14 = arith.constant 0 : index
    %10 = vector.load %arg6[%c0_12, %c0_13, %c0_14] : memref<1x1x64xf32, #tpu.memory_space<vmem>>, vector<1x1x64xf32>
    %11 = vector.shape_cast %10 : vector<1x1x64xf32> to vector<1x64xf32>
    %12 = vector.shape_cast %3 : vector<8x2x64xf32> to vector<16x64xf32>
    %13 = arith.truncf %12 : vector<16x64xf32> to vector<16x64xbf16>
    %cst = arith.constant dense<0.000000e+00> : vector<16x192xf32>
    %14 = tpu.matmul %13, %5, %cst {dimension_numbers = #tpu.dot_dimension_numbers<[1], [0], [0], [1], [0, 0, 1, 1], [], []>} : vector<16x64xbf16>, vector<64x192xbf16>, vector<16x192xf32> -> vector<16x192xf32>
    %15 = vector.broadcast %7 : vector<1x192xf32> to vector<16x192xf32>
    %16 = arith.addf %14, %15 : vector<16x192xf32>
    %17 = vector.shape_cast %16 : vector<16x192xf32> to vector<8x2x192xf32>
    %18 = vector.extract_strided_slice %17 {offsets = [0, 0, 0], sizes = [8, 2, 32], strides = [1, 1, 1]} : vector<8x2x192xf32> to vector<8x2x32xf32>
    %19 = vector.extract_strided_slice %17 {offsets = [0, 0, 32], sizes = [8, 2, 32], strides = [1, 1, 1]} : vector<8x2x192xf32> to vector<8x2x32xf32>
    %20 = tpu.concatenate %18, %19 in 0 : vector<8x2x32xf32>, vector<8x2x32xf32> -> vector<16x2x32xf32>
    %21 = vector.extract_strided_slice %17 {offsets = [0, 0, 64], sizes = [8, 2, 32], strides = [1, 1, 1]} : vector<8x2x192xf32> to vector<8x2x32xf32>
    %22 = vector.extract_strided_slice %17 {offsets = [0, 0, 96], sizes = [8, 2, 32], strides = [1, 1, 1]} : vector<8x2x192xf32> to vector<8x2x32xf32>
    %23 = tpu.concatenate %21, %22 in 0 : vector<8x2x32xf32>, vector<8x2x32xf32> -> vector<16x2x32xf32>
    %24 = vector.extract_strided_slice %17 {offsets = [0, 0, 128], sizes = [8, 2, 32], strides = [1, 1, 1]} : vector<8x2x192xf32> to vector<8x2x32xf32>
    %25 = vector.extract_strided_slice %17 {offsets = [0, 0, 160], sizes = [8, 2, 32], strides = [1, 1, 1]} : vector<8x2x192xf32> to vector<8x2x32xf32>
    %26 = tpu.concatenate %24, %25 in 0 : vector<8x2x32xf32>, vector<8x2x32xf32> -> vector<16x2x32xf32>
    %27 = arith.truncf %20 : vector<16x2x32xf32> to vector<16x2x32xbf16>
    %28 = arith.truncf %23 : vector<16x2x32xf32> to vector<16x2x32xbf16>
    "tpu.trace_start"() <{level = 10 : i32, message = "bqd,bkd->bqk"}> : () -> ()
    %cst_15 = arith.constant dense<0.000000e+00> : vector<16x2x2xf32>
    %29 = tpu.matmul %27, %28, %cst_15 {dimension_numbers = #tpu.dot_dimension_numbers<[2], [2], [1], [1], [0, 0, 0, 1, 1, 1], [0], [0]>} : vector<16x2x32xbf16>, vector<16x2x32xbf16>, vector<16x2x2xf32> -> vector<16x2x2xf32>
    "tpu.trace_stop"() : () -> ()
    %cst_16 = arith.constant dense<0xFF800000> : vector<16x2xf32>
    %30 = vector.multi_reduction <maximumf>, %29, %cst_16 [2] : vector<16x2x2xf32> to vector<16x2xf32>
    %31 = vector.shape_cast %30 : vector<16x2xf32> to vector<16x2x1xf32>
    %32 = vector.broadcast %31 : vector<16x2x1xf32> to vector<16x2x2xf32>
    %33 = arith.subf %29, %32 : vector<16x2x2xf32>
    %34 = math.exp %33 : vector<16x2x2xf32>
    %cst_17 = arith.constant dense<0.000000e+00> : vector<16x2xf32>
    %35 = vector.multi_reduction <add>, %34, %cst_17 [2] : vector<16x2x2xf32> to vector<16x2xf32>
    %36 = vector.shape_cast %35 : vector<16x2xf32> to vector<16x2x1xf32>
    %cst_18 = arith.constant 1.000000e+00 : f32
    %37 = vector.broadcast %cst_18 : f32 to vector<16x2x1xf32>
    %38 = arith.divf %37, %36 : vector<16x2x1xf32>
    %39 = vector.broadcast %38 : vector<16x2x1xf32> to vector<16x2x2xf32>
    %40 = arith.mulf %34, %39 : vector<16x2x2xf32>
    %41 = arith.truncf %40 : vector<16x2x2xf32> to vector<16x2x2xbf16>
    %42 = arith.truncf %26 : vector<16x2x32xf32> to vector<16x2x32xbf16>
    "tpu.trace_start"() <{level = 10 : i32, message = "bqk,bkd->bqd"}> : () -> ()
    %cst_19 = arith.constant dense<0.000000e+00> : vector<16x2x32xf32>
    %43 = tpu.matmul %41, %42, %cst_19 {dimension_numbers = #tpu.dot_dimension_numbers<[2], [1], [1], [2], [0, 0, 0, 1, 1, 2], [0], [0]>} : vector<16x2x2xbf16>, vector<16x2x32xbf16>, vector<16x2x32xf32> -> vector<16x2x32xf32>
    "tpu.trace_stop"() : () -> ()
    %44 = vector.extract_strided_slice %43 {offsets = [0, 0, 0], sizes = [8, 2, 32], strides = [1, 1, 1]} : vector<16x2x32xf32> to vector<8x2x32xf32>
    %45 = vector.extract_strided_slice %43 {offsets = [8, 0, 0], sizes = [8, 2, 32], strides = [1, 1, 1]} : vector<16x2x32xf32> to vector<8x2x32xf32>
    %46 = tpu.concatenate %44, %45 in 2 : vector<8x2x32xf32>, vector<8x2x32xf32> -> vector<8x2x64xf32>
    %47 = vector.shape_cast %46 : vector<8x2x64xf32> to vector<16x64xf32>
    %48 = arith.truncf %47 : vector<16x64xf32> to vector<16x64xbf16>
    %cst_20 = arith.constant dense<0.000000e+00> : vector<16x64xf32>
    %49 = tpu.matmul %48, %9, %cst_20 {dimension_numbers = #tpu.dot_dimension_numbers<[1], [0], [0], [1], [0, 0, 1, 1], [], []>} : vector<16x64xbf16>, vector<64x64xbf16>, vector<16x64xf32> -> vector<16x64xf32>
    %50 = vector.broadcast %11 : vector<1x64xf32> to vector<16x64xf32>
    %51 = arith.addf %49, %50 : vector<16x64xf32>
    %52 = vector.shape_cast %51 : vector<16x64xf32> to vector<8x2x64xf32>
    %53 = arith.addf %3, %52 : vector<8x2x64xf32>
    %c0_21 = arith.constant 0 : index
    %c0_22 = arith.constant 0 : index
    %c0_23 = arith.constant 0 : index
    %54 = vector.load %arg7[%c0_21, %c0_22, %c0_23] : memref<1x1x64xf32, #tpu.memory_space<vmem>>, vector<1x1x64xf32>
    %55 = vector.shape_cast %54 : vector<1x1x64xf32> to vector<1x64xf32>
    %c0_24 = arith.constant 0 : index
    %c0_25 = arith.constant 0 : index
    %c0_26 = arith.constant 0 : index
    %56 = vector.load %arg8[%c0_24, %c0_25, %c0_26] : memref<1x1x64xf32, #tpu.memory_space<vmem>>, vector<1x1x64xf32>
    %57 = vector.shape_cast %56 : vector<1x1x64xf32> to vector<1x64xf32>
    %cst_27 = arith.constant dense<0.000000e+00> : vector<8x2xf32>
    %58 = vector.multi_reduction <add>, %53, %cst_27 [2] : vector<8x2x64xf32> to vector<8x2xf32>
    %59 = vector.shape_cast %58 : vector<8x2xf32> to vector<8x2x1xf32>
    %cst_28 = arith.constant 6.400000e+01 : f32
    %60 = vector.broadcast %cst_28 : f32 to vector<8x2x1xf32>
    %61 = arith.divf %59, %60 : vector<8x2x1xf32>
    %62 = vector.broadcast %61 : vector<8x2x1xf32> to vector<8x2x64xf32>
    %63 = arith.subf %53, %62 : vector<8x2x64xf32>
    %64 = arith.mulf %63, %63 : vector<8x2x64xf32>
    %cst_29 = arith.constant dense<0.000000e+00> : vector<8x2xf32>
    %65 = vector.multi_reduction <add>, %64, %cst_29 [2] : vector<8x2x64xf32> to vector<8x2xf32>
    %66 = vector.shape_cast %65 : vector<8x2xf32> to vector<8x2x1xf32>
    %cst_30 = arith.constant 6.400000e+01 : f32
    %67 = vector.broadcast %cst_30 : f32 to vector<8x2x1xf32>
    %68 = arith.divf %66, %67 : vector<8x2x1xf32>
    %69 = vector.broadcast %61 : vector<8x2x1xf32> to vector<8x2x64xf32>
    %70 = arith.subf %53, %69 : vector<8x2x64xf32>
    %cst_31 = arith.constant 9.99999974E-6 : f32
    %71 = vector.broadcast %cst_31 : f32 to vector<8x2x1xf32>
    %72 = arith.addf %68, %71 : vector<8x2x1xf32>
    %73 = math.rsqrt %72 : vector<8x2x1xf32>
    %74 = vector.broadcast %73 : vector<8x2x1xf32> to vector<8x2x64xf32>
    %75 = arith.mulf %70, %74 : vector<8x2x64xf32>
    %76 = vector.shape_cast %55 : vector<1x64xf32> to vector<1x1x64xf32>
    %77 = vector.broadcast %76 : vector<1x1x64xf32> to vector<8x2x64xf32>
    %78 = arith.mulf %75, %77 : vector<8x2x64xf32>
    %79 = vector.shape_cast %57 : vector<1x64xf32> to vector<1x1x64xf32>
    %80 = vector.broadcast %79 : vector<1x1x64xf32> to vector<8x2x64xf32>
    %81 = arith.addf %78, %80 : vector<8x2x64xf32>
    %c0_32 = arith.constant 0 : index
    %c0_33 = arith.constant 0 : index
    %c0_34 = arith.constant 0 : index
    %82 = vector.load %arg11[%c0_32, %c0_33, %c0_34] : memref<1x64x128xbf16, #tpu.memory_space<vmem>>, vector<1x64x128xbf16>
    %83 = vector.shape_cast %82 : vector<1x64x128xbf16> to vector<64x128xbf16>
    %c0_35 = arith.constant 0 : index
    %c0_36 = arith.constant 0 : index
    %c0_37 = arith.constant 0 : index
    %84 = vector.load %arg12[%c0_35, %c0_36, %c0_37] : memref<1x1x128xf32, #tpu.memory_space<vmem>>, vector<1x1x128xf32>
    %85 = vector.shape_cast %84 : vector<1x1x128xf32> to vector<1x128xf32>
    %c0_38 = arith.constant 0 : index
    %c0_39 = arith.constant 0 : index
    %c0_40 = arith.constant 0 : index
    %86 = vector.load %arg13[%c0_38, %c0_39, %c0_40] : memref<1x128x64xbf16, #tpu.memory_space<vmem>>, vector<1x128x64xbf16>
    %87 = vector.shape_cast %86 : vector<1x128x64xbf16> to vector<128x64xbf16>
    %c0_41 = arith.constant 0 : index
    %c0_42 = arith.constant 0 : index
    %c0_43 = arith.constant 0 : index
    %88 = vector.load %arg14[%c0_41, %c0_42, %c0_43] : memref<1x1x64xf32, #tpu.memory_space<vmem>>, vector<1x1x64xf32>
    %89 = vector.shape_cast %88 : vector<1x1x64xf32> to vector<1x64xf32>
    %90 = vector.shape_cast %81 : vector<8x2x64xf32> to vector<16x64xf32>
    %91 = arith.truncf %90 : vector<16x64xf32> to vector<16x64xbf16>
    %cst_44 = arith.constant dense<0.000000e+00> : vector<16x128xf32>
    %92 = tpu.matmul %91, %83, %cst_44 {dimension_numbers = #tpu.dot_dimension_numbers<[1], [0], [0], [1], [0, 0, 1, 1], [], []>} : vector<16x64xbf16>, vector<64x128xbf16>, vector<16x128xf32> -> vector<16x128xf32>
    %93 = vector.broadcast %85 : vector<1x128xf32> to vector<16x128xf32>
    %94 = arith.addf %92, %93 : vector<16x128xf32>
    %cst_45 = arith.constant 0.000000e+00 : f32
    %95 = vector.broadcast %cst_45 : f32 to vector<16x128xf32>
    %96 = arith.maximumf %94, %95 : vector<16x128xf32>
    %97 = arith.truncf %96 : vector<16x128xf32> to vector<16x128xbf16>
    %cst_46 = arith.constant dense<0.000000e+00> : vector<16x64xf32>
    %98 = tpu.matmul %97, %87, %cst_46 {dimension_numbers = #tpu.dot_dimension_numbers<[1], [0], [0], [1], [0, 0, 1, 1], [], []>} : vector<16x128xbf16>, vector<128x64xbf16>, vector<16x64xf32> -> vector<16x64xf32>
    %99 = vector.broadcast %89 : vector<1x64xf32> to vector<16x64xf32>
    %100 = arith.addf %98, %99 : vector<16x64xf32>
    %101 = vector.shape_cast %100 : vector<16x64xf32> to vector<8x2x64xf32>
    %102 = arith.addf %81, %101 : vector<8x2x64xf32>
    %c0_47 = arith.constant 0 : index
    %c0_48 = arith.constant 0 : index
    %c0_49 = arith.constant 0 : index
    %103 = vector.load %arg9[%c0_47, %c0_48, %c0_49] : memref<1x1x64xf32, #tpu.memory_space<vmem>>, vector<1x1x64xf32>
    %104 = vector.shape_cast %103 : vector<1x1x64xf32> to vector<1x64xf32>
    %c0_50 = arith.constant 0 : index
    %c0_51 = arith.constant 0 : index
    %c0_52 = arith.constant 0 : index
    %105 = vector.load %arg10[%c0_50, %c0_51, %c0_52] : memref<1x1x64xf32, #tpu.memory_space<vmem>>, vector<1x1x64xf32>
    %106 = vector.shape_cast %105 : vector<1x1x64xf32> to vector<1x64xf32>
    %cst_53 = arith.constant dense<0.000000e+00> : vector<8x2xf32>
    %107 = vector.multi_reduction <add>, %102, %cst_53 [2] : vector<8x2x64xf32> to vector<8x2xf32>
    %108 = vector.shape_cast %107 : vector<8x2xf32> to vector<8x2x1xf32>
    %cst_54 = arith.constant 6.400000e+01 : f32
    %109 = vector.broadcast %cst_54 : f32 to vector<8x2x1xf32>
    %110 = arith.divf %108, %109 : vector<8x2x1xf32>
    %111 = vector.broadcast %110 : vector<8x2x1xf32> to vector<8x2x64xf32>
    %112 = arith.subf %102, %111 : vector<8x2x64xf32>
    %113 = arith.mulf %112, %112 : vector<8x2x64xf32>
    %cst_55 = arith.constant dense<0.000000e+00> : vector<8x2xf32>
    %114 = vector.multi_reduction <add>, %113, %cst_55 [2] : vector<8x2x64xf32> to vector<8x2xf32>
    %115 = vector.shape_cast %114 : vector<8x2xf32> to vector<8x2x1xf32>
    %cst_56 = arith.constant 6.400000e+01 : f32
    %116 = vector.broadcast %cst_56 : f32 to vector<8x2x1xf32>
    %117 = arith.divf %115, %116 : vector<8x2x1xf32>
    %118 = vector.broadcast %110 : vector<8x2x1xf32> to vector<8x2x64xf32>
    %119 = arith.subf %102, %118 : vector<8x2x64xf32>
    %cst_57 = arith.constant 9.99999974E-6 : f32
    %120 = vector.broadcast %cst_57 : f32 to vector<8x2x1xf32>
    %121 = arith.addf %117, %120 : vector<8x2x1xf32>
    %122 = math.rsqrt %121 : vector<8x2x1xf32>
    %123 = vector.broadcast %122 : vector<8x2x1xf32> to vector<8x2x64xf32>
    %124 = arith.mulf %119, %123 : vector<8x2x64xf32>
    %125 = vector.shape_cast %104 : vector<1x64xf32> to vector<1x1x64xf32>
    %126 = vector.broadcast %125 : vector<1x1x64xf32> to vector<8x2x64xf32>
    %127 = arith.mulf %124, %126 : vector<8x2x64xf32>
    %128 = vector.shape_cast %106 : vector<1x64xf32> to vector<1x1x64xf32>
    %129 = vector.broadcast %128 : vector<1x1x64xf32> to vector<8x2x64xf32>
    %130 = arith.addf %127, %129 : vector<8x2x64xf32>
    %c0_58 = arith.constant 0 : index
    %c0_59 = arith.constant 0 : index
    %c0_60 = arith.constant 0 : index
    %131 = vector.load %arg21[%c0_58, %c0_59, %c0_60] : memref<8x2x64xf32, #tpu.memory_space<vmem>>, vector<8x2x64xf32>
    tpu.vector_store %arg21[%c0_58, %c0_59, %c0_60], %130 {strides = array<i32>} : memref<8x2x64xf32, #tpu.memory_space<vmem>>, vector<8x2x64xf32>,
    %c1_i32 = arith.constant 1 : i32
    %132 = arith.cmpi eq, %arg1, %c1_i32 : i32
    %133 = arith.extui %132 : i1 to i32
    %c0_i32_61 = arith.constant 0 : i32
    %134 = arith.cmpi ne, %133, %c0_i32_61 : i32
    scf.if %134 {
      %c0_62 = arith.constant 0 : index
      %c0_63 = arith.constant 0 : index
      %135 = vector.load %arg15[%c0_62, %c0_63] : memref<1x64xf32, #tpu.memory_space<vmem>>, vector<1x64xf32>
      %c0_64 = arith.constant 0 : index
      %c0_65 = arith.constant 0 : index
      %136 = vector.load %arg16[%c0_64, %c0_65] : memref<1x64xf32, #tpu.memory_space<vmem>>, vector<1x64xf32>
      %cst_66 = arith.constant dense<0.000000e+00> : vector<8x2xf32>
      %137 = vector.multi_reduction <add>, %130, %cst_66 [2] : vector<8x2x64xf32> to vector<8x2xf32>
      %138 = vector.shape_cast %137 : vector<8x2xf32> to vector<8x2x1xf32>
      %cst_67 = arith.constant 6.400000e+01 : f32
      %139 = vector.broadcast %cst_67 : f32 to vector<8x2x1xf32>
      %140 = arith.divf %138, %139 : vector<8x2x1xf32>
      %141 = vector.broadcast %140 : vector<8x2x1xf32> to vector<8x2x64xf32>
      %142 = arith.subf %130, %141 : vector<8x2x64xf32>
      %143 = arith.mulf %142, %142 : vector<8x2x64xf32>
      %cst_68 = arith.constant dense<0.000000e+00> : vector<8x2xf32>
      %144 = vector.multi_reduction <add>, %143, %cst_68 [2] : vector<8x2x64xf32> to vector<8x2xf32>
      %145 = vector.shape_cast %144 : vector<8x2xf32> to vector<8x2x1xf32>
      %cst_69 = arith.constant 6.400000e+01 : f32
      %146 = vector.broadcast %cst_69 : f32 to vector<8x2x1xf32>
      %147 = arith.divf %145, %146 : vector<8x2x1xf32>
      %148 = vector.broadcast %140 : vector<8x2x1xf32> to vector<8x2x64xf32>
      %149 = arith.subf %130, %148 : vector<8x2x64xf32>
      %cst_70 = arith.constant 9.99999993E-9 : f32
      %150 = vector.broadcast %cst_70 : f32 to vector<8x2x1xf32>
      %151 = arith.addf %147, %150 : vector<8x2x1xf32>
      %152 = math.rsqrt %151 : vector<8x2x1xf32>
      %153 = vector.broadcast %152 : vector<8x2x1xf32> to vector<8x2x64xf32>
      %154 = arith.mulf %149, %153 : vector<8x2x64xf32>
      %155 = vector.shape_cast %135 : vector<1x64xf32> to vector<1x1x64xf32>
      %156 = vector.broadcast %155 : vector<1x1x64xf32> to vector<8x2x64xf32>
      %157 = arith.mulf %154, %156 : vector<8x2x64xf32>
      %158 = vector.shape_cast %136 : vector<1x64xf32> to vector<1x1x64xf32>
      %159 = vector.broadcast %158 : vector<1x1x64xf32> to vector<8x2x64xf32>
      %160 = arith.addf %157, %159 : vector<8x2x64xf32>
      %161 = vector.shape_cast %160 : vector<8x2x64xf32> to vector<16x64xf32>
      %c0_71 = arith.constant 0 : index
      %c0_72 = arith.constant 0 : index
      %162 = vector.load %arg17[%c0_71, %c0_72] : memref<64x128xf32, #tpu.memory_space<vmem>>, vector<64x128xf32>
      %cst_73 = arith.constant dense<0.000000e+00> : vector<16x128xf32>
      %163 = tpu.matmul %161, %162, %cst_73 {dimension_numbers = #tpu.dot_dimension_numbers<[1], [0], [0], [1], [0, 0, 1, 1], [], []>} : vector<16x64xf32>, vector<64x128xf32>, vector<16x128xf32> -> vector<16x128xf32>
      %c0_74 = arith.constant 0 : index
      %c0_75 = arith.constant 0 : index
      %164 = vector.load %arg18[%c0_74, %c0_75] : memref<1x128xf32, #tpu.memory_space<vmem>>, vector<1x128xf32>
      %165 = vector.broadcast %164 : vector<1x128xf32> to vector<16x128xf32>
      %166 = arith.addf %163, %165 : vector<16x128xf32>
      %167 = arith.negf %166 : vector<16x128xf32>
      %168 = math.exp %167 : vector<16x128xf32>
      %cst_76 = arith.constant 1.000000e+00 : f32
      %169 = vector.broadcast %cst_76 : f32 to vector<16x128xf32>
      %170 = arith.addf %169, %168 : vector<16x128xf32>
      %171 = arith.divf %169, %170 : vector<16x128xf32>
      %c0_77 = arith.constant 0 : index
      %c0_78 = arith.constant 0 : index
      %172 = vector.load %arg19[%c0_77, %c0_78] : memref<1x128xf32, #tpu.memory_space<vmem>>, vector<1x128xf32>
      %173 = vector.broadcast %172 : vector<1x128xf32> to vector<16x128xf32>
      %174 = arith.mulf %171, %173 : vector<16x128xf32>
      %175 = vector.shape_cast %174 : vector<16x128xf32> to vector<8x2x128xf32>
      %c0_79 = arith.constant 0 : index
      %c0_80 = arith.constant 0 : index
      %c0_81 = arith.constant 0 : index
      %176 = vector.load %arg20[%c0_79, %c0_80, %c0_81] : memref<8x2x128xf32, #tpu.memory_space<vmem>>, vector<8x2x128xf32>
      tpu.vector_store %arg20[%c0_79, %c0_80, %c0_81], %175 {strides = array<i32>} : memref<8x2x128xf32, #tpu.memory_space<vmem>>, vector<8x2x128xf32>,
    } else {
    }
    return
  }
  func.func @transform_0(%arg0: i32, %arg1: i32) -> (i32, i32, i32) {
    %c0_i32 = arith.constant 0 : i32
    %c0_i32_0 = arith.constant 0 : i32
    %c0_i32_1 = arith.constant 0 : i32
    return %arg0, %c0_i32, %c0_i32_0 : i32, i32, i32
  }
  func.func @transform_1(%arg0: i32, %arg1: i32) -> (i32, i32, i32) {
    %c0_i32 = arith.constant 0 : i32
    %c0_i32_0 = arith.constant 0 : i32
    %c0_i32_1 = arith.constant 0 : i32
    return %arg1, %c0_i32, %c0_i32_0 : i32, i32, i32
  }
  func.func @transform_2(%arg0: i32, %arg1: i32) -> (i32, i32, i32) {
    %c0_i32 = arith.constant 0 : i32
    %c0_i32_0 = arith.constant 0 : i32
    %c0_i32_1 = arith.constant 0 : i32
    return %arg1, %c0_i32, %c0_i32_0 : i32, i32, i32
  }
  func.func @transform_3(%arg0: i32, %arg1: i32) -> (i32, i32, i32) {
    %c0_i32 = arith.constant 0 : i32
    %c0_i32_0 = arith.constant 0 : i32
    %c0_i32_1 = arith.constant 0 : i32
    return %arg1, %c0_i32, %c0_i32_0 : i32, i32, i32
  }
  func.func @transform_4(%arg0: i32, %arg1: i32) -> (i32, i32, i32) {
    %c0_i32 = arith.constant 0 : i32
    %c0_i32_0 = arith.constant 0 : i32
    %c0_i32_1 = arith.constant 0 : i32
    return %arg1, %c0_i32, %c0_i32_0 : i32, i32, i32
  }
  func.func @transform_5(%arg0: i32, %arg1: i32) -> (i32, i32, i32) {
    %c0_i32 = arith.constant 0 : i32
    %c0_i32_0 = arith.constant 0 : i32
    %c0_i32_1 = arith.constant 0 : i32
    return %arg1, %c0_i32, %c0_i32_0 : i32, i32, i32
  }
  func.func @transform_6(%arg0: i32, %arg1: i32) -> (i32, i32, i32) {
    %c0_i32 = arith.constant 0 : i32
    %c0_i32_0 = arith.constant 0 : i32
    %c0_i32_1 = arith.constant 0 : i32
    return %arg1, %c0_i32, %c0_i32_0 : i32, i32, i32
  }
  func.func @transform_7(%arg0: i32, %arg1: i32) -> (i32, i32, i32) {
    %c0_i32 = arith.constant 0 : i32
    %c0_i32_0 = arith.constant 0 : i32
    %c0_i32_1 = arith.constant 0 : i32
    return %arg1, %c0_i32, %c0_i32_0 : i32, i32, i32
  }
  func.func @transform_8(%arg0: i32, %arg1: i32) -> (i32, i32, i32) {
    %c0_i32 = arith.constant 0 : i32
    %c0_i32_0 = arith.constant 0 : i32
    %c0_i32_1 = arith.constant 0 : i32
    return %arg1, %c0_i32, %c0_i32_0 : i32, i32, i32
  }
  func.func @transform_9(%arg0: i32, %arg1: i32) -> (i32, i32, i32) {
    %c0_i32 = arith.constant 0 : i32
    %c0_i32_0 = arith.constant 0 : i32
    %c0_i32_1 = arith.constant 0 : i32
    return %arg1, %c0_i32, %c0_i32_0 : i32, i32, i32
  }
  func.func @transform_10(%arg0: i32, %arg1: i32) -> (i32, i32, i32) {
    %c0_i32 = arith.constant 0 : i32
    %c0_i32_0 = arith.constant 0 : i32
    %c0_i32_1 = arith.constant 0 : i32
    return %arg1, %c0_i32, %c0_i32_0 : i32, i32, i32
  }
  func.func @transform_11(%arg0: i32, %arg1: i32) -> (i32, i32, i32) {
    %c0_i32 = arith.constant 0 : i32
    %c0_i32_0 = arith.constant 0 : i32
    %c0_i32_1 = arith.constant 0 : i32
    return %arg1, %c0_i32, %c0_i32_0 : i32, i32, i32
  }
  func.func @transform_12(%arg0: i32, %arg1: i32) -> (i32, i32, i32) {
    %c0_i32 = arith.constant 0 : i32
    %c0_i32_0 = arith.constant 0 : i32
    %c0_i32_1 = arith.constant 0 : i32
    return %arg1, %c0_i32, %c0_i32_0 : i32, i32, i32
  }
  func.func @transform_13(%arg0: i32, %arg1: i32) -> (i32, i32) {
    %c0_i32 = arith.constant 0 : i32
    %c0_i32_0 = arith.constant 0 : i32
    %c0_i32_1 = arith.constant 0 : i32
    return %c0_i32, %c0_i32_0 : i32, i32
  }
  func.func @transform_14(%arg0: i32, %arg1: i32) -> (i32, i32) {
    %c0_i32 = arith.constant 0 : i32
    %c0_i32_0 = arith.constant 0 : i32
    %c0_i32_1 = arith.constant 0 : i32
    return %c0_i32, %c0_i32_0 : i32, i32
  }
  func.func @transform_15(%arg0: i32, %arg1: i32) -> (i32, i32) {
    %c0_i32 = arith.constant 0 : i32
    %c0_i32_0 = arith.constant 0 : i32
    %c0_i32_1 = arith.constant 0 : i32
    return %c0_i32, %c0_i32_0 : i32, i32
  }
  func.func @transform_16(%arg0: i32, %arg1: i32) -> (i32, i32) {
    %c0_i32 = arith.constant 0 : i32
    %c0_i32_0 = arith.constant 0 : i32
    %c0_i32_1 = arith.constant 0 : i32
    return %c0_i32, %c0_i32_0 : i32, i32
  }
  func.func @transform_17(%arg0: i32, %arg1: i32) -> (i32, i32) {
    %c0_i32 = arith.constant 0 : i32
    %c0_i32_0 = arith.constant 0 : i32
    %c0_i32_1 = arith.constant 0 : i32
    return %c0_i32, %c0_i32_0 : i32, i32
  }
  func.func @transform_18(%arg0: i32, %arg1: i32) -> (i32, i32, i32) {
    %c0_i32 = arith.constant 0 : i32
    %c0_i32_0 = arith.constant 0 : i32
    %c0_i32_1 = arith.constant 0 : i32
    return %arg0, %c0_i32, %c0_i32_0 : i32, i32, i32
  }
}

</mosaic_0001>

<bundles_post_ra>
// kernel: _lambda_.2
= control target key start
LH: loop header
LB: loop body
LE: loop exit
PB: predicated region body
PF: predicated region fallthrough
CT: control target
= control target key end

     0   :  { %s4294_s0 = inlined_call_operand.hbm [shape: f32[2,8,64], index: 0, kind: input, shape index: {}]   ;;  %s4295_s1 = inlined_call_operand.hbm [shape: f32[2,8], index: 1, kind: input, shape index: {}]   ;;  %s4296_s2 = inlined_call_operand.hbm [shape: bf16[2,64,192], index: 2, kind: input, shape index: {}]   ;;  %s4297_s3 = inlined_call_operand.hbm [shape: f32[2,1,192], index: 3, kind: input, shape index: {}]   ;;  %s4298_s4 = inlined_call_operand.hbm [shape: bf16[2,64,64], index: 4, kind: input, shape index: {}]   ;;  %s4299_s5 = inlined_call_operand.hbm [shape: f32[2,1,64], index: 5, kind: input, shape index: {}]   ;;  %s4300_s6 = inlined_call_operand.hbm [shape: f32[2,1,64], index: 6, kind: input, shape index: {}]   ;;  %s4301_s7 = inlined_call_operand.hbm [shape: f32[2,1,64], index: 7, kind: input, shape index: {}]   ;;  %s4302_s8 = inlined_call_operand.hbm [shape: f32[2,1,64], index: 8, kind: input, shape index: {}]   ;;  %s4303_s9 = inlined_call_operand.hbm [shape: f32[2,1,64], index: 9, kind: input, shape index: {}]   ;;  %s4304_s10 = inlined_call_operand.hbm [shape: bf16[2,64,128], index: 10, kind: input, shape index: {}]   ;;  %s4305_s11 = inlined_call_operand.hbm [shape: f32[2,1,128], index: 11, kind: input, shape index: {}]   ;;  %s4306_s12 = inlined_call_operand.hbm [shape: bf16[2,128,64], index: 12, kind: input, shape index: {}]   ;;  %s4307_s13 = inlined_call_operand.hbm [shape: f32[2,1,64], index: 13, kind: input, shape index: {}]   ;;  %s4308_s14 = inlined_call_operand.hbm [shape: f32[1,64], index: 14, kind: input, shape index: {}]   ;;  %s4309_s15 = inlined_call_operand.hbm [shape: f32[1,64], index: 15, kind: input, shape index: {}]   ;;  %s4310_s16 = inlined_call_operand.hbm [shape: f32[2,8,64], index: 16, kind: output, shape index: {}]  }
   0x1   :  { %4351 = sst [smem:[#allocation37_spill]] %s4294_s0 }
   0x2   :  { %4352 = sst [smem:[#allocation38_spill]] %s4295_s1 }
   0x3   :  { %4353 = sst [smem:[#allocation39_spill]] %s4296_s2 }
   0x4   :  { %4354 = sst [smem:[#allocation40_spill]] %s4297_s3 }
   0x5   :  { %4355 = sst [smem:[#allocation41_spill]] %s4298_s4 }
   0x6   :  { %4356 = sst [smem:[#allocation42_spill]] %s4299_s5 }
   0x7   :  { %4357 = sst [smem:[#allocation43_spill]] %s4300_s6 }
   0x8   :  { %4358 = sst [smem:[#allocation44_spill]] %s4301_s7 }
   0x9   :  { %4359 = sst [smem:[#allocation45_spill]] %s4306_s12 }
   0xa   :  { %4360 = sst [smem:[#allocation46_spill]] %s4307_s13 }
   0xb   :  { %4361 = sst [smem:[#allocation47_spill]] %s4308_s14 }
   0xc   :  { %4362 = sst [smem:[#allocation48_spill]] %s4309_s15 }
   0xd   :  { %4363 = sst [smem:[#allocation49_spill]] %s4310_s16 }
   0xe   :  { %21 = vsyncpa [#allocation3], 0 }
   0xf   :  { %22 = vsyncpa [#allocation6], 0 }
  0x10   :  { %23 = vsyncpa [#allocation21], 0 }
  0x11   :  { %24 = vsyncpa [#allocation4], 0  ;;  %s3510_s21 = smov 0   ;;  %s3512_s22 = smov 0  }
  0x12   :  { %s3514_s23 = smov 0   ;;  %s3516_s24 = smov 0  }
  0x13   :  { %s3518_s25 = smov 0   ;;  %s3520_s26 = smov 0  }
  0x14 LB: > { %4364 = sst [smem:[#allocation29_spill]] %s3377_s22  ;;  %s3539_s27 = sadd.s32 4294967295, %s3393_s26   ;;  %s3393_s26 = sphi %s3520_s26, %s30_s26   ;;  %s3389_s25 = sphi %s3518_s25, %s4439_s25   ;;  %s3385_s24 = sphi %s3516_s24, %s4438_s24   ;;  %s3381_s23 = sphi %s3514_s23, %s4437_s23   ;;  %s3377_s22 = sphi %s3512_s22, %s4436_s22   ;;  %s3373_s21 = sphi %s3510_s21, %s4433_s21  }
  0x15   : > { %4365 = sst [smem:[#allocation30_spill]] %s3385_s24  ;;  %p108_p0 = scmp.ne.s32.totalorder %s3381_s23, %s3377_s22 }
  0x16   : > { %4366 = sst [smem:[#allocation31_spill]] %s3539_s27  ;;  %p109_p1 = scmp.eq.s32.totalorder %s3393_s26, 0 }
  0x17   : > { %p114_p2 = scmp.ne.s32.totalorder %s3377_s22, %s3373_s21  ;;  %p4320_p3 = scmp.eq.s32.totalorder %s3539_s27, 0 }
  0x18   : > { %p110_p4 = por %p109_p1, %p108_p0  ;;  %p2362_p5 = scmp.ge.s32.totalorder %s3393_s26, 1 }
  0x19   : > { %p3550_p6 = por %p4320_p3, %p114_p2  ;;  %p479_p7 = scmp.lt.s32.totalorder %s3393_s26, 3 }
  0x1a   : > { %s3395_s0 = smov [#allocation2]   ;;  %p2681_p10 = scmp.lt.s32.totalorder %s3393_s26, 2 }
  0x1b   : > { %s4367_s29 = scalar_select %p3550_p6, 1, 0 }
  0x1c   : > { %p3555_p8 = pnand %p2362_p5, %p479_p7  ;;  %s494_s17 = sshll.u32 %s3395_s0, 4  ;;  %s495_s17 = int_to_ptr.vmem [resolvable:$true] %s494_s17 }
  0x1d   : > { %4368 = sst [smem:[#allocation32_spill]] %s4367_s29  ;;  %s3569_s19 = sand.u32 1, %s3381_s23  }
  0x1e   : > { %s4369_s30 = scalar_select %p3555_p8, 1, 0 }
  0x1f   : > { %p2627_p9 = pneg %p3555_p8  ;;  %p3571_p12 = pnand %p2681_p10, %p110_p4 }
  0x20   : > { %4370 = sst [smem:[#allocation33_spill]] %s4369_s30  ;;  %s4374_s16 = sld [smem:[#allocation37_spill]] }
  0x21   : > { %p3564_p11 = pnand %p2627_p9, %p4320_p3 }
  0x22   : > { %s4373_s20 = scalar_select %p3571_p12, 1, 0 }
  0x23   : > { %s4371_s18 = scalar_select %p3564_p11, 1, 0 }
  0x24   : > { %p3583_p0 = pneg %p3564_p11 }
  0x25   : > { %4372 = sst [smem:[#allocation34_spill]] %s4371_s18 }
  0x26   : > { %s2825_s0 = scalar_lea.hbm %s4374_s16, 256 }
  0x27   : > { %p2826_p13 = scmp.ne.s32.totalorder %s4374_s16, %s2825_s0  ;;  %p2832_p4 = scmp.lt.u32.totalorder %s2825_s0, %s4374_s16 }
  0x28   : > { %s4375_s22 = scalar_select %p3583_p0, 1, 0 }
  0x29   : > { %p2828_p1 = pnand %p3583_p0, %p2826_p13 }
  0x2b   : > { %p2829_p2 = pneg %p2828_p1 }
  0x2d   : > { %p2834_p5 = pnand %p2832_p4, %p2829_p2 }
  0x2f   : > { %2837 = shalt.err (!%p2834_p5)
}
  0x30   : > { %s2838_s28 = scalar_lea.vmem %s495_s17, 256  ;;  %p2846_p3 = scmp.lt.s32.totalorder %s495_s17, %s495_s17 }
  0x31   : > { %p2839_p7 = scmp.ne.s32.totalorder %s495_s17, %s2838_s28  ;;  %p2847_p6 = scmp.lt.s32.totalorder %s2838_s28, %s2838_s28 }
  0x33   : > { %p2841_p9 = pnand %p2839_p7, %p3583_p0  ;;  %p2848_p8 = por %p2847_p6, %p2846_p3 }
  0x35   : > { %p2842_p10 = pneg %p2841_p9 }
  0x37   : > { %p2849_p12 = pnand %p2848_p8, %p2842_p10 }
  0x39   : > { %2852 = shalt.err (!%p2849_p12)
}
  0x3a   : > { %s4330_s24 = smov 128   ;;  %s4331_s27 = smov 8  }
  0x3b   : > { %2630 = dma.hbm_to_vmem [thread:$0]  (!%p3564_p11), %s4374_s16, 256, %s495_s17, [#allocation3], %s4330_s24, %s4330_s24, %s4331_s27  }
  0x3c   : > { %s39_s21 = sadd.s32 1, %s3389_s25  ;;  %s543_s0 = sand.u32 1, %s3393_s26  }
  0x3d   : > { %p40_p3 = scmp.ge.s32.totalorder %s39_s21, 2  ;;  %s4334_s28 = sshll.u32 %s3569_s19, 6 }
  0x3e   : > { %s4339_s13 = sshll.u32 %s3389_s25, 10  ;;  %s4377_s2 = sld [smem:[#allocation39_spill]] }
  0x3f   : > { %s4441_s21 = smov (%p40_p3, %s39_s21), 0  ;;  %s547_s17 = scalar_lea.vmem [#allocation7], %s4334_s28 }
  0x40   : > { %4376 = sst [smem:[#allocation35_spill]] %s4441_s21  ;;  %s98_s15 = ssub.s32 %s3389_s25, %s4441_s21 }
  0x41   : > { %p99_p6 = scmp.eq.s32.totalorder %s98_s15, 0  ;;  %s554_s29 = sshll.u32 %s547_s17, 4  ;;  %s3619_s29 = int_to_ptr.vmem [resolvable:$true] %s554_s29 }
  0x42   : > { %s2371_s30 = sshll.u32 %s3569_s19, 1  ;;  %s4378_s24 = sadd.s32 1, %s3381_s23 }
  0x43   : > { %s3625_s27 = scalar_select %p99_p6, %s3381_s23, %s4378_s24  }
  0x44   : > { %s3615_s18 = scalar_lea.hbm %s4377_s2, %s4339_s13  ;;  %s3627_s16 = scalar_lea.sflag [#allocation3], %s543_s0 }
  0x45   : > { %4379 = sst [smem:[#allocation36_spill]] %s3625_s27  ;;  %s2853_s21 = scalar_lea.hbm %s3615_s18, 1024 }
  0x46   : > { %p2854_p8 = scmp.ne.s32.totalorder %s3615_s18, %s2853_s21  ;;  %p4380_p12 = scmp.ne.s32.totalorder %s4373_s20, 0 }
  0x47   : > { %s2858_s17 = scalar_lea.hbm %s4377_s2, 2048  ;;  %p2859_p4 = scmp.lt.u32.totalorder %s3615_s18, %s4377_s2 }
  0x48   : > { %p3633_p13 = pneg %p4380_p12  ;;  %p2860_p5 = scmp.lt.u32.totalorder %s2858_s17, %s2853_s21 }
  0x49   : > { %p2862_p9 = scmp.lt.u32.totalorder %s2853_s21, %s3615_s18 }
  0x4a   : > { %s4381_s12 = scalar_select %p3633_p13, 1, 0 }
  0x4b   : > { %p2856_p1 = pnand %p3633_p13, %p2854_p8  ;;  %p2861_p7 = por %p2860_p5, %p2859_p4 }
  0x4d   : > { %p2857_p2 = pneg %p2856_p1  ;;  %p2863_p10 = por %p2862_p9, %p2861_p7 }
  0x4f   : > { %p2864_p3 = pnand %p2863_p10, %p2857_p2 }
  0x51   : > { %2867 = shalt.err (!%p2864_p3)
}
  0x52   : > { %s2868_s0 = scalar_lea.vmem %s3619_s29, 1024  ;;  %s3398_s14 = smov [#allocation7]  }
  0x53   : > { %p2869_p6 = scmp.ne.s32.totalorder %s3619_s29, %s2868_s0  ;;  %s2873_s15 = sshll.u32 %s3398_s14, 4  ;;  %s2874_s15 = int_to_ptr.vmem [resolvable:$false] %s2873_s15 }
  0x54   : > { %s2875_s28 = scalar_lea.vmem %s2874_s15, 2048  ;;  %p2876_p11 = scmp.lt.s32.totalorder %s3619_s29, %s2874_s15 }
  0x55   : > { %p2871_p8 = pnand %p2869_p6, %p3633_p13  ;;  %p2877_p0 = scmp.lt.s32.totalorder %s2875_s28, %s2868_s0 }
  0x57   : > { %p2872_p1 = pneg %p2871_p8  ;;  %p2878_p4 = por %p2877_p0, %p2876_p11 }
  0x59   : > { %p2879_p5 = pnand %p2878_p4, %p2872_p1 }
  0x5b   : > { %2882 = shalt.err (!%p2879_p5)
}
  0x5c   : > { %s4382_s21 = smov 8   ;;  %s4383_s17 = smov 128  }
  0x5d   : > { %2643 = dma.hbm_to_vmem [thread:$0]  (!%p4380_p12), %s3615_s18, 1024, %s3619_s29, %s3627_s16, %s4383_s17, %s4383_s17, %s4382_s21  }
  0x5e   : > { %s2452_s24 = sshll.u32 %s3389_s25, 5  ;;  %s4384_s3 = sld [smem:[#allocation40_spill]] }
  0x5f   : > { %s568_s28 = scalar_lea.vmem [#allocation8], %s2371_s30  ;;  %s4341_s2 = sshll.u32 %s3569_s19, 5 }
  0x60   : > { %s576_s13 = sshll.u32 %s568_s28, 4  ;;  %s577_s13 = int_to_ptr.vmem [resolvable:$true] %s576_s13 }
  0x64   : > { %s3664_s0 = scalar_lea.hbm %s4384_s3, %s2452_s24  ;;  %s2888_s21 = scalar_lea.hbm %s4384_s3, 64 }
  0x65   : > { %s2883_s27 = scalar_lea.hbm %s3664_s0, 32  ;;  %p2889_p7 = scmp.lt.u32.totalorder %s3664_s0, %s4384_s3 }
  0x66   : > { %p2884_p11 = scmp.ne.s32.totalorder %s3664_s0, %s2883_s27  ;;  %p2890_p9 = scmp.lt.u32.totalorder %s2888_s21, %s2883_s27 }
  0x67   : > { %p2892_p3 = scmp.lt.u32.totalorder %s2883_s27, %s3664_s0 }
  0x68   : > { %p2886_p0 = pnand %p2884_p11, %p3633_p13  ;;  %p2891_p10 = por %p2890_p9, %p2889_p7 }
  0x6a   : > { %p2887_p2 = pneg %p2886_p0  ;;  %p2893_p6 = por %p2892_p3, %p2891_p10 }
  0x6c   : > { %p2894_p8 = pnand %p2893_p6, %p2887_p2 }
  0x6e   : > { %2897 = shalt.err (!%p2894_p8)
}
  0x6f   : > { %s2898_s30 = scalar_lea.vmem %s577_s13, 32  ;;  %s3399_s14 = smov [#allocation8]  }
  0x70   : > { %p2899_p1 = scmp.ne.s32.totalorder %s577_s13, %s2898_s30  ;;  %s2903_s15 = sshll.u32 %s3399_s14, 4  ;;  %s2904_s15 = int_to_ptr.vmem [resolvable:$false] %s2903_s15 }
  0x71   : > { %s2905_s28 = scalar_lea.vmem %s2904_s15, 64  ;;  %p2906_p11 = scmp.lt.s32.totalorder %s577_s13, %s2904_s15 }
  0x72   : > { %p2901_p4 = pnand %p2899_p1, %p3633_p13  ;;  %p2907_p0 = scmp.lt.s32.totalorder %s2905_s28, %s2898_s30 }
  0x74   : > { %p2902_p5 = pneg %p2901_p4  ;;  %p2908_p12 = por %p2907_p0, %p2906_p11 }
  0x76   : > { %p2909_p7 = pnand %p2908_p12, %p2902_p5 }
  0x78   : > { %2912 = shalt.err (!%p2909_p7)
}
  0x79   : > { %p4385_p9 = scmp.ne.s32.totalorder %s4373_s20, 0  ;;  %s4342_s27 = sshll.u32 %s3389_s25, 9 }
  0x7a   : > { %s4386_s4 = sld [smem:[#allocation41_spill]]  ;;  %s587_s17 = scalar_lea.vmem [#allocation9], %s4341_s2 }
  0x7b   : > { %2646 = dma.hbm_to_vmem [thread:$0]  (!%p4385_p9), %s3664_s0, 32, %s577_s13, %s3627_s16  }
  0x7c   : > { %s594_s24 = sshll.u32 %s587_s17, 4  ;;  %s3697_s24 = int_to_ptr.vmem [resolvable:$true] %s594_s24 }
  0x80   : > { %s3693_s21 = scalar_lea.hbm %s4386_s4, %s4342_s27  ;;  %s2918_s14 = scalar_lea.hbm %s4386_s4, 1024 }
  0x81   : > { %s2913_s30 = scalar_lea.hbm %s3693_s21, 512  ;;  %p2919_p3 = scmp.lt.u32.totalorder %s3693_s21, %s4386_s4 }
  0x82   : > { %p2914_p12 = scmp.ne.s32.totalorder %s3693_s21, %s2913_s30  ;;  %p2920_p6 = scmp.lt.u32.totalorder %s2918_s14, %s2913_s30 }
  0x83   : > { %p2922_p1 = scmp.lt.u32.totalorder %s2913_s30, %s3693_s21 }
  0x84   : > { %p2916_p2 = pnand %p2914_p12, %p3633_p13  ;;  %p2921_p8 = por %p2920_p6, %p2919_p3 }
  0x86   : > { %p2917_p10 = pneg %p2916_p2  ;;  %p2923_p4 = por %p2922_p1, %p2921_p8 }
  0x88   : > { %p2924_p5 = pnand %p2923_p4, %p2917_p10 }
  0x8a   : > { %2927 = shalt.err (!%p2924_p5)
}
  0x8b   : > { %s2928_s18 = scalar_lea.vmem %s3697_s24, 512  ;;  %s3400_s29 = smov [#allocation9]  }
  0x8c   : > { %p2929_p11 = scmp.ne.s32.totalorder %s3697_s24, %s2928_s18  ;;  %s2933_s17 = sshll.u32 %s3400_s29, 4  ;;  %s2934_s17 = int_to_ptr.vmem [resolvable:$false] %s2933_s17 }
  0x8d   : > { %s2935_s13 = scalar_lea.vmem %s2934_s17, 1024  ;;  %p2936_p12 = scmp.lt.s32.totalorder %s3697_s24, %s2934_s17 }
  0x8e   : > { %p2931_p0 = pnand %p2929_p11, %p3633_p13  ;;  %p2937_p2 = scmp.lt.s32.totalorder %s2935_s13, %s2928_s18 }
  0x90   : > { %p2932_p7 = pneg %p2931_p0  ;;  %p2938_p3 = por %p2937_p2, %p2936_p12 }
  0x92   : > { %p2939_p6 = pnand %p2938_p3, %p2932_p7 }
  0x94   : > { %2942 = shalt.err (!%p2939_p6)
}
  0x95   : > { %s4344_s30 = smov 64   ;;  %s4346_s0 = smov 4  }
  0x96   : > { %2649 = dma.hbm_to_vmem [thread:$0]  (!%p4385_p9), %s3693_s21, 512, %s3697_s24, %s3627_s16, %s4344_s30, %s4344_s30, %s4346_s0  }
  0x97   : > { %s3725_s14 = sshll.u32 %s3389_s25, 4  ;;  %s607_s15 = scalar_lea.vmem [#allocation10], %s3569_s19 }
  0x98   : > { %s614_s28 = sshll.u32 %s607_s15, 4  ;;  %s4387_s5 = sld [smem:[#allocation42_spill]]  ;;  %s615_s28 = int_to_ptr.vmem [resolvable:$true] %s614_s28 }
  0x9e   : > { %s612_s17 = scalar_lea.hbm %s4387_s5, %s3725_s14  ;;  %s2948_s3 = scalar_lea.hbm %s4387_s5, 32 }
  0x9f   : > { %s2943_s13 = scalar_lea.hbm %s612_s17, 16  ;;  %p2949_p4 = scmp.lt.u32.totalorder %s612_s17, %s4387_s5 }
  0xa0   : > { %p2944_p10 = scmp.ne.s32.totalorder %s612_s17, %s2943_s13  ;;  %p2950_p5 = scmp.lt.u32.totalorder %s2948_s3, %s2943_s13 }
  0xa1   : > { %p2952_p0 = scmp.lt.u32.totalorder %s2943_s13, %s612_s17 }
  0xa2   : > { %p2946_p8 = pnand %p2944_p10, %p3633_p13  ;;  %p2951_p11 = por %p2950_p5, %p2949_p4 }
  0xa4   : > { %p2947_p1 = pneg %p2946_p8  ;;  %p2953_p7 = por %p2952_p0, %p2951_p11 }
  0xa6   : > { %p2954_p12 = pnand %p2953_p7, %p2947_p1 }
  0xa8   : > { %2957 = shalt.err (!%p2954_p12)
}
  0xa9   : > { %s2958_s15 = scalar_lea.vmem %s615_s28, 16  ;;  %s3403_s18 = smov [#allocation10]  }
  0xaa   : > { %p2959_p2 = scmp.ne.s32.totalorder %s615_s28, %s2958_s15  ;;  %s2963_s29 = sshll.u32 %s3403_s18, 4  ;;  %s2964_s29 = int_to_ptr.vmem [resolvable:$false] %s2963_s29 }
  0xab   : > { %s2965_s2 = scalar_lea.vmem %s2964_s29, 32  ;;  %p2966_p10 = scmp.lt.s32.totalorder %s615_s28, %s2964_s29 }
  0xac   : > { %p2961_p3 = pnand %p2959_p2, %p3633_p13  ;;  %p2967_p8 = scmp.lt.s32.totalorder %s2965_s2, %s2958_s15 }
  0xae   : > { %p2962_p6 = pneg %p2961_p3  ;;  %p2968_p9 = por %p2967_p8, %p2966_p10 }
  0xb0   : > { %p2969_p4 = pnand %p2968_p9, %p2962_p6 }
  0xb2   : > { %2972 = shalt.err (!%p2969_p4)
}
  0xb3   : > { %p4388_p5 = scmp.ne.s32.totalorder %s4373_s20, 0  ;;  %s4389_s6 = sld [smem:[#allocation43_spill]] }
  0xb4   : > { %s624_s21 = scalar_lea.vmem [#allocation11], %s3569_s19  ;;  %s4390_s7 = sld [smem:[#allocation44_spill]] }
  0xb5   : > { %2652 = dma.hbm_to_vmem [thread:$0]  (!%p4388_p5), %s612_s17, 16, %s615_s28, %s3627_s16  }
  0xb6   : > { %s631_s24 = sshll.u32 %s624_s21, 4  ;;  %s632_s24 = int_to_ptr.vmem [resolvable:$true] %s631_s24 }
  0xb9   : > { %s3749_s13 = scalar_lea.hbm %s4389_s6, %s3725_s14  ;;  %s2978_s3 = scalar_lea.hbm %s4389_s6, 32 }
  0xba   : > { %s3756_s29 = scalar_lea.hbm %s4390_s7, %s3725_s14  ;;  %s2973_s2 = scalar_lea.hbm %s3749_s13, 16 }
  0xbb   : > { %p2974_p9 = scmp.ne.s32.totalorder %s3749_s13, %s2973_s2  ;;  %p2979_p0 = scmp.lt.u32.totalorder %s3749_s13, %s4389_s6 }
  0xbc   : > { %p2980_p7 = scmp.lt.u32.totalorder %s2978_s3, %s2973_s2  ;;  %p2982_p2 = scmp.lt.u32.totalorder %s2973_s2, %s3749_s13 }
  0xbd   : > { %p2976_p1 = pnand %p2974_p9, %p3633_p13 }
  0xbe   : > { %p2981_p12 = por %p2980_p7, %p2979_p0 }
  0xbf   : > { %p2977_p11 = pneg %p2976_p1 }
  0xc0   : > { %p2983_p3 = por %p2982_p2, %p2981_p12 }
  0xc2   : > { %p2984_p6 = pnand %p2983_p3, %p2977_p11 }
  0xc4   : > { %2987 = shalt.err (!%p2984_p6)
}
  0xc5   : > { %s2988_s21 = scalar_lea.vmem %s632_s24, 16  ;;  %s3404_s15 = smov [#allocation11]  }
  0xc6   : > { %p2989_p10 = scmp.ne.s32.totalorder %s632_s24, %s2988_s21  ;;  %s2993_s18 = sshll.u32 %s3404_s15, 4  ;;  %s2994_s18 = int_to_ptr.vmem [resolvable:$false] %s2993_s18 }
  0xc7   : > { %s2995_s28 = scalar_lea.vmem %s2994_s18, 32  ;;  %p2996_p9 = scmp.lt.s32.totalorder %s632_s24, %s2994_s18 }
  0xc8   : > { %p2991_p8 = pnand %p2989_p10, %p3633_p13  ;;  %p2997_p1 = scmp.lt.s32.totalorder %s2995_s28, %s2988_s21 }
  0xca   : > { %p2992_p4 = pneg %p2991_p8  ;;  %p2998_p5 = por %p2997_p1, %p2996_p9 }
  0xcc   : > { %p2999_p0 = pnand %p2998_p5, %p2992_p4 }
  0xce   : > { %3002 = shalt.err (!%p2999_p0)
}
  0xcf   : > { %p4391_p7 = scmp.ne.s32.totalorder %s4373_s20, 0  ;;  %s641_s30 = scalar_lea.vmem [#allocation12], %s3569_s19 }
  0xd0   : > { %s648_s2 = sshll.u32 %s641_s30, 4  ;;  %s3781_s27 = scalar_lea.hbm %s4302_s8, %s3725_s14  ;;  %s649_s2 = int_to_ptr.vmem [resolvable:$true] %s648_s2 }
  0xd1   : > { %2655 = dma.hbm_to_vmem [thread:$0]  (!%p4391_p7), %s3749_s13, 16, %s632_s24, %s3627_s16  }
  0xd2   : > { %s3003_s21 = scalar_lea.hbm %s3756_s29, 16  ;;  %s3008_s28 = scalar_lea.hbm %s4390_s7, 32 }
  0xd3   : > { %p3004_p5 = scmp.ne.s32.totalorder %s3756_s29, %s3003_s21  ;;  %p3009_p2 = scmp.lt.u32.totalorder %s3756_s29, %s4390_s7 }
  0xd4   : > { %p3010_p3 = scmp.lt.u32.totalorder %s3008_s28, %s3003_s21  ;;  %p3012_p10 = scmp.lt.u32.totalorder %s3003_s21, %s3756_s29 }
  0xd5   : > { %p3006_p11 = pnand %p3004_p5, %p3633_p13 }
  0xd6   : > { %p3011_p6 = por %p3010_p3, %p3009_p2 }
  0xd7   : > { %p3007_p12 = pneg %p3006_p11 }
  0xd8   : > { %p3013_p8 = por %p3012_p10, %p3011_p6 }
  0xda   : > { %p3014_p4 = pnand %p3013_p8, %p3007_p12 }
  0xdc   : > { %3017 = shalt.err (!%p3014_p4)
}
  0xdd   : > { %s3018_s13 = scalar_lea.vmem %s649_s2, 16  ;;  %s3405_s24 = smov [#allocation12]  }
  0xde   : > { %p3019_p9 = scmp.ne.s32.totalorder %s649_s2, %s3018_s13  ;;  %s3023_s30 = sshll.u32 %s3405_s24, 4  ;;  %s3024_s30 = int_to_ptr.vmem [resolvable:$false] %s3023_s30 }
  0xdf   : > { %s3025_s17 = scalar_lea.vmem %s3024_s30, 32  ;;  %p3026_p5 = scmp.lt.s32.totalorder %s649_s2, %s3024_s30 }
  0xe0   : > { %p3021_p1 = pnand %p3019_p9, %p3633_p13  ;;  %p3027_p11 = scmp.lt.s32.totalorder %s3025_s17, %s3018_s13 }
  0xe2   : > { %p3022_p0 = pneg %p3021_p1  ;;  %p3028_p7 = por %p3027_p11, %p3026_p5 }
  0xe4   : > { %p3029_p2 = pnand %p3028_p7, %p3022_p0 }
  0xe6   : > { %3032 = shalt.err (!%p3029_p2)
}
  0xe7   : > { %p4392_p3 = scmp.ne.s32.totalorder %s4373_s20, 0  ;;  %s658_s4 = scalar_lea.vmem [#allocation13], %s3569_s19 }
  0xe8   : > { %s665_s0 = sshll.u32 %s658_s4, 4  ;;  %s3806_s15 = scalar_lea.hbm %s4303_s9, %s3725_s14  ;;  %s666_s0 = int_to_ptr.vmem [resolvable:$true] %s665_s0 }
  0xe9   : > { %2658 = dma.hbm_to_vmem [thread:$0]  (!%p4392_p3), %s3756_s29, 16, %s649_s2, %s3627_s16  }
  0xea   : > { %s3033_s18 = scalar_lea.hbm %s3781_s27, 16  ;;  %s3038_s24 = scalar_lea.hbm %s4302_s8, 32 }
  0xeb   : > { %p3034_p7 = scmp.ne.s32.totalorder %s3781_s27, %s3033_s18  ;;  %p3039_p10 = scmp.lt.u32.totalorder %s3781_s27, %s4302_s8 }
  0xec   : > { %p3040_p8 = scmp.lt.u32.totalorder %s3038_s24, %s3033_s18  ;;  %p3042_p9 = scmp.lt.u32.totalorder %s3033_s18, %s3781_s27 }
  0xed   : > { %p3036_p12 = pnand %p3034_p7, %p3633_p13 }
  0xee   : > { %p3041_p4 = por %p3040_p8, %p3039_p10 }
  0xef   : > { %p3037_p6 = pneg %p3036_p12 }
  0xf0   : > { %p3043_p1 = por %p3042_p9, %p3041_p4 }
  0xf2   : > { %p3044_p0 = pnand %p3043_p1, %p3037_p6 }
  0xf4   : > { %3047 = shalt.err (!%p3044_p0)
}
  0xf5   : > { %s3048_s29 = scalar_lea.vmem %s666_s0, 16  ;;  %s3406_s2 = smov [#allocation13]  }
  0xf6   : > { %p3049_p5 = scmp.ne.s32.totalorder %s666_s0, %s3048_s29  ;;  %s3053_s4 = sshll.u32 %s3406_s2, 4  ;;  %s3054_s4 = int_to_ptr.vmem [resolvable:$false] %s3053_s4 }
  0xf7   : > { %s3055_s3 = scalar_lea.vmem %s3054_s4, 32  ;;  %p3056_p7 = scmp.lt.s32.totalorder %s666_s0, %s3054_s4 }
  0xf8   : > { %p3051_p11 = pnand %p3049_p5, %p3633_p13  ;;  %p3057_p12 = scmp.lt.s32.totalorder %s3055_s3, %s3048_s29 }
  0xfa   : > { %p3052_p2 = pneg %p3051_p11  ;;  %p3058_p3 = por %p3057_p12, %p3056_p7 }
  0xfc   : > { %p3059_p8 = pnand %p3058_p3, %p3052_p2 }
  0xfe   : > { %3062 = shalt.err (!%p3059_p8)
}
  0xff   : > { %p4393_p10 = scmp.ne.s32.totalorder %s4373_s20, 0  ;;  %s675_s21 = scalar_lea.vmem [#allocation14], %s3569_s19 }
 0x100   : > { %s682_s18 = sshll.u32 %s675_s21, 4  ;;  %s4394_s28 = sshll.u32 %s3389_s25, 9  ;;  %s683_s18 = int_to_ptr.vmem [resolvable:$true] %s682_s18 }
 0x101   : > { %2661 = dma.hbm_to_vmem [thread:$0]  (!%p4393_p10), %s3781_s27, 16, %s666_s0, %s3627_s16  }
 0x102   : > { %s3832_s30 = scalar_lea.hbm %s4304_s10, %s4394_s28  ;;  %s3063_s17 = scalar_lea.hbm %s3806_s15, 16 }
 0x103   : > { %p3064_p3 = scmp.ne.s32.totalorder %s3806_s15, %s3063_s17  ;;  %s3068_s4 = scalar_lea.hbm %s4303_s9, 32 }
 0x104   : > { %p3069_p9 = scmp.lt.u32.totalorder %s3806_s15, %s4303_s9  ;;  %p3070_p1 = scmp.lt.u32.totalorder %s3068_s4, %s3063_s17 }
 0x105   : > { %p3066_p6 = pnand %p3064_p3, %p3633_p13  ;;  %p3072_p5 = scmp.lt.u32.totalorder %s3063_s17, %s3806_s15 }
 0x106   : > { %p3071_p0 = por %p3070_p1, %p3069_p9 }
 0x107   : > { %p3067_p4 = pneg %p3066_p6 }
 0x108   : > { %p3073_p11 = por %p3072_p5, %p3071_p0 }
 0x10a   : > { %p3074_p2 = pnand %p3073_p11, %p3067_p4 }
 0x10c   : > { %3077 = shalt.err (!%p3074_p2)
}
 0x10d   : > { %s3078_s0 = scalar_lea.vmem %s683_s18, 16  ;;  %s3407_s21 = smov [#allocation14]  }
 0x10e   : > { %p3079_p7 = scmp.ne.s32.totalorder %s683_s18, %s3078_s0  ;;  %s3083_s28 = sshll.u32 %s3407_s21, 4  ;;  %s3084_s28 = int_to_ptr.vmem [resolvable:$false] %s3083_s28 }
 0x10f   : > { %s3085_s13 = scalar_lea.vmem %s3084_s28, 32  ;;  %p3086_p3 = scmp.lt.s32.totalorder %s683_s18, %s3084_s28 }
 0x110   : > { %p3081_p12 = pnand %p3079_p7, %p3633_p13  ;;  %p3087_p6 = scmp.lt.s32.totalorder %s3085_s13, %s3078_s0 }
 0x112   : > { %p3082_p8 = pneg %p3081_p12  ;;  %p3088_p10 = por %p3087_p6, %p3086_p3 }
 0x114   : > { %p3089_p1 = pnand %p3088_p10, %p3082_p8 }
 0x116   : > { %3092 = shalt.err (!%p3089_p1)
}
 0x117   : > { %p4395_p9 = scmp.ne.s32.totalorder %s4373_s20, 0  ;;  %s4396_s24 = sshll.u32 %s3569_s19, 5 }
 0x118   : > { %s693_s17 = scalar_lea.vmem [#allocation15], %s4396_s24  ;;  %s3860_s3 = scalar_lea.hbm %s4305_s11, %s3725_s14 }
 0x119   : > { %2664 = dma.hbm_to_vmem [thread:$0]  (!%p4395_p9), %s3806_s15, 16, %s683_s18, %s3627_s16  }
 0x11a   : > { %s700_s29 = sshll.u32 %s693_s17, 4  ;;  %s3093_s27 = scalar_lea.hbm %s3832_s30, 512  ;;  %s3854_s29 = int_to_ptr.vmem [resolvable:$true] %s700_s29 }
 0x11b   : > { %p3094_p10 = scmp.ne.s32.totalorder %s3832_s30, %s3093_s27  ;;  %s3098_s28 = scalar_lea.hbm %s4304_s10, 1024 }
 0x11c   : > { %p3099_p5 = scmp.lt.u32.totalorder %s3832_s30, %s4304_s10  ;;  %p3100_p11 = scmp.lt.u32.totalorder %s3098_s28, %s3093_s27 }
 0x11d   : > { %p3096_p4 = pnand %p3094_p10, %p3633_p13  ;;  %p3102_p7 = scmp.lt.u32.totalorder %s3093_s27, %s3832_s30 }
 0x11e   : > { %p3101_p2 = por %p3100_p11, %p3099_p5 }
 0x11f   : > { %p3097_p0 = pneg %p3096_p4 }
 0x120   : > { %p3103_p12 = por %p3102_p7, %p3101_p2 }
 0x122   : > { %p3104_p8 = pnand %p3103_p12, %p3097_p0 }
 0x124   : > { %3107 = shalt.err (!%p3104_p8)
}
 0x125   : > { %s3108_s13 = scalar_lea.vmem %s3854_s29, 512  ;;  %s3408_s24 = smov [#allocation15]  }
 0x126   : > { %p3109_p3 = scmp.ne.s32.totalorder %s3854_s29, %s3108_s13  ;;  %s3113_s17 = sshll.u32 %s3408_s24, 4  ;;  %s3114_s17 = int_to_ptr.vmem [resolvable:$false] %s3113_s17 }
 0x127   : > { %s3115_s2 = scalar_lea.vmem %s3114_s17, 1024  ;;  %p3116_p10 = scmp.lt.s32.totalorder %s3854_s29, %s3114_s17 }
 0x128   : > { %p3111_p6 = pnand %p3109_p3, %p3633_p13  ;;  %p3117_p4 = scmp.lt.s32.totalorder %s3115_s2, %s3108_s13 }
 0x12a   : > { %p3112_p1 = pneg %p3111_p6  ;;  %p3118_p5 = por %p3117_p4, %p3116_p10 }
 0x12c   : > { %p3119_p11 = pnand %p3118_p5, %p3112_p1 }
 0x12e   : > { %3122 = shalt.err (!%p3119_p11)
}
 0x12f   : > { %s4397_s4 = smov 4   ;;  %s4398_s27 = smov 64  }
 0x130   : > { %2667 = dma.hbm_to_vmem [thread:$0]  (!%p4395_p9), %s3832_s30, 512, %s3854_s29, %s3627_s16, %s4398_s27, %s4398_s27, %s4397_s4  }
 0x131   : > { %s713_s0 = scalar_lea.vmem [#allocation16], %s3569_s19  ;;  %s3409_s28 = smov [#allocation5]  }
 0x132   : > { %s720_s21 = sshll.u32 %s713_s0, 4  ;;  %s510_s15 = sshll.u32 %s3409_s28, 4  ;;  %s3888_s21 = int_to_ptr.vmem [resolvable:$true] %s720_s21  ;;  %s511_s15 = int_to_ptr.vmem [resolvable:$true] %s510_s15 }
 0x133   : > { %s3123_s18 = scalar_lea.hbm %s3860_s3, 16  ;;  %s3128_s17 = scalar_lea.hbm %s4305_s11, 32 }
 0x134   : > { %p3124_p0 = scmp.ne.s32.totalorder %s3860_s3, %s3123_s18  ;;  %p3129_p12 = scmp.lt.u32.totalorder %s3860_s3, %s4305_s11 }
 0x135   : > { %p3130_p8 = scmp.lt.u32.totalorder %s3128_s17, %s3123_s18  ;;  %p3132_p6 = scmp.lt.u32.totalorder %s3123_s18, %s3860_s3 }
 0x136   : > { %p3126_p2 = pnand %p3124_p0, %p3633_p13 }
 0x137   : > { %p3131_p3 = por %p3130_p8, %p3129_p12 }
 0x138   : > { %p3127_p7 = pneg %p3126_p2 }
 0x139   : > { %p3133_p1 = por %p3132_p6, %p3131_p3 }
 0x13b   : > { %p3134_p10 = pnand %p3133_p1, %p3127_p7 }
 0x13d   : > { %3137 = shalt.err (!%p3134_p10)
}
 0x13e   : > { %s3138_s30 = scalar_lea.vmem %s3888_s21, 16  ;;  %s3410_s29 = smov [#allocation16]  }
 0x13f   : > { %p3139_p4 = scmp.ne.s32.totalorder %s3888_s21, %s3138_s30  ;;  %s3143_s0 = sshll.u32 %s3410_s29, 4  ;;  %s3144_s0 = int_to_ptr.vmem [resolvable:$false] %s3143_s0 }
 0x140   : > { %s3145_s5 = scalar_lea.vmem %s3144_s0, 32  ;;  %p3146_p0 = scmp.lt.s32.totalorder %s3888_s21, %s3144_s0 }
 0x141   : > { %p3141_p5 = pnand %p3139_p4, %p3633_p13  ;;  %p3147_p2 = scmp.lt.s32.totalorder %s3145_s5, %s3138_s30 }
 0x143   : > { %p3142_p11 = pneg %p3141_p5  ;;  %p3148_p12 = por %p3147_p2, %p3146_p0 }
 0x145   : > { %p3149_p8 = pnand %p3148_p12, %p3142_p11 }
 0x147   : > { %3152 = shalt.err (!%p3149_p8)
}
 0x148   : > { %2670 = dma.hbm_to_vmem [thread:$0]  (!%p4395_p9), %s3860_s3, 16, %s3888_s21, %s3627_s16  }
 0x149   : > { %s4399_s1 = sld [smem:[#allocation38_spill]]  ;;  %p4400_p3 = scmp.ne.s32.totalorder %s4375_s22, 0 }
 0x14f   : > { %s3153_s13 = scalar_lea.hbm %s4399_s1, 32 }
 0x150   : > { %p3154_p7 = scmp.ne.s32.totalorder %s4399_s1, %s3153_s13  ;;  %p3160_p10 = scmp.lt.u32.totalorder %s3153_s13, %s4399_s1 }
 0x152   : > { %p3156_p6 = pnand %p3154_p7, %p4400_p3 }
 0x154   : > { %p3157_p1 = pneg %p3156_p6 }
 0x156   : > { %p3162_p4 = pnand %p3160_p10, %p3157_p1 }
 0x158   : > { %3165 = shalt.err (!%p3162_p4)
}
 0x159   : > { %s3166_s29 = scalar_lea.vmem %s511_s15, 32  ;;  %p3174_p2 = scmp.lt.s32.totalorder %s511_s15, %s511_s15 }
 0x15a   : > { %p3167_p5 = scmp.ne.s32.totalorder %s511_s15, %s3166_s29  ;;  %p3175_p12 = scmp.lt.s32.totalorder %s3166_s29, %s3166_s29 }
 0x15c   : > { %p3169_p11 = pnand %p3167_p5, %p4400_p3  ;;  %p3176_p8 = por %p3175_p12, %p3174_p2 }
 0x15e   : > { %p3170_p0 = pneg %p3169_p11 }
 0x160   : > { %p3177_p9 = pnand %p3176_p8, %p3170_p0 }
 0x162   : > { %3180 = shalt.err (!%p3177_p9)
}
 0x163   : > { %s4401_s3 = sld [smem:[#allocation34_spill]]  ;;  %s4403_s5 = sshll.u32 %s3389_s25, 10 }
 0x164   : > { %s4404_s13 = sld [smem:[#allocation45_spill]]  ;;  %s4405_s17 = sshll.u32 %s3569_s19, 6 }
 0x165   : > { %s731_s2 = scalar_lea.vmem [#allocation17], %s4405_s17 }
 0x166   : > { %s738_s30 = sshll.u32 %s731_s2, 4  ;;  %s3939_s30 = int_to_ptr.vmem [resolvable:$true] %s738_s30 }
 0x169   : > { %p4402_p7 = scmp.ne.s32.totalorder %s4401_s3, 0 }
 0x16a   : > { %s3935_s24 = scalar_lea.hbm %s4404_s13, %s4403_s5  ;;  %s3186_s0 = scalar_lea.hbm %s4404_s13, 2048 }
 0x16b   : > { %2633 = dma.hbm_to_vmem [thread:$0]  (!%p4402_p7), %s4399_s1, 32, %s511_s15, [#allocation6]  }
 0x16c   : > { %s3181_s29 = scalar_lea.hbm %s3935_s24, 1024  ;;  %p3187_p10 = scmp.lt.u32.totalorder %s3935_s24, %s4404_s13 }
 0x16d   : > { %p3182_p9 = scmp.ne.s32.totalorder %s3935_s24, %s3181_s29  ;;  %p3188_p4 = scmp.lt.u32.totalorder %s3186_s0, %s3181_s29 }
 0x16e   : > { %p3190_p11 = scmp.lt.u32.totalorder %s3181_s29, %s3935_s24 }
 0x16f   : > { %p3184_p6 = pnand %p3182_p9, %p3633_p13  ;;  %p3189_p5 = por %p3188_p4, %p3187_p10 }
 0x171   : > { %p3185_p1 = pneg %p3184_p6  ;;  %p3191_p0 = por %p3190_p11, %p3189_p5 }
 0x173   : > { %p3192_p2 = pnand %p3191_p0, %p3185_p1 }
 0x175   : > { %3195 = shalt.err (!%p3192_p2)
}
 0x176   : > { %s3196_s18 = scalar_lea.vmem %s3939_s30, 1024  ;;  %s3411_s17 = smov [#allocation17]  }
 0x177   : > { %p3197_p12 = scmp.ne.s32.totalorder %s3939_s30, %s3196_s18  ;;  %s3201_s2 = sshll.u32 %s3411_s17, 4  ;;  %s3202_s2 = int_to_ptr.vmem [resolvable:$false] %s3201_s2 }
 0x178   : > { %s3203_s15 = scalar_lea.vmem %s3202_s2, 2048  ;;  %p3204_p6 = scmp.lt.s32.totalorder %s3939_s30, %s3202_s2 }
 0x179   : > { %p3199_p8 = pnand %p3197_p12, %p3633_p13  ;;  %p3205_p7 = scmp.lt.s32.totalorder %s3203_s15, %s3196_s18 }
 0x17b   : > { %p3200_p9 = pneg %p3199_p8  ;;  %p3206_p10 = por %p3205_p7, %p3204_p6 }
 0x17d   : > { %p3207_p4 = pnand %p3206_p10, %p3200_p9 }
 0x17f   : > { %3210 = shalt.err (!%p3207_p4)
}
 0x180   : > { %p4406_p1 = scmp.ne.s32.totalorder %s4373_s20, 0  ;;  %s3412_s29 = smov [#allocation19]  }
 0x181   : > { %s521_s21 = sshll.u32 %s3412_s29, 4  ;;  %s3413_s0 = smov [#allocation20]   ;;  %s522_s21 = int_to_ptr.vmem [resolvable:$true] %s521_s21 }
 0x182   : > { %2673 = dma.hbm_to_vmem [thread:$0]  (!%p4406_p1), %s3935_s24, 1024, %s3939_s30, %s3627_s16, %s4398_s27, %s4398_s27, %s4397_s4  }
 0x183   : > { %s532_s5 = sshll.u32 %s3413_s0, 4  ;;  %s4407_s17 = sld [smem:[#allocation47_spill]]  ;;  %s533_s5 = int_to_ptr.vmem [resolvable:$true] %s532_s5 }
 0x189   : > { %s3211_s2 = scalar_lea.hbm %s4407_s17, 16 }
 0x18a   : > { %p3212_p7 = scmp.ne.s32.totalorder %s4407_s17, %s3211_s2  ;;  %p3218_p0 = scmp.lt.u32.totalorder %s3211_s2, %s4407_s17 }
 0x18c   : > { %p3214_p5 = pnand %p3212_p7, %p4400_p3 }
 0x18e   : > { %p3215_p11 = pneg %p3214_p5 }
 0x190   : > { %p3220_p2 = pnand %p3218_p0, %p3215_p11 }
 0x192   : > { %3223 = shalt.err (!%p3220_p2)
}
 0x193   : > { %s3224_s4 = scalar_lea.vmem %s522_s21, 16  ;;  %s3231_s27 = scalar_lea.vmem %s522_s21, 32 }
 0x194   : > { %p3225_p12 = scmp.ne.s32.totalorder %s522_s21, %s3224_s4  ;;  %p3232_p6 = scmp.lt.s32.totalorder %s522_s21, %s522_s21 }
 0x195   : > { %p3233_p10 = scmp.lt.s32.totalorder %s3231_s27, %s3224_s4 }
 0x196   : > { %p3227_p8 = pnand %p3225_p12, %p4400_p3 }
 0x197   : > { %p3234_p4 = por %p3233_p10, %p3232_p6 }
 0x198   : > { %p3228_p9 = pneg %p3227_p8 }
 0x19a   : > { %p3235_p1 = pnand %p3234_p4, %p3228_p9 }
 0x19c   : > { %3238 = shalt.err (!%p3235_p1)
}
 0x19d   : > { %p4408_p7 = scmp.ne.s32.totalorder %s4401_s3, 0  ;;  %s4409_s30 = sld [smem:[#allocation48_spill]] }
 0x19f   : > { %2636 = dma.hbm_to_vmem [thread:$0]  (!%p4408_p7), %s4407_s17, 16, %s522_s21, [#allocation6]  }
 0x1a3   : > { %s3239_s29 = scalar_lea.hbm %s4409_s30, 16 }
 0x1a4   : > { %p3240_p5 = scmp.ne.s32.totalorder %s4409_s30, %s3239_s29  ;;  %p3246_p1 = scmp.lt.u32.totalorder %s3239_s29, %s4409_s30 }
 0x1a6   : > { %p3242_p11 = pnand %p3240_p5, %p4400_p3 }
 0x1a8   : > { %p3243_p0 = pneg %p3242_p11 }
 0x1aa   : > { %p3248_p2 = pnand %p3246_p1, %p3243_p0 }
 0x1ac   : > { %3251 = shalt.err (!%p3248_p2)
}
 0x1ad   : > { %s3252_s15 = scalar_lea.vmem %s533_s5, 16  ;;  %s3259_s21 = scalar_lea.vmem %s533_s5, 32 }
 0x1ae   : > { %p3253_p12 = scmp.ne.s32.totalorder %s533_s5, %s3252_s15  ;;  %p3260_p6 = scmp.lt.s32.totalorder %s533_s5, %s533_s5 }
 0x1af   : > { %p3261_p10 = scmp.lt.s32.totalorder %s3259_s21, %s3252_s15 }
 0x1b0   : > { %p3255_p8 = pnand %p3253_p12, %p4400_p3 }
 0x1b1   : > { %p3262_p4 = por %p3261_p10, %p3260_p6 }
 0x1b2   : > { %p3256_p9 = pneg %p3255_p8 }
 0x1b4   : > { %p3263_p13 = pnand %p3262_p4, %p3256_p9 }
 0x1b6   : > { %3266 = shalt.err (!%p3263_p13)
}
 0x1b7   : > { %2639 = dma.hbm_to_vmem [thread:$0]  (!%p4408_p7), %s4409_s30, 16, %s533_s5, [#allocation21]  }
 0x1b8   : > { %s4410_s22 = sld [smem:[#allocation46_spill]]  ;;  %s751_s29 = scalar_lea.vmem [#allocation18], %s3569_s19 }
 0x1b9   : > { %s758_s0 = sshll.u32 %s751_s29, 4  ;;  %p4412_p3 = scmp.ne.s32.totalorder %s4381_s12, 0  ;;  %s759_s0 = int_to_ptr.vmem [resolvable:$true] %s758_s0 }
 0x1be   : > { %s4411_s6 = smov %s4410_s22  ;;  %s4006_s7 = scalar_lea.hbm %s4410_s22, %s3725_s14 }
 0x1bf   : > { %s3267_s3 = scalar_lea.hbm %s4006_s7, 16  ;;  %s3272_s5 = scalar_lea.hbm %s4411_s6, 32 }
 0x1c0   : > { %p3268_p13 = scmp.ne.s32.totalorder %s4006_s7, %s3267_s3  ;;  %p3273_p7 = scmp.lt.u32.totalorder %s4006_s7, %s4411_s6 }
 0x1c1   : > { %p3274_p0 = scmp.lt.u32.totalorder %s3272_s5, %s3267_s3  ;;  %p3276_p2 = scmp.lt.u32.totalorder %s3267_s3, %s4006_s7 }
 0x1c2   : > { %p3270_p5 = pnand %p3268_p13, %p4412_p3 }
 0x1c3   : > { %p3275_p1 = por %p3274_p0, %p3273_p7 }
 0x1c4   : > { %p3271_p11 = pneg %p3270_p5 }
 0x1c5   : > { %p3277_p12 = por %p3276_p2, %p3275_p1 }
 0x1c7   : > { %p3278_p8 = pnand %p3277_p12, %p3271_p11 }
 0x1c9   : > { %3281 = shalt.err (!%p3278_p8)
}
 0x1ca   : > { %s3282_s19 = scalar_lea.vmem %s759_s0, 16  ;;  %s3414_s14 = smov [#allocation18]  }
 0x1cb   : > { %p3283_p9 = scmp.ne.s32.totalorder %s759_s0, %s3282_s19  ;;  %s3287_s21 = sshll.u32 %s3414_s14, 4  ;;  %s3288_s21 = int_to_ptr.vmem [resolvable:$false] %s3287_s21 }
 0x1cc   : > { %s3289_s4 = scalar_lea.vmem %s3288_s21, 32  ;;  %p3290_p4 = scmp.lt.s32.totalorder %s759_s0, %s3288_s21 }
 0x1cd   : > { %p3285_p6 = pnand %p3283_p9, %p4412_p3  ;;  %p3291_p13 = scmp.lt.s32.totalorder %s3289_s4, %s3282_s19 }
 0x1cf   : > { %p3286_p10 = pneg %p3285_p6  ;;  %p3292_p5 = por %p3291_p13, %p3290_p4 }
 0x1d1   : > { %p3293_p0 = pnand %p3292_p5, %p3286_p10 }
 0x1d3   : > { %3296 = shalt.err (!%p3293_p0)
}
 0x1d4   : > { %p4413_p7 = scmp.ne.s32.totalorder %s4373_s20, 0  ;;  %s4414_s27 = sld [smem:[#allocation33_spill]] }
 0x1d6   : > { %2676 = dma.hbm_to_vmem [thread:$0]  (!%p4413_p7), %s4006_s7, 16, %s759_s0, %s3627_s16  }
 0x1da   : > { %p4415_p11 = scmp.ne.s32.totalorder %s4414_s27, 0 }
 0x1db   : > { %s4416_s12 = sld [smem:[#allocation31_spill]] (!%p4415_p11) }
 0x1dc   : > { %767 = sbr.rel (%p4415_p11) target bundleno = 3505 (0xdb1), region = 84 }
 0x1e1   : > { %p4417_p3 = scmp.eq.s32.totalorder (!%p4415_p11), %s4416_s12, 0 }
 0x1e3   : > { %3348 = dma.done.wait (%p4417_p3), [#allocation3], 256   ;;  %p4418_p1 = pmov %p4417_p3 }
 0x1e5   : > { %3350 = vsyncadd (%p4418_p1), [#allocation3], 4294967040  ;;  %p4419_p2 = pmov %p4418_p1 }
 0x1e6   : > { %p4420_p12 = pmov %p4418_p1 }
 0x1e7   : > { %3352 = dma.done.wait (%p4419_p2), [#allocation6], 32  }
 0x1e8   : > { %3354 = vsyncadd (%p4420_p12), [#allocation6], 4294967264  ;;  %s4421_s20 = sld [smem:[#allocation29_spill]]  ;;  %s4422_s1 = sld [smem:[#allocation32_spill]] }
 0x1e9   : > { %s777_s24 = sand.u32 1, %s4416_s12  }
 0x1ea   : > { %s778_s7 = scalar_lea.sflag [#allocation3], %s777_s24 }
 0x1ee   : > { %s4039_s16 = sand.u32 1, %s4421_s20   ;;  %p4423_p8 = scmp.ne.s32.totalorder %s4422_s1, 0 }
 0x1ef   : > { %s2393_s22 = sshll.u32 %s4039_s16, 6 }
 0x1f0   : > { %s4042_s29 = scalar_lea.vmem [#allocation7], %s2393_s22 }
 0x1f1   : > { %3356 = dma.done.wait (%p4423_p8), %s778_s7, 3216  }
 0x1f2   : > { %3358 = vsyncadd (%p4423_p8), %s778_s7, 4294964080  ;;  %s2394_s0 = sshll.u32 %s4039_s16, 1  ;;  %s2395_s3 = sshll.u32 %s4039_s16, 5 }
 0x1f3   : > { %s4050_s28 = scalar_lea.vmem [#allocation8], %s2394_s0  ;;  %s4052_s18 = scalar_lea.vmem [#allocation9], %s2395_s3 }
 0x1f4   : > { %s807_s5 = scalar_lea.vmem [#allocation10], %s4039_s16  ;;  %s815_s2 = scalar_lea.vmem [#allocation11], %s4039_s16 }
 0x1f5   : > { %s823_s15 = scalar_lea.vmem [#allocation12], %s4039_s16  ;;  %s831_s19 = scalar_lea.vmem [#allocation13], %s4039_s16 }
 0x1f6   : > { %s839_s14 = scalar_lea.vmem [#allocation14], %s4039_s16  ;;  %s4059_s21 = scalar_lea.vmem [#allocation15], %s2395_s3 }
 0x1f7   : > { %s856_s4 = scalar_lea.vmem [#allocation16], %s4039_s16  ;;  %s4062_s27 = scalar_lea.vmem [#allocation17], %s2393_s22 }
 0x1f8   : > { %s873_s20 = scalar_lea.vmem [#allocation18], %s4039_s16  ;;  %p4424_p9 = pmov %p4418_p1 }
 0x1f9   : > { %p4425_p6 = pmov %p4418_p1 }
 0x1fa   : > { %3360 = dma.done.wait (%p4424_p9), [#allocation6], 16  }
 0x1fb   : > { %3362 = vsyncadd (%p4425_p6), [#allocation6], 4294967280  ;;  %p4426_p10 = pmov %p4418_p1 }
 0x1fc   : > { %p4427_p4 = pmov %p4418_p1 }
 0x1fd   : > { %3364 = dma.done.wait (%p4426_p10), [#allocation21], 16  }
 0x1fe   : > { %3366 = vsyncadd (%p4427_p4), [#allocation21], 4294967280  ;;  %s4428_s1 = sld [smem:[#allocation30_spill]] }
 0x204   : > { %p2400_p13 = scmp.ne.s32.totalorder %s4428_s1, 0 }
 0x205   : > { %v980_v0 = vld [vmem:[#allocation2] sm:$0xff] (!%p2400_p13)  ;;  %vm982_vm0 = vcmask (!%p2400_p13), 523264   ;;  %v981_v1 = vld [vmem:[#allocation2 + $0x8] sm:$0xff] (!%p2400_p13) }
 0x206   : > { %979 = sbr.rel (%p2400_p13) target bundleno = 525 (0x20d), region = 152  ;;  %983 = vst.msk [vmem:[#allocation22] sm:$0xff] (!%p2400_p13), %vm982_vm0, %v980_v0  ;;  %984 = vst.msk [vmem:[#allocation22 + $0x8] sm:$0xff] (!%p2400_p13), %vm982_vm0, %v981_v1 }
 0x20d PF: > { %v4074_v2 = vld [vmem:[#allocation22] sm:$0xff]  ;;  %vm990_vm1 = vcmask 523264   ;;  %v4076_v3 = vld [vmem:[#allocation22 + $0x8] sm:$0xff]  ;;  %v3415_v24 = vmov 0   ;;  %v2401_v33 = vld [vmem:[%s815_s2] ss:$0 sm:$0xff]  ;;  %v1054_v42 = vlaneseq }
 0x20e   : > { %v991_v4 = vsel %vm990_vm1, %v4074_v2, 0.0  ;;  %v994_v5 = vsel %vm990_vm1, %v4076_v3, 0.0  ;;  %v2769_v16 = vld [vmem:[%s4042_s29 + $0x4] ss:$8 sps:$4 sm:$0xff]   ;;  %v2771_v17 = vld [vmem:[%s4042_s29] ss:$8 sps:$4 sm:$0xff]   ;;  %1139 = vmatprep.mubr.bf16.mxu1 %v3415_v24 }
 0x20f   : > { %992 = vadd.xlane.f32.xlu0 %v991_v4  ;;  %1107 = vmatprep.subr.bf16.mxu1 %v2769_v16  ;;  %v2772_v18 = vld [vmem:[%s4042_s29 + $0x14] ss:$8 sps:$4 sm:$0xff]   ;;  %v2774_v19 = vld [vmem:[%s4042_s29 + $0x10] ss:$8 sps:$4 sm:$0xff]   ;;  %v2775_v20 = vld [vmem:[%s4042_s29 + $0x24] ss:$8 sps:$4 sm:$0xff]  }
 0x210   : > { %1108 = vmatpush1.bf16.msra.mxu1 %v2771_v17  ;;  %v2777_v21 = vld [vmem:[%s4042_s29 + $0x20] ss:$8 sps:$4 sm:$0xff]   ;;  %v2778_v22 = vld [vmem:[%s4042_s29 + $0x34] ss:$8 sps:$4 sm:$0xff]   ;;  %v2780_v23 = vld [vmem:[%s4042_s29 + $0x30] ss:$8 sps:$4 sm:$0xff]  }
 0x211   : > { %1109 = vmatprep.subr.bf16.mxu1 %v2772_v18  ;;  %v2402_v37 = vld [vmem:[%s823_s15] ss:$0 sm:$0xff]  ;;  %v4099_v43 = vshrl.u32 %v1054_v42, 7  ;;  %v3416_v44 = vmov 0.0   ;;  %v1042_v46 = vld [vmem:[%s4050_s28] sm:$0x3] }
 0x212   : > { %2503 = vmatprep.subr.bf16.mxu0 %v3416_v44  ;;  %vm3417_vm2 = vmmov 0   ;;  %s3418_s12 = smov 64   ;;  %s3419_s24 = smov 96   ;;  %vm1223_vm3 = vcmask 261120   ;;  %vm1477_vm4 = vcmask 1043456   ;;  %vm1173_vm5 = vcmask 1041408  }
 0x213   : > { %995 = vadd.xlane.f32.xlu0 %v994_v5  ;;  %v4104_v45 = vsub.s32 0, %v4099_v43  ;;  %v1060_v47 = vsub.s32 1, %v4099_v43  ;;  %2505 = vmatprep.mubr.msk.bf16.mxu0 %vm3417_vm2, %v3416_v44  ;;  %v3420_v17 = vmov 1966171168   ;;  %vm1417_vm6 = vcmask 64512   ;;  %s3421_s22 = smov 32  }
 0x214   : > { %1110 = vmatpush1.bf16.msra.mxu1 %v2774_v19  ;;  %v1177_v18 = vunpack.c.l.s4 %v3420_v17  ;;  %v987_v19 = vld [vmem:[#allocation5] sm:$0x3]  ;;  %s4429_s7 = sld [smem:[#allocation30_spill]] }
 0x215   : > { %1111 = vmatprep.subr.bf16.mxu1 %v2775_v20  ;;  %v1057_v48 = vrot.slane %v1042_v46, %v4104_v45  ;;  %v1061_v50 = vrot.slane %v1042_v46, %v1060_v47 }
 0x216   : > { %v1178_v20 = vunpack.c.0.s8 %v1177_v18 }
 0x218   : > { %1112 = vmatpush1.bf16.msra.mxu1 %v2777_v21  ;;  %v1171_v21 = vrot.slane %v987_v19, 6 }
 0x219   : > { %1113 = vmatprep.subr.bf16.mxu1 %v2778_v22  ;;  %v1181_v22 = vsub.s32 %v1178_v20, %v4099_v43 }
 0x21a   : > { %p2443_p5 = scmp.ge.s32.totalorder %s4429_s7, 1 }
 0x21c   : > { %1114 = vmatpush1.bf16.msra.mxu1 %v2780_v23  ;;  %v1174_v23 = vsel %vm1173_vm5, %v987_v19, %v1171_v21 }
 0x21d   : > { %2491 = vmatprep.subr.bf16.mxu1 %v3416_v44  ;;  %v1182_v24 = vrot.slane %v1174_v23, %v1181_v22 }
 0x29c   : > { %v993_v6 = vpop.xlane.xlu0 %992 }
 0x29d   : > { %v998_v7 = vmul.f32 0.015625, %v993_v6 }
 0x29f   : > { %v1000_v8 = vsub.f32 %v4074_v2, %v998_v7 }
 0x2a0   : > { %v996_v9 = vpop.xlane.xlu0 %995 }
 0x2a1   : > { %v999_v10 = vmul.f32 0.015625, %v996_v9  ;;  %v1002_v11 = vmul.f32 %v1000_v8, %v1000_v8 }
 0x2a3   : > { %v1001_v12 = vsub.f32 %v4076_v3, %v999_v10  ;;  %v1004_v13 = vsel %vm990_vm1, %v1002_v11, 0.0 }
 0x2a4   : > { %1005 = vadd.xlane.f32.xlu1 %v1004_v13 }
 0x2a5   : > { %v1003_v14 = vmul.f32 %v1001_v12, %v1001_v12 }
 0x2a7   : > { %v1007_v15 = vsel %vm990_vm1, %v1003_v14, 0.0 }
 0x2a8   : > { %1008 = vadd.xlane.f32.xlu1 %v1007_v15 }
 0x331   : > { %v1006_v25 = vpop.xlane.xlu1 %1005 }
 0x332   : > { %v1010_v26 = vmul.f32 0.015625, %v1006_v25  ;;  %v1190_v25 = vrot.slane %v1182_v24, %v1181_v22 }
 0x334   : > { %v1012_v27 = vadd.f32 1e-06, %v1010_v26  ;;  %v1203_v26 = vrot.slane %v1190_v25, %v4104_v45  ;;  %v1198_v42 = vcombine.high %v1190_v25, %v1190_v25 }
 0x335   : > { %v1009_v28 = vpop.xlane.xlu1 %1008 }
 0x336   : > { %2797 = vrsqrt.f32 %v1012_v27  ;;  %v1011_v29 = vmul.f32 0.015625, %v1009_v28  ;;  %v1183_v27 = vcombine.high %v1182_v24, %v1182_v24  ;;  %v1211_v46 = vrot.slane %v1198_v42, %v4104_v45 }
 0x338   : > { %v1013_v30 = vadd.f32 1e-06, %v1011_v29 }
 0x33a   : > { %2799 = vrsqrt.f32 %v1013_v30 }
 0x340   : > { %v2798_v31 = vpop.eup %2797 }
 0x341   : > { %v1016_v32 = vmul.f32 %v2798_v31, %v1000_v8  ;;  %v1197_v31 = vrot.slane %v1183_v27, %v1181_v22 }
 0x343   : > { %v1024_v36 = vmul.f32 %v2401_v33, %v1016_v32  ;;  %v1199_v43 = vcombine.high %v1197_v31, %v1197_v31 }
 0x344   : > { %v2800_v34 = vpop.eup %2799 }
 0x345   : > { %v1017_v35 = vmul.f32 %v2800_v34, %v1001_v12  ;;  %v1032_v39 = vadd.f32 %v2402_v37, %v1024_v36  ;;  %v1215_v47 = vrot.slane %v1199_v43, %v4104_v45 }
 0x347   : > { %v1025_v38 = vmul.f32 %v2401_v33, %v1017_v35  ;;  %v1207_v35 = vrot.slane %v1197_v31, %v4104_v45 }
 0x349   : > { %v1033_v40 = vadd.f32 %v2402_v37, %v1025_v38 }
 0x34b   : > { %v1052_v41 = vpack.c.bf16 %v1033_v40, %v1032_v39 }
 0x34d   : > { %2411 = vmatmul.mubr.msk.bf16.vlgmr.msra.gmra.mrb[0].mxu1 %vm990_vm1, %v1052_v41 }
 0x34e   : > { %2493 = vmatprep.mubr.msk.bf16.mxu1 %vm3417_vm2, %v3416_v44 }
 0x420   : > { %v1141_v49 = vpop.f32.mrb[0].mxu1 }
 0x421   : > { %v1142_v51 = vadd.f32 %v1141_v49, %v1057_v48  ;;  %v1143_v52 = vpop.f32.mrb[1].mxu1 }
 0x422   : > { %v1145_v53 = vpop.f32.mrb[2].mxu1  ;;  %v4113_v57 = vadd.f32 %v1143_v52, %v1061_v50 }
 0x423   : > { %v1166_v54 = vpack.c.bf16 %v1142_v51, %v1142_v51  ;;  %v1146_v55 = vadd.f32 %v1145_v53, %v1057_v48  ;;  %v1147_v56 = vpop.f32.mrb[3].mxu1 }
 0x424   : > { %v4115_v58 = vadd.f32 %v1147_v56, %v1061_v50  ;;  %v1470_v13 = vpack.c.bf16 %v4113_v57, %v4113_v57 }
 0x425   : > { %v2754_v59 = vpack.i.bf16 %v1146_v55, %v1142_v51  ;;  %1221 = vrot.lane.b32.xlu1 %v1166_v54, %s3418_s12  ;;  %v1167_v61 = vpack.c.bf16 %v1146_v55, %v1146_v55 }
 0x426   : > { %v2759_v60 = vpack.i.bf16 %v4115_v58, %v4113_v57  ;;  %v1471_v14 = vpack.c.bf16 %v4115_v58, %v4115_v58  ;;  %v1479_v15 = vsel %vm1477_vm4, %v1470_v13, 0 }
 0x427   : > { %2755 = vrot.lane.b32.xlu0 %v2754_v59, %s3419_s24 }
 0x428   : > { %v1525_v16 = vsel %vm1477_vm4, %v1471_v14, 0 }
 0x429   : > { %1271 = vrot.lane.b32.xlu1 %v1167_v61, %s3418_s12 }
 0x497   : > { %v1222_v62 = vpop.permute.xlu1 %1221 }
 0x498   : > { %v1228_v63 = vsel %vm1223_vm3, %v1222_v62, 0 }
 0x499   : > { %v2756_v0 = vpop.permute.xlu0 %2755  ;;  %2492 = vmatpush3.bf16.xpose.msra.mxu1 %v1228_v63 }
 0x49a   : > { %v2758_v1 = vunpack.i.h.bf16 %v2756_v0  ;;  %v2757_v4 = vunpack.i.l.bf16 %v2756_v0  ;;  %2497 = vmatprep.subr.bf16.mxu1 %v3416_v44 }
 0x49b   : > { %v1272_v7 = vpop.permute.xlu1 %1271 }
 0x49c   : > { %v1169_v5 = vpack.c.bf16 %v2758_v1, %v2758_v1  ;;  %v1168_v6 = vpack.c.bf16 %v2757_v4, %v2757_v4  ;;  %v1277_v8 = vsel %vm1223_vm3, %v1272_v7, 0 }
 0x49e   : > { %1369 = vrot.lane.b32.xlu0 %v1169_v5, %s3418_s12  ;;  %1320 = vrot.lane.b32.xlu1 %v1168_v6, %s3418_s12 }
 0x4a0   : > { %2494 = vmatmul.mubr.msk.bf16.vlgmr.msra.gmra.mrb[4].mxu1 %vm1223_vm3, %v1166_v54 }
 0x4a1   : > { %2498 = vmatpush3.bf16.xpose.msra.mxu1 %v1277_v8  ;;  %2499 = vmatprep.mubr.msk.bf16.mxu1 %vm3417_vm2, %v3416_v44 }
 0x4a2   : > { %2509 = vmatprep.subr.bf16.mxu1 %v3416_v44 }
 0x4a8   : > { %2500 = vmatmul.mubr.msk.bf16.vlgmr.msra.gmra.mrb[8].mxu1 %vm1223_vm3, %v1167_v61 }
 0x4a9   : > { %2511 = vmatprep.mubr.msk.bf16.mxu1 %vm3417_vm2, %v3416_v44 }
 0x510   : > { %v1370_v9 = vpop.permute.xlu0 %1369  ;;  %v1321_v10 = vpop.permute.xlu1 %1320 }
 0x511   : > { %v1375_v11 = vsel %vm1223_vm3, %v1370_v9, 0  ;;  %v1326_v12 = vsel %vm1223_vm3, %v1321_v10, 0 }
 0x512   : > { %2504 = vmatpush3.bf16.xpose.msra.mxu0 %v1326_v12  ;;  %2510 = vmatpush3.bf16.xpose.msra.mxu1 %v1375_v11 }
 0x513   : > { %2515 = vmatprep.subr.bf16.mxu0 %v3416_v44  ;;  %2521 = vmatprep.subr.bf16.mxu1 %v3416_v44 }
 0x519   : > { %2506 = vmatmul.mubr.msk.bf16.vlgmr.msra.gmra.mrb[0].mxu0 %vm1223_vm3, %v1168_v6  ;;  %2512 = vmatmul.mubr.msk.bf16.vlgmr.msra.gmra.mrb[12].mxu1 %vm1223_vm3, %v1169_v5 }
 0x51a   : > { %2516 = vmatpush3.bf16.msra.mxu0 %v1479_v15  ;;  %2522 = vmatpush3.bf16.msra.mxu1 %v1525_v16 }
 0x51b   : > { %2517 = vmatprep.mubr.msk.bf16.mxu0 %vm3417_vm2, %v3416_v44  ;;  %2523 = vmatprep.mubr.msk.bf16.mxu1 %vm3417_vm2, %v3416_v44 }
 0x51c   : > { %2527 = vmatprep.subr.bf16.mxu0 %v3416_v44  ;;  %2533 = vmatprep.subr.bf16.mxu1 %v3416_v44 }
 0x573   : > { %v1264_v28 = vpop.f32.mrb[4].mxu1 }
 0x574   : > { %v1265_v29 = vadd.f32 %v1264_v28, %v1203_v26  ;;  %v2495_v30 = vpop.f32.mrb[5].mxu1 }
 0x575   : > { %v1267_v32 = vpop.f32.mrb[6].mxu1 }
 0x576   : > { %v2496_v33 = vpop.f32.mrb[7].mxu1  ;;  %v1418_v34 = vsel %vm1417_vm6, %v1265_v29, -inf }
 0x577   : > { %1419 = vmax.xlane.f32.xlu1 %v1418_v34 }
 0x57b   : > { %v1313_v36 = vpop.f32.mrb[8].mxu1 }
 0x57c   : > { %v1314_v37 = vadd.f32 %v1313_v36, %v1207_v35  ;;  %v2501_v38 = vpop.f32.mrb[9].mxu1 }
 0x57d   : > { %v1316_v39 = vpop.f32.mrb[10].mxu1 }
 0x57e   : > { %v2502_v40 = vpop.f32.mrb[11].mxu1  ;;  %v1421_v41 = vsel %vm1417_vm6, %v1314_v37, -inf }
 0x57f   : > { %1422 = vmax.xlane.f32.xlu0 %v1421_v41  ;;  %v2781_v41 = vld [vmem:[%s4052_s18] sm:$0xff]  }
 0x5ec   : > { %v1362_v48 = vpop.f32.mrb[0].mxu0  ;;  %v1411_v49 = vpop.f32.mrb[12].mxu1 }
 0x5ed   : > { %v1363_v50 = vadd.f32 %v1362_v48, %v1211_v46  ;;  %v2507_v51 = vpop.f32.mrb[1].mxu0  ;;  %v2513_v52 = vpop.f32.mrb[13].mxu1  ;;  %v1412_v55 = vadd.f32 %v1411_v49, %v1215_v47  ;;  %v2782_v46 = vld [vmem:[%s4052_s18 + $0x8] sm:$0xff]   ;;  %v2783_v48 = vld [vmem:[%s4052_s18 + $0x10] sm:$0xff]  }
 0x5ee   : > { %v1365_v53 = vpop.f32.mrb[2].mxu0  ;;  %v1414_v54 = vpop.f32.mrb[14].mxu1 }
 0x5ef   : > { %v2508_v56 = vpop.f32.mrb[3].mxu0  ;;  %v2514_v59 = vpop.f32.mrb[15].mxu1  ;;  %v1424_v61 = vsel %vm1417_vm6, %v1363_v50, -inf  ;;  %v1427_v62 = vsel %vm1417_vm6, %v1412_v55, -inf  ;;  %v2784_v53 = vld [vmem:[%s4052_s18 + $0x18] sm:$0xff]  }
 0x5f0   : > { %1425 = vmax.xlane.f32.xlu0 %v1424_v61 }
 0x5f4   : > { %1428 = vmax.xlane.f32.xlu0 %v1427_v62 }
 0x604   : > { %v1420_v63 = vpop.xlane.xlu1 %1419 }
 0x605   : > { %v1430_v0 = vsub.f32 %v1265_v29, %v1420_v63 }
 0x607   : > { %v1434_v1 = vmul.f32 1.442695, %v1430_v0 }
 0x609   : > { %2801 = vpow2.f32 %v1434_v1 }
 0x60c   : > { %v1423_v45 = vpop.xlane.xlu0 %1422 }
 0x60d   : > { %v1431_v4 = vsub.f32 %v1314_v37, %v1423_v45 }
 0x60f   : > { %v1436_v5 = vmul.f32 1.442695, %v1431_v4 }
 0x611   : > { %2803 = vpow2.f32 %v1436_v5 }
 0x613   : > { %v2802_v6 = vpop.eup %2801 }
 0x614   : > { %v1442_v7 = vsel %vm1417_vm6, %v2802_v6, 0.0 }
 0x615   : > { %1443 = vadd.xlane.f32.xlu1 %v1442_v7 }
 0x61b   : > { %v2804_v8 = vpop.eup %2803 }
 0x61c   : > { %v1445_v9 = vsel %vm1417_vm6, %v2804_v8, 0.0 }
 0x61d   : > { %1446 = vadd.xlane.f32.xlu0 %v1445_v9  ;;  %v2420_v9 = vld [vmem:[%s807_s5] ss:$0 sm:$0xff] }
 0x67d   : > { %v1426_v10 = vpop.xlane.xlu0 %1425 }
 0x67e   : > { %v1432_v11 = vsub.f32 %v1363_v50, %v1426_v10 }
 0x680   : > { %v1438_v12 = vmul.f32 1.442695, %v1432_v11 }
 0x681   : > { %v1429_v13 = vpop.xlane.xlu0 %1428 }
 0x682   : > { %2805 = vpow2.f32 %v1438_v12  ;;  %v1433_v14 = vsub.f32 %v1412_v55, %v1429_v13 }
 0x684   : > { %v1440_v15 = vmul.f32 1.442695, %v1433_v14 }
 0x686   : > { %2807 = vpow2.f32 %v1440_v15 }
 0x68c   : > { %v2806_v16 = vpop.eup %2805 }
 0x68d   : > { %v1448_v17 = vsel %vm1417_vm6, %v2806_v16, 0.0 }
 0x68e   : > { %1449 = vadd.xlane.f32.xlu1 %v1448_v17 }
 0x690   : > { %v2808_v18 = vpop.eup %2807 }
 0x691   : > { %v1451_v19 = vsel %vm1417_vm6, %v2808_v18, 0.0 }
 0x692   : > { %1452 = vadd.xlane.f32.xlu0 %v1451_v19 }
 0x69f   : > { %2760 = vrot.lane.b32.xlu1 %v2759_v60, %s3419_s24 }
 0x6a2   : > { %v1444_v20 = vpop.xlane.xlu1 %1443 }
 0x6a3   : > { %2809 = vrcp.f32 %v1444_v20 }
 0x6aa   : > { %v1447_v21 = vpop.xlane.xlu0 %1446 }
 0x6ab   : > { %2811 = vrcp.f32 %v1447_v21 }
 0x6ad   : > { %v2810_v22 = vpop.eup %2809 }
 0x6ae   : > { %v1462_v23 = vmul.f32 %v2810_v22, %v2802_v6 }
 0x6b0   : > { %v1466_v24 = vpack.c.bf16 %v1462_v23, %v1462_v23 }
 0x6b2   : > { %2518 = vmatmul.mubr.msk.bf16.vlgmr.msra.gmra.mrb[4].mxu0 %vm1417_vm6, %v1466_v24 }
 0x6b3   : > { %2529 = vmatprep.mubr.msk.bf16.mxu0 %vm3417_vm2, %v3416_v44 }
 0x6b5   : > { %v2812_v25 = vpop.eup %2811 }
 0x6b6   : > { %v1463_v26 = vmul.f32 %v2812_v25, %v2804_v8 }
 0x6b8   : > { %v1467_v27 = vpack.c.bf16 %v1463_v26, %v1463_v26 }
 0x6ba   : > { %2524 = vmatmul.mubr.msk.bf16.vlgmr.msra.gmra.mrb[16].mxu1 %vm1417_vm6, %v1467_v27 }
 0x6bb   : > { %2535 = vmatprep.mubr.msk.bf16.mxu1 %vm3417_vm2, %v3416_v44 }
 0x71b   : > { %v1450_v57 = vpop.xlane.xlu1 %1449 }
 0x71c   : > { %2813 = vrcp.f32 %v1450_v57  ;;  %v2785_v57 = vld [vmem:[%s4059_s21] sm:$0xff]  }
 0x71f   : > { %v1453_v58 = vpop.xlane.xlu0 %1452  ;;  %v2761_v60 = vpop.permute.xlu1 %2760 }
 0x720   : > { %2815 = vrcp.f32 %v1453_v58  ;;  %v2763_v28 = vunpack.i.h.bf16 %v2761_v60  ;;  %v2762_v29 = vunpack.i.l.bf16 %v2761_v60  ;;  %v2786_v58 = vld [vmem:[%s4059_s21 + $0x8] sm:$0xff]   ;;  %v2787_v60 = vld [vmem:[%s4059_s21 + $0x10] sm:$0xff]  }
 0x722   : > { %v1473_v30 = vpack.c.bf16 %v2763_v28, %v2763_v28  ;;  %v1472_v31 = vpack.c.bf16 %v2762_v29, %v2762_v29  ;;  %v2788_v28 = vld [vmem:[%s4059_s21 + $0x18] sm:$0xff]   ;;  %v2789_v29 = vld [vmem:[%s4062_s27] sm:$0xff]  }
 0x724   : > { %v1571_v32 = vsel %vm1477_vm4, %v1472_v31, 0  ;;  %v1617_v33 = vsel %vm1477_vm4, %v1473_v30, 0  ;;  %v2790_v30 = vld [vmem:[%s4062_s27 + $0x8] sm:$0xff]   ;;  %v2791_v31 = vld [vmem:[%s4062_s27 + $0x10] sm:$0xff]  }
 0x725   : > { %2528 = vmatpush3.bf16.msra.mxu0 %v1571_v32  ;;  %2534 = vmatpush3.bf16.msra.mxu1 %v1617_v33  ;;  %v2792_v32 = vld [vmem:[%s4062_s27 + $0x18] sm:$0xff]   ;;  %v2793_v33 = vld [vmem:[%s4062_s27 + $0x20] sm:$0xff]  }
 0x726   : > { %v2814_v34 = vpop.eup %2813  ;;  %2539 = vmatprep.subr.bf16.mxu0 %v3416_v44  ;;  %2551 = vmatprep.subr.bf16.mxu1 %v3416_v44 }
 0x727   : > { %v1464_v35 = vmul.f32 %v2814_v34, %v2806_v16  ;;  %v2794_v34 = vld [vmem:[%s4062_s27 + $0x28] sm:$0xff]  }
 0x729   : > { %v1468_v36 = vpack.c.bf16 %v1464_v35, %v1464_v35 }
 0x72a   : > { %v2816_v37 = vpop.eup %2815 }
 0x72b   : > { %v1465_v38 = vmul.f32 %v2816_v37, %v2808_v18  ;;  %2530 = vmatmul.mubr.msk.bf16.vlgmr.msra.gmra.mrb[8].mxu0 %vm1417_vm6, %v1468_v36 }
 0x72c   : > { %2547 = vmatprep.mubr.msk.bf16.mxu0 %vm3417_vm2, %v3416_v44  ;;  %2540 = vmatpush3.bf16.msra.mxu0 %v2781_v41 }
 0x72d   : > { %v1469_v39 = vpack.c.bf16 %v1465_v38, %v1465_v38  ;;  %2541 = vmatprep.subr.bf16.mxu0 %v3416_v44 }
 0x72f   : > { %2536 = vmatmul.mubr.msk.bf16.vlgmr.msra.gmra.mrb[20].mxu1 %vm1417_vm6, %v1469_v39 }
 0x730   : > { %2559 = vmatprep.mubr.msk.bf16.mxu1 %vm3417_vm2, %v3416_v44  ;;  %2542 = vmatpush3.bf16.msra.mxu0 %v2782_v46 }
 0x731   : > { %2543 = vmatprep.subr.bf16.mxu0 %v3416_v44  ;;  %2552 = vmatpush3.bf16.msra.mxu1 %v2785_v57 }
 0x732   : > { %2553 = vmatprep.subr.bf16.mxu1 %v3416_v44 }
 0x734   : > { %2544 = vmatpush3.bf16.msra.mxu0 %v2783_v48 }
 0x735   : > { %2545 = vmatprep.subr.bf16.mxu0 %v3416_v44  ;;  %2554 = vmatpush3.bf16.msra.mxu1 %v2786_v58 }
 0x736   : > { %2555 = vmatprep.subr.bf16.mxu1 %v3416_v44 }
 0x738   : > { %2546 = vmatpush3.bf16.msra.mxu0 %v2784_v53 }
 0x739   : > { %2563 = vmatprep.subr.bf16.mxu0 %v3416_v44  ;;  %2556 = vmatpush3.bf16.msra.mxu1 %v2787_v60 }
 0x73a   : > { %2557 = vmatprep.subr.bf16.mxu1 %v3416_v44 }
 0x73d   : > { %2558 = vmatpush3.bf16.msra.mxu1 %v2788_v28 }
 0x785   : > { %v1515_v40 = vpop.f32.mrb[4].mxu0 }
 0x786   : > { %v2519_v42 = vpop.f32.mrb[5].mxu0 }
 0x787   : > { %v1518_v43 = vpop.f32.mrb[6].mxu0  ;;  %v2426_v42 = vld [vmem:[%s831_s19] ss:$0 sm:$0xff] }
 0x788   : > { %v2520_v47 = vpop.f32.mrb[7].mxu0 }
 0x78d   : > { %v1561_v49 = vpop.f32.mrb[16].mxu1 }
 0x78e   : > { %v2525_v50 = vpop.f32.mrb[17].mxu1 }
 0x78f   : > { %v1564_v51 = vpop.f32.mrb[18].mxu1 }
 0x790   : > { %v2526_v52 = vpop.f32.mrb[19].mxu1 }
 0x7fe   : > { %v1607_v54 = vpop.f32.mrb[8].mxu0 }
 0x7ff   : > { %v2531_v55 = vpop.f32.mrb[9].mxu0 }
 0x800   : > { %v1610_v56 = vpop.f32.mrb[10].mxu0  ;;  %v2796_v55 = vld [vmem:[%s4062_s27 + $0x38] sm:$0xff]  }
 0x801   : > { %v2532_v59 = vpop.f32.mrb[11].mxu0  ;;  %v2428_v56 = vld [vmem:[%s856_s4] ss:$0 sm:$0xff] }
 0x802   : > { %v1653_v61 = vpop.f32.mrb[20].mxu1 }
 0x803   : > { %v2764_v62 = vpack.i.bf16 %v1653_v61, %v1607_v54  ;;  %v2537_v63 = vpop.f32.mrb[21].mxu1  ;;  %v2795_v54 = vld [vmem:[%s4062_s27 + $0x30] sm:$0xff]  }
 0x804   : > { %v1656_v0 = vpop.f32.mrb[22].mxu1 }
 0x805   : > { %v2538_v1 = vpop.f32.mrb[23].mxu1  ;;  %2765 = vrot.lane.b32.xlu0 %v2764_v62, %s3421_s22 }
 0x877   : > { %v2766_v45 = vpop.permute.xlu0 %2765 }
 0x878   : > { %v2768_v4 = vunpack.i.h.bf16 %v2766_v45  ;;  %v2767_v5 = vunpack.i.l.bf16 %v2766_v45 }
 0x87a   : > { %v1668_v6 = vsel %vm1223_vm3, %v1561_v49, %v2768_v4  ;;  %v1667_v7 = vsel %vm1223_vm3, %v1515_v40, %v2767_v5  ;;  %v2427_v49 = vld [vmem:[%s839_s14] ss:$0 sm:$0xff] }
 0x87b   : > { %v1669_v8 = vpack.c.bf16 %v1668_v6, %v1667_v7  ;;  %v2434_v6 = vld [vmem:[%s873_s20] ss:$0 sm:$0xff] }
 0x87d   : > { %2548 = vmatmul.mubr.msk.bf16.vlgmr.msra.gmra.mrb[12].mxu0 %vm990_vm1, %v1669_v8 }
 0x87e   : > { %2579 = vmatprep.mubr.msk.bf16.mxu0 %vm3417_vm2, %v3416_v44  ;;  %2564 = vmatpush3.bf16.msra.mxu0 %v2789_v29 }
 0x87f   : > { %2565 = vmatprep.subr.bf16.mxu0 %v3416_v44 }
 0x882   : > { %2566 = vmatpush3.bf16.msra.mxu0 %v2790_v30 }
 0x883   : > { %2567 = vmatprep.subr.bf16.mxu0 %v3416_v44 }
 0x886   : > { %2568 = vmatpush3.bf16.msra.mxu0 %v2791_v31 }
 0x887   : > { %2569 = vmatprep.subr.bf16.mxu0 %v3416_v44 }
 0x88a   : > { %2570 = vmatpush3.bf16.msra.mxu0 %v2792_v32 }
 0x88b   : > { %2571 = vmatprep.subr.bf16.mxu0 %v3416_v44 }
 0x88e   : > { %2572 = vmatpush3.bf16.msra.mxu0 %v2793_v33 }
 0x88f   : > { %2573 = vmatprep.subr.bf16.mxu0 %v3416_v44 }
 0x892   : > { %2574 = vmatpush3.bf16.msra.mxu0 %v2794_v34 }
 0x893   : > { %2575 = vmatprep.subr.bf16.mxu0 %v3416_v44 }
 0x896   : > { %2576 = vmatpush3.bf16.msra.mxu0 %v2795_v54 }
 0x897   : > { %2577 = vmatprep.subr.bf16.mxu0 %v3416_v44 }
 0x89a   : > { %2578 = vmatpush3.bf16.msra.mxu0 %v2796_v55 }
 0x950   : > { %v1737_v10 = vpop.f32.mrb[12].mxu0 }
 0x951   : > { %v1738_v11 = vadd.f32 %v2420_v9, %v1737_v10  ;;  %v2549_v12 = vpop.f32.mrb[13].mxu0 }
 0x952   : > { %v1740_v13 = vpop.f32.mrb[14].mxu0 }
 0x953   : > { %v4197_v14 = vadd.f32 %v1738_v11, %v4074_v2  ;;  %v1741_v15 = vadd.f32 %v2420_v9, %v1740_v13  ;;  %v2550_v16 = vpop.f32.mrb[15].mxu0 }
 0x955   : > { %v4200_v17 = vadd.f32 %v1741_v15, %v4076_v3  ;;  %v1748_v18 = vsel %vm990_vm1, %v4197_v14, 0.0 }
 0x956   : > { %1749 = vadd.xlane.f32.xlu1 %v1748_v18 }
 0x957   : > { %v1751_v19 = vsel %vm990_vm1, %v4200_v17, 0.0 }
 0x958   : > { %1752 = vadd.xlane.f32.xlu0 %v1751_v19 }
 0x9e3   : > { %v1750_v20 = vpop.xlane.xlu1 %1749 }
 0x9e4   : > { %v1754_v21 = vmul.f32 0.015625, %v1750_v20 }
 0x9e5   : > { %v1753_v22 = vpop.xlane.xlu0 %1752 }
 0x9e6   : > { %v1756_v2 = vsub.f32 %v4197_v14, %v1754_v21  ;;  %v1755_v23 = vmul.f32 0.015625, %v1753_v22 }
 0x9e8   : > { %v1757_v3 = vsub.f32 %v4200_v17, %v1755_v23  ;;  %v1758_v24 = vmul.f32 %v1756_v2, %v1756_v2 }
 0x9ea   : > { %v1760_v25 = vsel %vm990_vm1, %v1758_v24, 0.0  ;;  %v1759_v26 = vmul.f32 %v1757_v3, %v1757_v3 }
 0x9eb   : > { %1761 = vadd.xlane.f32.xlu1 %v1760_v25 }
 0x9ec   : > { %v1763_v27 = vsel %vm990_vm1, %v1759_v26, 0.0 }
 0x9ed   : > { %1764 = vadd.xlane.f32.xlu0 %v1763_v27 }
 0xa78   : > { %v1762_v35 = vpop.xlane.xlu1 %1761 }
 0xa79   : > { %v1766_v36 = vmul.f32 0.015625, %v1762_v35 }
 0xa7a   : > { %v1765_v37 = vpop.xlane.xlu0 %1764 }
 0xa7b   : > { %v1768_v38 = vadd.f32 1e-06, %v1766_v36  ;;  %v1767_v39 = vmul.f32 0.015625, %v1765_v37 }
 0xa7d   : > { %2817 = vrsqrt.f32 %v1768_v38  ;;  %v1769_v40 = vadd.f32 1e-06, %v1767_v39 }
 0xa7f   : > { %2819 = vrsqrt.f32 %v1769_v40 }
 0xa87   : > { %v2818_v41 = vpop.eup %2817 }
 0xa88   : > { %v1772_v43 = vmul.f32 %v2818_v41, %v1756_v2 }
 0xa89   : > { %v2820_v46 = vpop.eup %2819 }
 0xa8a   : > { %v1780_v47 = vmul.f32 %v2426_v42, %v1772_v43  ;;  %v1773_v48 = vmul.f32 %v2820_v46, %v1757_v3 }
 0xa8c   : > { %v1781_v50 = vmul.f32 %v2426_v42, %v1773_v48  ;;  %v1788_v51 = vadd.f32 %v2427_v49, %v1780_v47 }
 0xa8e   : > { %v1789_v52 = vadd.f32 %v2427_v49, %v1781_v50 }
 0xa90   : > { %v1816_v53 = vpack.c.bf16 %v1789_v52, %v1788_v51 }
 0xa92   : > { %2560 = vmatmul.mubr.msk.bf16.vlgmr.msra.gmra.mrb[24].mxu1 %vm990_vm1, %v1816_v53 }
 0xb65   : > { %v1884_v59 = vpop.f32.mrb[24].mxu1 }
 0xb66   : > { %v1885_v61 = vadd.f32 %v2428_v56, %v1884_v59  ;;  %v2561_v62 = vpop.f32.mrb[25].mxu1 }
 0xb67   : > { %v1887_v63 = vpop.f32.mrb[26].mxu1 }
 0xb68   : > { %v1888_v0 = vadd.f32 %v2428_v56, %v1887_v63  ;;  %v2562_v1 = vpop.f32.mrb[27].mxu1  ;;  %v1891_v45 = vmax.f32 %v1885_v61, 0.0 }
 0xb6a   : > { %v1892_v4 = vmax.f32 %v1888_v0, 0.0 }
 0xb6c   : > { %v1893_v5 = vpack.c.bf16 %v1892_v4, %v1891_v45 }
 0xb6e   : > { %2580 = vmatmul.mubr.bf16.vlgmr.msra.gmra.mrb[16].mxu0 %v1893_v5 }
 0xc40   : > { %1994 = sbr.rel (%p2443_p5) target bundleno = 3145 (0xc49), region = 156 }
 0xc41   : > { %v1982_v7 = vpop.f32.mrb[16].mxu0 }
 0xc42   : > { %v1983_v8 = vadd.f32 %v2434_v6, %v1982_v7  ;;  %v2581_v9 = vpop.f32.mrb[17].mxu0 }
 0xc43   : > { %v1985_v44 = vpop.f32.mrb[18].mxu0 }
 0xc44   : > { %v1989_v10 = vadd.f32 %v1983_v8, %v4197_v14  ;;  %v1986_v11 = vadd.f32 %v2434_v6, %v1985_v44  ;;  %v2582_v12 = vpop.f32.mrb[19].mxu0 }
 0xc46   : > { %v1990_v13 = vadd.f32 %v1986_v11, %v4200_v17  ;;  %1995 = vst.msk [vmem:[#allocation22] sm:$0xff] (!%p2443_p5), %vm990_vm1, %v1989_v10 }
 0xc48   : > { %1996 = vst.msk [vmem:[#allocation22 + $0x8] sm:$0xff] %vm990_vm1, %v1990_v13 }
 0xc49 PF: > { %s4430_s16 = sld [smem:[#allocation30_spill]] }
 0xc4f   : > { %p2444_p0 = scmp.ne.s32.totalorder %s4430_s16, 1 }
 0xc50   : > { %v2003_v15 = vsel (!%p2444_p0), %vm990_vm1, %v1989_v10, 0.0  ;;  %v2006_v14 = vsel (!%p2444_p0), %vm990_vm1, %v1990_v13, 0.0  ;;  %v2445_v28 = vld [vmem:[#allocation19] ss:$0 sm:$0xff] (!%p2444_p0)  ;;  %v2446_v30 = vld [vmem:[#allocation20] ss:$0 sm:$0xff] (!%p2444_p0) }
 0xc51   : > { %2000 = sbr.rel (%p2444_p0) target bundleno = 3470 (0xd8e), region = 160  ;;  %2004 = vadd.xlane.f32.xlu0 (!%p2444_p0), %v2003_v15 }
 0xc55   : > { %2007 = vadd.xlane.f32.xlu0 (!%p2444_p0), %v2006_v14 }
 0xcde   : > { %v2005_v16 = vpop.xlane.xlu0 %2004 }
 0xcdf   : > { %v2009_v18 = vmul.f32 0.015625, %v2005_v16 }
 0xce1   : > { %v2011_v17 = vsub.f32 %v1989_v10, %v2009_v18 }
 0xce2   : > { %v2008_v19 = vpop.xlane.xlu0 %2007 }
 0xce3   : > { %v2010_v20 = vmul.f32 0.015625, %v2008_v19  ;;  %v2013_v21 = vmul.f32 %v2011_v17, %v2011_v17 }
 0xce5   : > { %v2012_v22 = vsub.f32 %v1990_v13, %v2010_v20  ;;  %v2015_v2 = vsel %vm990_vm1, %v2013_v21, 0.0 }
 0xce6   : > { %2016 = vadd.xlane.f32.xlu1 %v2015_v2 }
 0xce7   : > { %v2014_v23 = vmul.f32 %v2012_v22, %v2012_v22 }
 0xce9   : > { %v2018_v3 = vsel %vm990_vm1, %v2014_v23, 0.0 }
 0xcea   : > { %2019 = vadd.xlane.f32.xlu1 %v2018_v3 }
 0xd73   : > { %v2017_v24 = vpop.xlane.xlu1 %2016 }
 0xd74   : > { %v2021_v25 = vmul.f32 0.015625, %v2017_v24 }
 0xd76   : > { %v2023_v26 = vadd.f32 1e-06, %v2021_v25 }
 0xd77   : > { %v2020_v27 = vpop.xlane.xlu1 %2019 }
 0xd78   : > { %2821 = vrsqrt.f32 %v2023_v26  ;;  %v2022_v57 = vmul.f32 0.015625, %v2020_v27 }
 0xd7a   : > { %v2024_v58 = vadd.f32 1e-06, %v2022_v57 }
 0xd7c   : > { %2823 = vrsqrt.f32 %v2024_v58 }
 0xd82   : > { %v2822_v60 = vpop.eup %2821 }
 0xd83   : > { %v2027_v29 = vmul.f32 %v2822_v60, %v2011_v17 }
 0xd85   : > { %v2035_v31 = vmul.f32 %v2445_v28, %v2027_v29 }
 0xd86   : > { %v2824_v32 = vpop.eup %2823 }
 0xd87   : > { %v2043_v33 = vadd.f32 %v2446_v30, %v2035_v31  ;;  %v2028_v34 = vmul.f32 %v2824_v32, %v2012_v22 }
 0xd89   : > { %2045 = vst.msk [vmem:[#allocation22] sm:$0xff] %vm990_vm1, %v2043_v33  ;;  %v2036_v35 = vmul.f32 %v2445_v28, %v2028_v34 }
 0xd8b   : > { %v2044_v36 = vadd.f32 %v2446_v30, %v2036_v35 }
 0xd8d   : > { %2046 = vst.msk [vmem:[#allocation22 + $0x8] sm:$0xff] %vm990_vm1, %v2044_v36 }
 0xd8e PF: > { %s4431_s29 = sld [smem:[#allocation31_spill]]  ;;  %s3422_s0 = smov [#allocation22]  }
 0xd8f   : > { %s2056_s3 = sshll.u32 %s3422_s0, 4  ;;  %s2057_s3 = int_to_ptr.vmem [resolvable:$true] %s2056_s3 }
 0xd90   : > { %s3297_s28 = scalar_lea.vmem %s2057_s3, 256  ;;  %p3304_p2 = scmp.lt.s32.totalorder %s2057_s3, %s2057_s3 }
 0xd91   : > { %p3298_p11 = scmp.ne.s32.totalorder %s2057_s3, %s3297_s28  ;;  %p3305_p12 = scmp.lt.s32.totalorder %s3297_s28, %s3297_s28 }
 0xd93   : > { %p3306_p8 = por %p3305_p12, %p3304_p2 }
 0xd94   : > { %p2686_p7 = scmp.eq.s32.totalorder %s4431_s29, 1 }
 0xd96   : > { %p3299_p3 = pnand %p3298_p11, %p2686_p7 }
 0xd98   : > { %p3300_p1 = pneg %p3299_p3 }
 0xd9a   : > { %p3307_p9 = pnand %p3306_p8, %p3300_p1 }
 0xd9c   : > { %3310 = shalt.err (!%p3307_p9)
}
 0xd9d   : > { %s4432_s2 = sld [smem:[#allocation49_spill]] }
 0xda3   : > { %s3311_s15 = scalar_lea.hbm %s4432_s2, 256 }
 0xda4   : > { %p3312_p6 = scmp.ne.s32.totalorder %s4432_s2, %s3311_s15  ;;  %p3317_p13 = scmp.lt.u32.totalorder %s3311_s15, %s4432_s2 }
 0xda6   : > { %p3313_p10 = pnand %p3312_p6, %p2686_p7 }
 0xda8   : > { %p3314_p4 = pneg %p3313_p10 }
 0xdaa   : > { %p3319_p5 = pnand %p3317_p13, %p3314_p4 }
 0xdac   : > { %3322 = shalt.err (!%p3319_p5)
}
 0xdad   : > { %s3423_s27 = smov 128   ;;  %s3424_s20 = smov 8  }
 0xdae   : > { %2624 = dma.vmem_to_hbm [thread:$0]  (%p2686_p7), %s2057_s3, 256, %s4432_s2, [#allocation4], %s3423_s27, %s3423_s27, %s3424_s20  }
 0xdaf   : > { %3368 = dma.done.wait (%p2686_p7), [#allocation4], 256  }
 0xdb0   : > { %3370 = vsyncadd (%p2686_p7), [#allocation4], 4294967040 }
 0xdb1 PF: > { %s30_s26 = sadd.s32 1, %s3393_s26   ;;  %s4433_s21 = sld [smem:[#allocation29_spill]] }
 0xdb2   : > { %p27_p0 = scmp.ge.s32.totalorder %s30_s26, 4   ;;  %s4434_s24 = sld [smem:[#allocation36_spill]] }
 0xdb3   : > { %s4435_s7 = sld [smem:[#allocation35_spill]]  ;;  %s4436_s22 = smov %s3381_s23 }
 0xdb4   :  { %29 = sbr.rel (!%p27_p0) target bundleno = 20 (0x14), region = 272 }
 0xdb8   : > { %s4437_s23 = smov %s4434_s24  ;;  %s4438_s24 = smov %s3389_s25 }
 0xdb9   : > { %s4439_s25 = smov %s4435_s7 }
 0xdbb   :  { %2072 = vsyncpa [#allocation3], 1 }
 0xdbc   :  { %2074 = vsyncpa [#allocation3 + $0x1], 1 }
 0xdbd   :  { %2075 = vsyncpa [#allocation6], 1 }
 0xdbe   :  { %2076 = vsyncpa [#allocation21], 1 }
 0xdbf   :  { %2077 = vsyncpa [#allocation4], 1 }
 0xdc0   :  { %2079 = vsyncpa [#allocation4 + $0x1], 1 }

// kernel: _lambda_.3
= control target key start
LH: loop header
LB: loop body
LE: loop exit
PB: predicated region body
PF: predicated region fallthrough
CT: control target
= control target key end

     0   :  { %s7751_s0 = inlined_call_operand.hbm [shape: f32[8,2,64], index: 0, kind: input, shape index: {}]   ;;  %s7752_s1 = inlined_call_operand.hbm [shape: bf16[2,64,192], index: 1, kind: input, shape index: {}]   ;;  %s7753_s2 = inlined_call_operand.hbm [shape: f32[2,1,192], index: 2, kind: input, shape index: {}]   ;;  %s7754_s3 = inlined_call_operand.hbm [shape: bf16[2,64,64], index: 3, kind: input, shape index: {}]   ;;  %s7755_s4 = inlined_call_operand.hbm [shape: f32[2,1,64], index: 4, kind: input, shape index: {}]   ;;  %s7756_s5 = inlined_call_operand.hbm [shape: f32[2,1,64], index: 5, kind: input, shape index: {}]   ;;  %s7757_s6 = inlined_call_operand.hbm [shape: f32[2,1,64], index: 6, kind: input, shape index: {}]   ;;  %s7758_s7 = inlined_call_operand.hbm [shape: f32[2,1,64], index: 7, kind: input, shape index: {}]   ;;  %s7759_s8 = inlined_call_operand.hbm [shape: f32[2,1,64], index: 8, kind: input, shape index: {}]   ;;  %s7760_s9 = inlined_call_operand.hbm [shape: bf16[2,64,128], index: 9, kind: input, shape index: {}]   ;;  %s7761_s10 = inlined_call_operand.hbm [shape: f32[2,1,128], index: 10, kind: input, shape index: {}]   ;;  %s7762_s11 = inlined_call_operand.hbm [shape: bf16[2,128,64], index: 11, kind: input, shape index: {}]   ;;  %s7763_s12 = inlined_call_operand.hbm [shape: f32[2,1,64], index: 12, kind: input, shape index: {}]   ;;  %s7764_s13 = inlined_call_operand.hbm [shape: f32[1,64], index: 13, kind: input, shape index: {}]   ;;  %s7765_s14 = inlined_call_operand.hbm [shape: f32[1,64], index: 14, kind: input, shape index: {}]   ;;  %s7766_s15 = inlined_call_operand.hbm [shape: f32[64,128], index: 15, kind: input, shape index: {}]   ;;  %s7767_s16 = inlined_call_operand.hbm [shape: f32[1,128], index: 16, kind: input, shape index: {}]   ;;  %s7768_s17 = inlined_call_operand.hbm [shape: f32[1,128], index: 17, kind: input, shape index: {}]   ;;  %s7769_s18 = inlined_call_operand.hbm [shape: f32[8,2,128], index: 18, kind: output, shape index: {}]  }
   0x1   :  { %7815 = sst [smem:[#allocation51_spill]] %s7751_s0 }
   0x2   :  { %7816 = sst [smem:[#allocation52_spill]] %s7752_s1 }
   0x3   :  { %7817 = sst [smem:[#allocation53_spill]] %s7753_s2 }
   0x4   :  { %7818 = sst [smem:[#allocation54_spill]] %s7754_s3 }
   0x5   :  { %7819 = sst [smem:[#allocation55_spill]] %s7755_s4 }
   0x6   :  { %7820 = sst [smem:[#allocation56_spill]] %s7756_s5 }
   0x7   :  { %7821 = sst [smem:[#allocation57_spill]] %s7757_s6 }
   0x8   :  { %7822 = sst [smem:[#allocation58_spill]] %s7758_s7 }
   0x9   :  { %7823 = sst [smem:[#allocation59_spill]] %s7759_s8 }
   0xa   :  { %7824 = sst [smem:[#allocation60_spill]] %s7760_s9 }
   0xb   :  { %7825 = sst [smem:[#allocation61_spill]] %s7761_s10 }
   0xc   :  { %7826 = sst [smem:[#allocation62_spill]] %s7762_s11 }
   0xd   :  { %7827 = sst [smem:[#allocation63_spill]] %s7763_s12 }
   0xe   :  { %7828 = sst [smem:[#allocation64_spill]] %s7764_s13 }
   0xf   :  { %7829 = sst [smem:[#allocation65_spill]] %s7765_s14 }
  0x10   :  { %7830 = sst [smem:[#allocation66_spill]] %s7766_s15 }
  0x11   :  { %7831 = sst [smem:[#allocation67_spill]] %s7769_s18 }
  0x12   :  { %23 = vsyncpa [#allocation4], 0 }
  0x13   :  { %24 = vsyncpa [#allocation7], 0 }
  0x14   :  { %26 = vsyncpa [#allocation7 + $0x1], 0 }
  0x15   :  { %27 = vsyncpa [#allocation10], 0 }
  0x16   :  { %29 = vsyncpa [#allocation10 + $0x1], 0 }
  0x17   :  { %30 = vsyncpa [#allocation13], 0 }
  0x18   :  { %32 = vsyncpa [#allocation13 + $0x1], 0 }
  0x19   :  { %33 = vsyncpa [#allocation16], 0 }
  0x1a   :  { %35 = vsyncpa [#allocation16 + $0x1], 0 }
  0x1b   :  { %36 = vsyncpa [#allocation19], 0 }
  0x1c   :  { %38 = vsyncpa [#allocation19 + $0x1], 0 }
  0x1d   :  { %39 = vsyncpa [#allocation22], 0 }
  0x1e   :  { %41 = vsyncpa [#allocation22 + $0x1], 0 }
  0x1f   :  { %42 = vsyncpa [#allocation25], 0 }
  0x20   :  { %43 = vsyncpa [#allocation28], 0 }
  0x21   :  { %44 = vsyncpa [#allocation31], 0 }
  0x22   :  { %45 = vsyncpa [#allocation5], 0  ;;  %s6244_s27 = smov 0   ;;  %s6246_s28 = smov 0  }
  0x23   :  { %s6248_s29 = smov 0   ;;  %s6250_s30 = smov 0  }
  0x24   :  { %s6252_s0 = smov 0   ;;  %s6254_s19 = smov 0  }
  0x25 LB: > { %7832 = sst [smem:[#allocation44_spill]] %s6098_s28  ;;  %s6273_s1 = sadd.s32 4294967295, %s6114_s19   ;;  %s6114_s19 = sphi %s6254_s19, %s51_s19   ;;  %s6110_s0 = sphi %s6252_s0, %s7916_s0   ;;  %s6106_s30 = sphi %s6250_s30, %s7915_s30   ;;  %s6102_s29 = sphi %s6248_s29, %s7914_s29   ;;  %s6098_s28 = sphi %s6246_s28, %s7913_s28   ;;  %s6094_s27 = sphi %s6244_s27, %s7911_s27  }
  0x26   : > { %7833 = sst [smem:[#allocation45_spill]] %s6106_s30  ;;  %p103_p0 = scmp.ne.s32.totalorder %s6102_s29, %s6098_s28 }
  0x27   : > { %7834 = sst [smem:[#allocation46_spill]] %s6114_s19  ;;  %p104_p1 = scmp.eq.s32.totalorder %s6114_s19, 0 }
  0x28   : > { %7835 = sst [smem:[#allocation47_spill]] %s6273_s1  ;;  %p109_p2 = scmp.ne.s32.totalorder %s6098_s28, %s6094_s27 }
  0x29   : > { %p7780_p3 = scmp.eq.s32.totalorder %s6273_s1, 0  ;;  %p4607_p4 = scmp.ge.s32.totalorder %s6114_s19, 1 }
  0x2a   : > { %p105_p5 = por %p104_p1, %p103_p0  ;;  %p537_p6 = scmp.lt.s32.totalorder %s6114_s19, 3 }
  0x2b   : > { %p6284_p7 = por %p7780_p3, %p109_p2  ;;  %s6116_s22 = smov [#allocation24]  }
  0x2c   : > { %p6288_p8 = pnand %p4607_p4, %p537_p6  ;;  %s566_s2 = sshll.u32 %s6116_s22, 4  ;;  %s567_s2 = int_to_ptr.vmem [resolvable:$true] %s566_s2 }
  0x2d   : > { %s7836_s20 = scalar_select %p6284_p7, 1, 0 }
  0x2e   : > { %s7838_s21 = scalar_select %p6288_p8, 1, 0 }
  0x2f   : > { %7837 = sst [smem:[#allocation48_spill]] %s7836_s20  ;;  %p5154_p9 = pneg %p6288_p8 }
  0x30   : > { %7839 = sst [smem:[#allocation49_spill]] %s7838_s21  ;;  %p5216_p10 = scmp.lt.s32.totalorder %s6114_s19, 2 }
  0x31   : > { %p6297_p11 = pnand %p5154_p9, %p7780_p3  ;;  %s6117_s24 = smov [#allocation27]  }
  0x32   : > { %s587_s25 = sshll.u32 %s6117_s24, 4  ;;  %p6301_p12 = pnand %p5216_p10, %p105_p5  ;;  %s6305_s25 = int_to_ptr.vmem [resolvable:$true] %s587_s25 }
  0x33   : > { %s7840_s23 = scalar_select %p6297_p11, 1, 0 }
  0x34   : > { %s7841_s26 = scalar_select %p6301_p12, 1, 0 }
  0x35   : > { %s7842_s13 = sld [smem:[#allocation64_spill]]  ;;  %p6315_p0 = pneg %p6297_p11 }
  0x37   : > { %s7843_s28 = scalar_select %p6315_p0, 1, 0 }
  0x3b   : > { %s5470_s18 = scalar_lea.hbm %s7842_s13, 16 }
  0x3c   : > { %p5471_p13 = scmp.ne.s32.totalorder %s7842_s13, %s5470_s18  ;;  %p5477_p4 = scmp.lt.u32.totalorder %s5470_s18, %s7842_s13 }
  0x3e   : > { %p5473_p1 = pnand %p6315_p0, %p5471_p13 }
  0x40   : > { %p5474_p2 = pneg %p5473_p1 }
  0x42   : > { %p5479_p5 = pnand %p5477_p4, %p5474_p2 }
  0x44   : > { %5482 = shalt.err (!%p5479_p5)
}
  0x45   : > { %s5483_s27 = scalar_lea.vmem %s567_s2, 16  ;;  %s5490_s30 = scalar_lea.vmem %s567_s2, 32 }
  0x46   : > { %p5484_p6 = scmp.ne.s32.totalorder %s567_s2, %s5483_s27  ;;  %p5491_p3 = scmp.lt.s32.totalorder %s567_s2, %s567_s2 }
  0x47   : > { %p5492_p7 = scmp.lt.s32.totalorder %s5490_s30, %s5483_s27 }
  0x48   : > { %p5486_p9 = pnand %p5484_p6, %p6315_p0 }
  0x49   : > { %p5493_p8 = por %p5492_p7, %p5491_p3 }
  0x4a   : > { %p5487_p10 = pneg %p5486_p9 }
  0x4c   : > { %p5494_p12 = pnand %p5493_p8, %p5487_p10 }
  0x4e   : > { %5497 = shalt.err (!%p5494_p12)
}
  0x4f   : > { %5160 = dma.hbm_to_vmem [thread:$0]  (!%p6297_p11), %s7842_s13, 16, %s567_s2, [#allocation25]  }
  0x50   : > { %s7844_s15 = sld [smem:[#allocation66_spill]] }
  0x56   : > { %s5498_s24 = scalar_lea.hbm %s7844_s15, 1024 }
  0x57   : > { %p5499_p13 = scmp.ne.s32.totalorder %s7844_s15, %s5498_s24  ;;  %p5505_p7 = scmp.lt.u32.totalorder %s5498_s24, %s7844_s15 }
  0x59   : > { %p5501_p1 = pnand %p5499_p13, %p6315_p0 }
  0x5b   : > { %p5502_p3 = pneg %p5501_p1 }
  0x5d   : > { %p5507_p8 = pnand %p5505_p7, %p5502_p3 }
  0x5f   : > { %5510 = shalt.err (!%p5507_p8)
}
  0x60   : > { %s5511_s2 = scalar_lea.vmem %s6305_s25, 1024  ;;  %p5519_p5 = scmp.lt.s32.totalorder %s6305_s25, %s6305_s25 }
  0x61   : > { %p5512_p12 = scmp.ne.s32.totalorder %s6305_s25, %s5511_s2  ;;  %p5520_p6 = scmp.lt.s32.totalorder %s5511_s2, %s5511_s2 }
  0x63   : > { %p5514_p2 = pnand %p5512_p12, %p6315_p0  ;;  %p5521_p9 = por %p5520_p6, %p5519_p5 }
  0x65   : > { %p5515_p4 = pneg %p5514_p2 }
  0x67   : > { %p5522_p10 = pnand %p5521_p9, %p5515_p4 }
  0x69   : > { %5525 = shalt.err (!%p5522_p10)
}
  0x6a   : > { %s7787_s12 = smov 128   ;;  %s7788_s21 = smov 8  }
  0x6b   : > { %5166 = dma.hbm_to_vmem [thread:$0]  (!%p6297_p11), %s7844_s15, 1024, %s6305_s25, [#allocation28], %s7787_s12, %s7787_s12, %s7788_s21  }
  0x6c   : > { %s6359_s1 = sand.u32 1, %s6114_s19   ;;  %s60_s24 = sadd.s32 1, %s6110_s0 }
  0x6d   : > { %p61_p13 = scmp.ge.s32.totalorder %s60_s24, 2  ;;  %s6363_s27 = sand.u32 1, %s6102_s29  }
  0x6e   : > { %s7790_s30 = sshll.u32 %s6363_s27, 6  ;;  %s7791_s2 = sshll.u32 %s6110_s0, 10 }
  0x6f   : > { %s7918_s24 = smov (%p61_p13, %s60_s24), 0  ;;  %s7846_s20 = sld [smem:[#allocation52_spill]] }
  0x70   : > { %7845 = sst [smem:[#allocation50_spill]] %s7918_s24  ;;  %s93_s22 = ssub.s32 %s6110_s0, %s7918_s24 }
  0x71   : > { %s627_s18 = scalar_lea.vmem [#allocation6], %s7790_s30  ;;  %p6380_p1 = scmp.eq.s32.totalorder %s93_s22, 0 }
  0x72   : > { %s634_s12 = sshll.u32 %s627_s18, 4  ;;  %p7848_p7 = scmp.ne.s32.totalorder %s7841_s26, 0  ;;  %s6384_s12 = int_to_ptr.vmem [resolvable:$true] %s634_s12 }
  0x73   : > { %s7847_s21 = scalar_select %p6380_p1, 1, 0 }
  0x74   : > { %p6391_p8 = pneg %p7848_p7 }
  0x75   : > { %s6374_s25 = scalar_lea.hbm %s7846_s20, %s7791_s2  ;;  %s5531_s22 = scalar_lea.hbm %s7846_s20, 2048 }
  0x76   : > { %s5526_s19 = scalar_lea.hbm %s6374_s25, 1024  ;;  %p5532_p4 = scmp.lt.u32.totalorder %s6374_s25, %s7846_s20 }
  0x77   : > { %p5527_p3 = scmp.ne.s32.totalorder %s6374_s25, %s5526_s19  ;;  %p5533_p5 = scmp.lt.u32.totalorder %s5531_s22, %s5526_s19 }
  0x78   : > { %s7849_s10 = scalar_select %p6391_p8, 1, 0 }
  0x79   : > { %p5529_p12 = pnand %p6391_p8, %p5527_p3  ;;  %p5534_p6 = por %p5533_p5, %p5532_p4 }
  0x7a   : > { %p5535_p9 = scmp.lt.u32.totalorder %s5526_s19, %s6374_s25 }
  0x7b   : > { %p5530_p2 = pneg %p5529_p12 }
  0x7c   : > { %p5536_p10 = por %p5535_p9, %p5534_p6 }
  0x7e   : > { %p5537_p13 = pnand %p5536_p10, %p5530_p2 }
  0x80   : > { %5540 = shalt.err (!%p5537_p13)
}
  0x81   : > { %s5541_s15 = scalar_lea.vmem %s6384_s12, 1024  ;;  %s6120_s13 = smov [#allocation6]  }
  0x82   : > { %p5542_p3 = scmp.ne.s32.totalorder %s6384_s12, %s5541_s15  ;;  %s5546_s18 = sshll.u32 %s6120_s13, 4  ;;  %s5547_s18 = int_to_ptr.vmem [resolvable:$false] %s5546_s18 }
  0x83   : > { %s5548_s30 = scalar_lea.vmem %s5547_s18, 2048  ;;  %p5549_p0 = scmp.lt.s32.totalorder %s6384_s12, %s5547_s18 }
  0x84   : > { %p5544_p12 = pnand %p5542_p3, %p6391_p8  ;;  %p5550_p1 = scmp.lt.s32.totalorder %s5548_s30, %s5541_s15 }
  0x86   : > { %p5545_p11 = pneg %p5544_p12  ;;  %p5551_p4 = por %p5550_p1, %p5549_p0 }
  0x88   : > { %p5552_p5 = pnand %p5551_p4, %p5545_p11 }
  0x8a   : > { %5555 = shalt.err (!%p5552_p5)
}
  0x8b   : > { %s7850_s19 = smov 8   ;;  %s7851_s2 = smov 128  }
  0x8c   : > { %s7852_s22 = scalar_lea.sflag [#allocation7], %s6359_s1  ;;  %s7853_s15 = sadd.s32 1, %s6102_s29 }
  0x8d   : > { %5176 = dma.hbm_to_vmem [thread:$0]  (!%p7848_p7), %s6374_s25, 1024, %s6384_s12, %s7852_s22, %s7851_s2, %s7851_s2, %s7850_s19  }
  0x8e   : > { %p7854_p11 = scmp.ne.s32.totalorder %s7847_s21, 0  ;;  %s7801_s18 = sshll.u32 %s6363_s27, 5 }
  0x8f   : > { %s7802_s30 = sshll.u32 %s6110_s0, 9  ;;  %s7855_s3 = sld [smem:[#allocation54_spill]] }
  0x90   : > { %s6424_s13 = scalar_select %p7854_p11, %s6102_s29, %s7853_s15  }
  0x91   : > { %s667_s6 = scalar_lea.vmem [#allocation9], %s7801_s18  ;;  %s6440_s12 = sshll.u32 %s6110_s0, 4 }
  0x92   : > { %s674_s4 = sshll.u32 %s667_s6, 4  ;;  %s7803_s21 = scalar_lea.sflag [#allocation10], %s6359_s1  ;;  %s6437_s4 = int_to_ptr.vmem [resolvable:$true] %s674_s4 }
  0x95   : > { %s6433_s8 = scalar_lea.hbm %s7855_s3, %s7802_s30  ;;  %s5561_s19 = scalar_lea.hbm %s7855_s3, 1024 }
  0x96   : > { %s5556_s25 = scalar_lea.hbm %s6433_s8, 512  ;;  %p5562_p6 = scmp.lt.u32.totalorder %s6433_s8, %s7855_s3 }
  0x97   : > { %p5557_p0 = scmp.ne.s32.totalorder %s6433_s8, %s5556_s25  ;;  %p5563_p9 = scmp.lt.u32.totalorder %s5561_s19, %s5556_s25 }
  0x98   : > { %p5565_p13 = scmp.lt.u32.totalorder %s5556_s25, %s6433_s8 }
  0x99   : > { %p5559_p1 = pnand %p5557_p0, %p6391_p8  ;;  %p5564_p10 = por %p5563_p9, %p5562_p6 }
  0x9b   : > { %p5560_p2 = pneg %p5559_p1  ;;  %p5566_p3 = por %p5565_p13, %p5564_p10 }
  0x9d   : > { %p5567_p12 = pnand %p5566_p3, %p5560_p2 }
  0x9f   : > { %5570 = shalt.err (!%p5567_p12)
}
  0xa0   : > { %s5571_s6 = scalar_lea.vmem %s6437_s4, 512  ;;  %s6121_s15 = smov [#allocation9]  }
  0xa1   : > { %p5572_p4 = scmp.ne.s32.totalorder %s6437_s4, %s5571_s6  ;;  %s5576_s24 = sshll.u32 %s6121_s15, 4  ;;  %s5577_s24 = int_to_ptr.vmem [resolvable:$false] %s5576_s24 }
  0xa2   : > { %s5578_s20 = scalar_lea.vmem %s5577_s24, 1024  ;;  %p5579_p0 = scmp.lt.s32.totalorder %s6437_s4, %s5577_s24 }
  0xa3   : > { %p5574_p5 = pnand %p5572_p4, %p6391_p8  ;;  %p5580_p1 = scmp.lt.s32.totalorder %s5578_s20, %s5571_s6 }
  0xa5   : > { %p5575_p11 = pneg %p5574_p5  ;;  %p5581_p6 = por %p5580_p1, %p5579_p0 }
  0xa7   : > { %p5582_p9 = pnand %p5581_p6, %p5575_p11 }
  0xa9   : > { %5585 = shalt.err (!%p5582_p9)
}
  0xaa   : > { %s7804_s25 = smov 64   ;;  %s6123_s19 = smov 4  }
  0xab   : > { %5182 = dma.hbm_to_vmem [thread:$0]  (!%p7848_p7), %s6433_s8, 512, %s6437_s4, %s7803_s21, %s7804_s25, %s7804_s25, %s6123_s19  }
  0xac   : > { %s7856_s5 = sld [smem:[#allocation56_spill]]  ;;  %s704_s15 = scalar_lea.vmem [#allocation12], %s6363_s27 }
  0xad   : > { %s711_s24 = sshll.u32 %s704_s15, 4  ;;  %s7807_s20 = scalar_lea.sflag [#allocation13], %s6359_s1  ;;  %s712_s24 = int_to_ptr.vmem [resolvable:$true] %s711_s24 }
  0xb2   : > { %s6473_s6 = scalar_lea.hbm %s7856_s5, %s6440_s12  ;;  %s5591_s8 = scalar_lea.hbm %s7856_s5, 32 }
  0xb3   : > { %s5586_s18 = scalar_lea.hbm %s6473_s6, 16  ;;  %p5592_p3 = scmp.lt.u32.totalorder %s6473_s6, %s7856_s5 }
  0xb4   : > { %p5587_p2 = scmp.ne.s32.totalorder %s6473_s6, %s5586_s18  ;;  %p5593_p12 = scmp.lt.u32.totalorder %s5591_s8, %s5586_s18 }
  0xb5   : > { %p5595_p5 = scmp.lt.u32.totalorder %s5586_s18, %s6473_s6 }
  0xb6   : > { %p5589_p10 = pnand %p5587_p2, %p6391_p8  ;;  %p5594_p4 = por %p5593_p12, %p5592_p3 }
  0xb8   : > { %p5590_p13 = pneg %p5589_p10  ;;  %p5596_p11 = por %p5595_p5, %p5594_p4 }
  0xba   : > { %p5597_p0 = pnand %p5596_p11, %p5590_p13 }
  0xbc   : > { %5600 = shalt.err (!%p5597_p0)
}
  0xbd   : > { %s5601_s15 = scalar_lea.vmem %s712_s24, 16  ;;  %s6124_s21 = smov [#allocation12]  }
  0xbe   : > { %p5602_p1 = scmp.ne.s32.totalorder %s712_s24, %s5601_s15  ;;  %s5606_s25 = sshll.u32 %s6124_s21, 4  ;;  %s5607_s25 = int_to_ptr.vmem [resolvable:$false] %s5606_s25 }
  0xbf   : > { %s5608_s30 = scalar_lea.vmem %s5607_s25, 32  ;;  %p5609_p2 = scmp.lt.s32.totalorder %s712_s24, %s5607_s25 }
  0xc0   : > { %p5604_p6 = pnand %p5602_p1, %p6391_p8  ;;  %p5610_p10 = scmp.lt.s32.totalorder %s5608_s30, %s5601_s15 }
  0xc2   : > { %p5605_p9 = pneg %p5604_p6  ;;  %p5611_p7 = por %p5610_p10, %p5609_p2 }
  0xc4   : > { %p5612_p3 = pnand %p5611_p7, %p5605_p9 }
  0xc6   : > { %5615 = shalt.err (!%p5612_p3)
}
  0xc7   : > { %p7857_p12 = scmp.ne.s32.totalorder %s7841_s26, 0  ;;  %s7858_s7 = sld [smem:[#allocation58_spill]] }
  0xc8   : > { %s738_s25 = scalar_lea.vmem [#allocation15], %s6363_s27  ;;  %s7808_s2 = scalar_lea.sflag [#allocation16], %s6359_s1 }
  0xc9   : > { %5188 = dma.hbm_to_vmem [thread:$0]  (!%p7857_p12), %s6473_s6, 16, %s712_s24, %s7807_s20  }
  0xca   : > { %s745_s8 = sshll.u32 %s738_s25, 4  ;;  %s746_s8 = int_to_ptr.vmem [resolvable:$true] %s745_s8 }
  0xcd   : > { %s6500_s21 = scalar_lea.hbm %s7858_s7, %s6440_s12  ;;  %s5621_s24 = scalar_lea.hbm %s7858_s7, 32 }
  0xce   : > { %s5616_s22 = scalar_lea.hbm %s6500_s21, 16  ;;  %p5622_p5 = scmp.lt.u32.totalorder %s6500_s21, %s7858_s7 }
  0xcf   : > { %p5617_p7 = scmp.ne.s32.totalorder %s6500_s21, %s5616_s22  ;;  %p5623_p11 = scmp.lt.u32.totalorder %s5621_s24, %s5616_s22 }
  0xd0   : > { %p5625_p1 = scmp.lt.u32.totalorder %s5616_s22, %s6500_s21 }
  0xd1   : > { %p5619_p13 = pnand %p5617_p7, %p6391_p8  ;;  %p5624_p0 = por %p5623_p11, %p5622_p5 }
  0xd3   : > { %p5620_p4 = pneg %p5619_p13  ;;  %p5626_p6 = por %p5625_p1, %p5624_p0 }
  0xd5   : > { %p5627_p9 = pnand %p5626_p6, %p5620_p4 }
  0xd7   : > { %5630 = shalt.err (!%p5627_p9)
}
  0xd8   : > { %s5631_s4 = scalar_lea.vmem %s746_s8, 16  ;;  %s6125_s25 = smov [#allocation15]  }
  0xd9   : > { %p5632_p2 = scmp.ne.s32.totalorder %s746_s8, %s5631_s4  ;;  %s5636_s20 = sshll.u32 %s6125_s25, 4  ;;  %s5637_s20 = int_to_ptr.vmem [resolvable:$false] %s5636_s20 }
  0xda   : > { %s5638_s15 = scalar_lea.vmem %s5637_s20, 32  ;;  %p5639_p7 = scmp.lt.s32.totalorder %s746_s8, %s5637_s20 }
  0xdb   : > { %p5634_p10 = pnand %p5632_p2, %p6391_p8  ;;  %p5640_p13 = scmp.lt.s32.totalorder %s5638_s15, %s5631_s4 }
  0xdd   : > { %p5635_p3 = pneg %p5634_p10  ;;  %p5641_p12 = por %p5640_p13, %p5639_p7 }
  0xdf   : > { %p5642_p5 = pnand %p5641_p12, %p5635_p3 }
  0xe1   : > { %5645 = shalt.err (!%p5642_p5)
}
  0xe2   : > { %p7859_p11 = scmp.ne.s32.totalorder %s7841_s26, 0  ;;  %s7860_s22 = sshll.u32 %s6110_s0, 9 }
  0xe3   : > { %s7861_s9 = sld [smem:[#allocation60_spill]]  ;;  %s7862_s20 = sshll.u32 %s6363_s27, 5 }
  0xe4   : > { %5194 = dma.hbm_to_vmem [thread:$0]  (!%p7859_p11), %s6500_s21, 16, %s746_s8, %s7808_s2  }
  0xe5   : > { %s773_s18 = scalar_lea.vmem [#allocation18], %s7862_s20  ;;  %s7809_s25 = scalar_lea.sflag [#allocation19], %s6359_s1 }
  0xe6   : > { %s780_s4 = sshll.u32 %s773_s18, 4  ;;  %s6532_s4 = int_to_ptr.vmem [resolvable:$true] %s780_s4 }
  0xe9   : > { %s6528_s30 = scalar_lea.hbm %s7861_s9, %s7860_s22  ;;  %s5651_s22 = scalar_lea.hbm %s7861_s9, 1024 }
  0xea   : > { %s5646_s15 = scalar_lea.hbm %s6528_s30, 512  ;;  %p5652_p1 = scmp.lt.u32.totalorder %s6528_s30, %s7861_s9 }
  0xeb   : > { %p5647_p12 = scmp.ne.s32.totalorder %s6528_s30, %s5646_s15  ;;  %p5653_p6 = scmp.lt.u32.totalorder %s5651_s22, %s5646_s15 }
  0xec   : > { %p5655_p2 = scmp.lt.u32.totalorder %s5646_s15, %s6528_s30 }
  0xed   : > { %p5649_p4 = pnand %p5647_p12, %p6391_p8  ;;  %p5654_p9 = por %p5653_p6, %p5652_p1 }
  0xef   : > { %p5650_p0 = pneg %p5649_p4  ;;  %p5656_p10 = por %p5655_p2, %p5654_p9 }
  0xf1   : > { %p5657_p3 = pnand %p5656_p10, %p5650_p0 }
  0xf3   : > { %5660 = shalt.err (!%p5657_p3)
}
  0xf4   : > { %s5661_s20 = scalar_lea.vmem %s6532_s4, 512  ;;  %s6126_s18 = smov [#allocation18]  }
  0xf5   : > { %p5662_p7 = scmp.ne.s32.totalorder %s6532_s4, %s5661_s20  ;;  %s5666_s21 = sshll.u32 %s6126_s18, 4  ;;  %s5667_s21 = int_to_ptr.vmem [resolvable:$false] %s5666_s21 }
  0xf6   : > { %s5668_s8 = scalar_lea.vmem %s5667_s21, 1024  ;;  %p5669_p12 = scmp.lt.s32.totalorder %s6532_s4, %s5667_s21 }
  0xf7   : > { %p5664_p13 = pnand %p5662_p7, %p6391_p8  ;;  %p5670_p4 = scmp.lt.s32.totalorder %s5668_s8, %s5661_s20 }
  0xf9   : > { %p5665_p5 = pneg %p5664_p13  ;;  %p5671_p1 = por %p5670_p4, %p5669_p12 }
  0xfb   : > { %p5672_p6 = pnand %p5671_p1, %p5665_p5 }
  0xfd   : > { %5675 = shalt.err (!%p5672_p6)
}
  0xfe   : > { %s7863_s15 = smov 64   ;;  %s7864_s22 = sshll.u32 %s6110_s0, 10 }
  0xff   : > { %5200 = dma.hbm_to_vmem [thread:$0]  (!%p7859_p11), %s6528_s30, 512, %s6532_s4, %s7809_s25, %s7863_s15, %s7863_s15, %s6123_s19  }
 0x100   : > { %s7865_s11 = sld [smem:[#allocation62_spill]]  ;;  %s7866_s18 = sshll.u32 %s6363_s27, 6 }
 0x101   : > { %s811_s21 = scalar_lea.vmem [#allocation21], %s7866_s18  ;;  %s7811_s2 = scalar_lea.sflag [#allocation22], %s6359_s1 }
 0x102   : > { %s818_s8 = sshll.u32 %s811_s21, 4  ;;  %s6570_s8 = int_to_ptr.vmem [resolvable:$true] %s818_s8 }
 0x106   : > { %s6566_s20 = scalar_lea.hbm %s7865_s11, %s7864_s22  ;;  %s5681_s22 = scalar_lea.hbm %s7865_s11, 2048 }
 0x107   : > { %s5676_s3 = scalar_lea.hbm %s6566_s20, 1024  ;;  %p5682_p10 = scmp.lt.u32.totalorder %s6566_s20, %s7865_s11 }
 0x108   : > { %p5677_p0 = scmp.ne.s32.totalorder %s6566_s20, %s5676_s3  ;;  %p5683_p3 = scmp.lt.u32.totalorder %s5681_s22, %s5676_s3 }
 0x109   : > { %p5685_p13 = scmp.lt.u32.totalorder %s5676_s3, %s6566_s20 }
 0x10a   : > { %p5679_p9 = pnand %p5677_p0, %p6391_p8  ;;  %p5684_p7 = por %p5683_p3, %p5682_p10 }
 0x10c   : > { %p5680_p2 = pneg %p5679_p9  ;;  %p5686_p5 = por %p5685_p13, %p5684_p7 }
 0x10e   : > { %p5687_p12 = pnand %p5686_p5, %p5680_p2 }
 0x110   : > { %5690 = shalt.err (!%p5687_p12)
}
 0x111   : > { %s5691_s18 = scalar_lea.vmem %s6570_s8, 1024  ;;  %s6127_s21 = smov [#allocation21]  }
 0x112   : > { %p5692_p4 = scmp.ne.s32.totalorder %s6570_s8, %s5691_s18  ;;  %s5696_s30 = sshll.u32 %s6127_s21, 4  ;;  %s5697_s30 = int_to_ptr.vmem [resolvable:$false] %s5696_s30 }
 0x113   : > { %s5698_s4 = scalar_lea.vmem %s5697_s30, 2048  ;;  %p5699_p0 = scmp.lt.s32.totalorder %s6570_s8, %s5697_s30 }
 0x114   : > { %p5694_p1 = pnand %p5692_p4, %p6391_p8  ;;  %p5700_p9 = scmp.lt.s32.totalorder %s5698_s4, %s5691_s18 }
 0x116   : > { %p5695_p6 = pneg %p5694_p1  ;;  %p5701_p10 = por %p5700_p9, %p5699_p0 }
 0x118   : > { %p5702_p3 = pnand %p5701_p10, %p5695_p6 }
 0x11a   : > { %5705 = shalt.err (!%p5702_p3)
}
 0x11b   : > { %5206 = dma.hbm_to_vmem [thread:$0]  (!%p7859_p11), %s6566_s20, 1024, %s6570_s8, %s7811_s2, %s7863_s15, %s7863_s15, %s6123_s19  }
 0x11c   : > { %s6128_s3 = smov [#allocation3]   ;;  %s7867_s18 = sld [smem:[#allocation51_spill]] }
 0x11d   : > { %s552_s22 = sshll.u32 %s6128_s3, 4  ;;  %p7868_p7 = scmp.ne.s32.totalorder %s7843_s28, 0  ;;  %s553_s22 = int_to_ptr.vmem [resolvable:$true] %s552_s22 }
 0x122   : > { %s5706_s21 = scalar_lea.hbm %s7867_s18, 256 }
 0x123   : > { %p5707_p2 = scmp.ne.s32.totalorder %s7867_s18, %s5706_s21  ;;  %p5713_p12 = scmp.lt.u32.totalorder %s5706_s21, %s7867_s18 }
 0x125   : > { %p5709_p13 = pnand %p5707_p2, %p7868_p7 }
 0x127   : > { %p5710_p5 = pneg %p5709_p13 }
 0x129   : > { %p5715_p4 = pnand %p5713_p12, %p5710_p5 }
 0x12b   : > { %5718 = shalt.err (!%p5715_p4)
}
 0x12c   : > { %s5719_s19 = scalar_lea.vmem %s553_s22, 256  ;;  %p5727_p9 = scmp.lt.s32.totalorder %s553_s22, %s553_s22 }
 0x12d   : > { %p5720_p1 = scmp.ne.s32.totalorder %s553_s22, %s5719_s19  ;;  %p5728_p10 = scmp.lt.s32.totalorder %s5719_s19, %s5719_s19 }
 0x12f   : > { %p5722_p6 = pnand %p5720_p1, %p7868_p7  ;;  %p5729_p3 = por %p5728_p10, %p5727_p9 }
 0x131   : > { %p5723_p0 = pneg %p5722_p6 }
 0x133   : > { %p5730_p11 = pnand %p5729_p3, %p5723_p0 }
 0x135   : > { %5733 = shalt.err (!%p5730_p11)
}
 0x136   : > { %s6129_s15 = smov 32   ;;  %s6130_s20 = smov 2  }
 0x137   : > { %p7869_p2 = scmp.ne.s32.totalorder %s7840_s23, 0  ;;  %s6131_s8 = smov [#allocation26]  }
 0x138   : > { %s577_s3 = sshll.u32 %s6131_s8, 4  ;;  %s6132_s6 = smov [#allocation29]   ;;  %s578_s3 = int_to_ptr.vmem [resolvable:$true] %s577_s3 }
 0x139   : > { %5157 = dma.hbm_to_vmem [thread:$0]  (!%p7869_p2), %s7867_s18, 256, %s553_s22, [#allocation4], %s6129_s15, %s6129_s15, %s6130_s20  }
 0x13a   : > { %s601_s24 = sshll.u32 %s6132_s6, 4  ;;  %s7870_s14 = sld [smem:[#allocation65_spill]]  ;;  %s602_s24 = int_to_ptr.vmem [resolvable:$true] %s601_s24 }
 0x140   : > { %s5734_s4 = scalar_lea.hbm %s7870_s14, 16 }
 0x141   : > { %p5735_p11 = scmp.ne.s32.totalorder %s7870_s14, %s5734_s4  ;;  %p5741_p12 = scmp.lt.u32.totalorder %s5734_s4, %s7870_s14 }
 0x143   : > { %p5737_p13 = pnand %p5735_p11, %p7868_p7 }
 0x145   : > { %p5738_p5 = pneg %p5737_p13 }
 0x147   : > { %p5743_p4 = pnand %p5741_p12, %p5738_p5 }
 0x149   : > { %5746 = shalt.err (!%p5743_p4)
}
 0x14a   : > { %s5747_s22 = scalar_lea.vmem %s578_s3, 16  ;;  %s5754_s15 = scalar_lea.vmem %s578_s3, 32 }
 0x14b   : > { %p5748_p1 = scmp.ne.s32.totalorder %s578_s3, %s5747_s22  ;;  %p5755_p9 = scmp.lt.s32.totalorder %s578_s3, %s578_s3 }
 0x14c   : > { %p5756_p10 = scmp.lt.s32.totalorder %s5754_s15, %s5747_s22 }
 0x14d   : > { %p5750_p6 = pnand %p5748_p1, %p7868_p7 }
 0x14e   : > { %p5757_p3 = por %p5756_p10, %p5755_p9 }
 0x14f   : > { %p5751_p0 = pneg %p5750_p6 }
 0x151   : > { %p5758_p8 = pnand %p5757_p3, %p5751_p0 }
 0x153   : > { %5761 = shalt.err (!%p5758_p8)
}
 0x154   : > { %5163 = dma.hbm_to_vmem [thread:$0]  (!%p7869_p2), %s7870_s14, 16, %s578_s3, [#allocation25]  }
 0x155   : > { %s5762_s5 = scalar_lea.hbm %s7767_s16, 16 }
 0x156   : > { %p5763_p11 = scmp.ne.s32.totalorder %s7767_s16, %s5762_s5  ;;  %p5769_p8 = scmp.lt.u32.totalorder %s5762_s5, %s7767_s16 }
 0x158   : > { %p5765_p13 = pnand %p5763_p11, %p7868_p7 }
 0x15a   : > { %p5766_p5 = pneg %p5765_p13 }
 0x15c   : > { %p5771_p12 = pnand %p5769_p8, %p5766_p5 }
 0x15e   : > { %5774 = shalt.err (!%p5771_p12)
}
 0x15f   : > { %s5775_s30 = scalar_lea.vmem %s602_s24, 16  ;;  %s5782_s3 = scalar_lea.vmem %s602_s24, 32 }
 0x160   : > { %p5776_p4 = scmp.ne.s32.totalorder %s602_s24, %s5775_s30  ;;  %p5783_p0 = scmp.lt.s32.totalorder %s602_s24, %s602_s24 }
 0x161   : > { %p5784_p9 = scmp.lt.s32.totalorder %s5782_s3, %s5775_s30 }
 0x162   : > { %p5778_p1 = pnand %p5776_p4, %p7868_p7 }
 0x163   : > { %p5785_p10 = por %p5784_p9, %p5783_p0 }
 0x164   : > { %p5779_p6 = pneg %p5778_p1 }
 0x166   : > { %p5786_p3 = pnand %p5785_p10, %p5779_p6 }
 0x168   : > { %5789 = shalt.err (!%p5786_p3)
}
 0x169   : > { %5169 = dma.hbm_to_vmem [thread:$0]  (!%p7869_p2), %s7767_s16, 16, %s602_s24, [#allocation28]  }
 0x16a   : > { %s6133_s22 = smov [#allocation30]   ;;  %s4618_s2 = sshll.u32 %s6363_s27, 1 }
 0x16b   : > { %s612_s15 = sshll.u32 %s6133_s22, 4  ;;  %s5790_s9 = scalar_lea.hbm %s7768_s17, 16  ;;  %s613_s15 = int_to_ptr.vmem [resolvable:$true] %s612_s15 }
 0x16c   : > { %p5791_p11 = scmp.ne.s32.totalorder %s7768_s17, %s5790_s9  ;;  %p5797_p8 = scmp.lt.u32.totalorder %s5790_s9, %s7768_s17 }
 0x16e   : > { %p5793_p13 = pnand %p5791_p11, %p7868_p7 }
 0x170   : > { %p5794_p5 = pneg %p5793_p13 }
 0x172   : > { %p5799_p12 = pnand %p5797_p8, %p5794_p5 }
 0x174   : > { %5802 = shalt.err (!%p5799_p12)
}
 0x175   : > { %s5803_s24 = scalar_lea.vmem %s613_s15, 16  ;;  %s5810_s21 = scalar_lea.vmem %s613_s15, 32 }
 0x176   : > { %p5804_p4 = scmp.ne.s32.totalorder %s613_s15, %s5803_s24  ;;  %p5811_p0 = scmp.lt.s32.totalorder %s613_s15, %s613_s15 }
 0x177   : > { %p5812_p9 = scmp.lt.s32.totalorder %s5810_s21, %s5803_s24 }
 0x178   : > { %p5806_p1 = pnand %p5804_p4, %p7868_p7 }
 0x179   : > { %p5813_p10 = por %p5812_p9, %p5811_p0 }
 0x17a   : > { %p5807_p6 = pneg %p5806_p1 }
 0x17c   : > { %p5814_p3 = pnand %p5813_p10, %p5807_p6 }
 0x17e   : > { %5817 = shalt.err (!%p5814_p3)
}
 0x17f   : > { %5172 = dma.hbm_to_vmem [thread:$0]  (!%p7869_p2), %s7768_s17, 16, %s613_s15, [#allocation31]  }
 0x180   : > { %s4734_s4 = sshll.u32 %s6110_s0, 5  ;;  %s648_s19 = scalar_lea.vmem [#allocation8], %s4618_s2 }
 0x181   : > { %s656_s22 = sshll.u32 %s648_s19, 4  ;;  %s7871_s7 = sld [smem:[#allocation53_spill]]  ;;  %s657_s22 = int_to_ptr.vmem [resolvable:$true] %s656_s22 }
 0x182   : > { %p7872_p11 = scmp.ne.s32.totalorder %s7849_s10, 0 }
 0x187   : > { %s654_s9 = scalar_lea.hbm %s7871_s7, %s4734_s4  ;;  %s5823_s8 = scalar_lea.hbm %s7871_s7, 64 }
 0x188   : > { %s5818_s5 = scalar_lea.hbm %s654_s9, 32  ;;  %p5824_p2 = scmp.lt.u32.totalorder %s654_s9, %s7871_s7 }
 0x189   : > { %p5819_p7 = scmp.ne.s32.totalorder %s654_s9, %s5818_s5  ;;  %p5825_p8 = scmp.lt.u32.totalorder %s5823_s8, %s5818_s5 }
 0x18a   : > { %p5827_p4 = scmp.lt.u32.totalorder %s5818_s5, %s654_s9 }
 0x18b   : > { %p5821_p13 = pnand %p5819_p7, %p7872_p11  ;;  %p5826_p12 = por %p5825_p8, %p5824_p2 }
 0x18d   : > { %p5822_p5 = pneg %p5821_p13  ;;  %p5828_p1 = por %p5827_p4, %p5826_p12 }
 0x18f   : > { %p5829_p6 = pnand %p5828_p1, %p5822_p5 }
 0x191   : > { %5832 = shalt.err (!%p5829_p6)
}
 0x192   : > { %s5833_s15 = scalar_lea.vmem %s657_s22, 32  ;;  %s6134_s2 = smov [#allocation8]  }
 0x193   : > { %p5834_p0 = scmp.ne.s32.totalorder %s657_s22, %s5833_s15  ;;  %s5838_s21 = sshll.u32 %s6134_s2, 4  ;;  %s5839_s21 = int_to_ptr.vmem [resolvable:$false] %s5838_s21 }
 0x194   : > { %s5840_s30 = scalar_lea.vmem %s5839_s21, 64  ;;  %p5841_p3 = scmp.lt.s32.totalorder %s657_s22, %s5839_s21 }
 0x195   : > { %p5836_p9 = pnand %p5834_p0, %p7872_p11  ;;  %p5842_p7 = scmp.lt.s32.totalorder %s5840_s30, %s5833_s15 }
 0x197   : > { %p5837_p10 = pneg %p5836_p9  ;;  %p5843_p13 = por %p5842_p7, %p5841_p3 }
 0x199   : > { %p5844_p2 = pnand %p5843_p13, %p5837_p10 }
 0x19b   : > { %5847 = shalt.err (!%p5844_p2)
}
 0x19c   : > { %p7873_p8 = scmp.ne.s32.totalorder %s7841_s26, 0  ;;  %s7874_s3 = scalar_lea.sflag [#allocation7], %s6359_s1 }
 0x19d   : > { %s7875_s28 = sld [smem:[#allocation55_spill]]  ;;  %s687_s23 = scalar_lea.vmem [#allocation11], %s6363_s27 }
 0x19e   : > { %5179 = dma.hbm_to_vmem [thread:$0]  (!%p7873_p8), %s654_s9, 32, %s657_s22, %s7874_s3  }
 0x19f   : > { %s694_s25 = sshll.u32 %s687_s23, 4  ;;  %s7877_s24 = sld [smem:[#allocation57_spill]]  ;;  %s695_s25 = int_to_ptr.vmem [resolvable:$true] %s694_s25 }
 0x1a3   : > { %s7876_s20 = smov %s7875_s28  ;;  %s6694_s5 = scalar_lea.hbm %s7875_s28, %s6440_s12 }
 0x1a4   : > { %s5848_s2 = scalar_lea.hbm %s6694_s5, 16  ;;  %s5853_s21 = scalar_lea.hbm %s7876_s20, 32 }
 0x1a5   : > { %s6701_s15 = scalar_lea.hbm %s7877_s24, %s6440_s12  ;;  %p5849_p5 = scmp.ne.s32.totalorder %s6694_s5, %s5848_s2 }
 0x1a6   : > { %p5854_p1 = scmp.lt.u32.totalorder %s6694_s5, %s7876_s20  ;;  %p5855_p6 = scmp.lt.u32.totalorder %s5853_s21, %s5848_s2 }
 0x1a7   : > { %p5851_p12 = pnand %p5849_p5, %p7872_p11  ;;  %p5857_p9 = scmp.lt.u32.totalorder %s5848_s2, %s6694_s5 }
 0x1a8   : > { %p5856_p0 = por %p5855_p6, %p5854_p1 }
 0x1a9   : > { %p5852_p4 = pneg %p5851_p12 }
 0x1aa   : > { %p5858_p10 = por %p5857_p9, %p5856_p0 }
 0x1ac   : > { %p5859_p3 = pnand %p5858_p10, %p5852_p4 }
 0x1ae   : > { %5862 = shalt.err (!%p5859_p3)
}
 0x1af   : > { %s5863_s4 = scalar_lea.vmem %s695_s25, 16  ;;  %s6135_s19 = smov [#allocation11]  }
 0x1b0   : > { %p5864_p7 = scmp.ne.s32.totalorder %s695_s25, %s5863_s4  ;;  %s5868_s28 = sshll.u32 %s6135_s19, 4  ;;  %s5869_s28 = int_to_ptr.vmem [resolvable:$false] %s5868_s28 }
 0x1b1   : > { %s5870_s23 = scalar_lea.vmem %s5869_s28, 32  ;;  %p5871_p5 = scmp.lt.s32.totalorder %s695_s25, %s5869_s28 }
 0x1b2   : > { %p5866_p13 = pnand %p5864_p7, %p7872_p11  ;;  %p5872_p12 = scmp.lt.s32.totalorder %s5870_s23, %s5863_s4 }
 0x1b4   : > { %p5867_p2 = pneg %p5866_p13  ;;  %p5873_p8 = por %p5872_p12, %p5871_p5 }
 0x1b6   : > { %p5874_p1 = pnand %p5873_p8, %p5867_p2 }
 0x1b8   : > { %5877 = shalt.err (!%p5874_p1)
}
 0x1b9   : > { %p7878_p6 = scmp.ne.s32.totalorder %s7841_s26, 0  ;;  %s7879_s8 = scalar_lea.sflag [#allocation10], %s6359_s1 }
 0x1ba   : > { %s721_s6 = scalar_lea.vmem [#allocation14], %s6363_s27  ;;  %s7880_s21 = sld [smem:[#allocation59_spill]] }
 0x1bb   : > { %5185 = dma.hbm_to_vmem [thread:$0]  (!%p7878_p6), %s6694_s5, 16, %s695_s25, %s7879_s8  }
 0x1bc   : > { %s728_s2 = sshll.u32 %s721_s6, 4  ;;  %s5878_s3 = scalar_lea.hbm %s6701_s15, 16  ;;  %s729_s2 = int_to_ptr.vmem [resolvable:$true] %s728_s2 }
 0x1bd   : > { %p5879_p8 = scmp.ne.s32.totalorder %s6701_s15, %s5878_s3  ;;  %s5883_s28 = scalar_lea.hbm %s7877_s24, 32 }
 0x1be   : > { %p5884_p9 = scmp.lt.u32.totalorder %s6701_s15, %s7877_s24  ;;  %p5885_p10 = scmp.lt.u32.totalorder %s5883_s28, %s5878_s3 }
 0x1bf   : > { %p5881_p4 = pnand %p5879_p8, %p7872_p11  ;;  %p5887_p7 = scmp.lt.u32.totalorder %s5878_s3, %s6701_s15 }
 0x1c0   : > { %s6727_s30 = scalar_lea.hbm %s7880_s21, %s6440_s12  ;;  %p5886_p3 = por %p5885_p10, %p5884_p9 }
 0x1c1   : > { %p5882_p0 = pneg %p5881_p4 }
 0x1c2   : > { %p5888_p13 = por %p5887_p7, %p5886_p3 }
 0x1c4   : > { %p5889_p2 = pnand %p5888_p13, %p5882_p0 }
 0x1c6   : > { %5892 = shalt.err (!%p5889_p2)
}
 0x1c7   : > { %s5893_s5 = scalar_lea.vmem %s729_s2, 16  ;;  %s6136_s25 = smov [#allocation14]  }
 0x1c8   : > { %p5894_p5 = scmp.ne.s32.totalorder %s729_s2, %s5893_s5  ;;  %s5898_s8 = sshll.u32 %s6136_s25, 4  ;;  %s5899_s8 = int_to_ptr.vmem [resolvable:$false] %s5898_s8 }
 0x1c9   : > { %s5900_s6 = scalar_lea.vmem %s5899_s8, 32  ;;  %p5901_p8 = scmp.lt.s32.totalorder %s729_s2, %s5899_s8 }
 0x1ca   : > { %p5896_p12 = pnand %p5894_p5, %p7872_p11  ;;  %p5902_p4 = scmp.lt.s32.totalorder %s5900_s6, %s5893_s5 }
 0x1cc   : > { %p5897_p1 = pneg %p5896_p12  ;;  %p5903_p6 = por %p5902_p4, %p5901_p8 }
 0x1ce   : > { %p5904_p9 = pnand %p5903_p6, %p5897_p1 }
 0x1d0   : > { %5907 = shalt.err (!%p5904_p9)
}
 0x1d1   : > { %p7881_p10 = scmp.ne.s32.totalorder %s7841_s26, 0  ;;  %s7882_s7 = scalar_lea.sflag [#allocation13], %s6359_s1 }
 0x1d2   : > { %s755_s22 = scalar_lea.vmem [#allocation17], %s6363_s27  ;;  %s7883_s19 = sld [smem:[#allocation61_spill]] }
 0x1d3   : > { %5191 = dma.hbm_to_vmem [thread:$0]  (!%p7881_p10), %s6701_s15, 16, %s729_s2, %s7882_s7  }
 0x1d4   : > { %s762_s9 = sshll.u32 %s755_s22, 4  ;;  %s5908_s5 = scalar_lea.hbm %s6727_s30, 16  ;;  %s763_s9 = int_to_ptr.vmem [resolvable:$true] %s762_s9 }
 0x1d5   : > { %p5909_p6 = scmp.ne.s32.totalorder %s6727_s30, %s5908_s5  ;;  %s5913_s6 = scalar_lea.hbm %s7880_s21, 32 }
 0x1d6   : > { %p5914_p7 = scmp.lt.u32.totalorder %s6727_s30, %s7880_s21  ;;  %p5915_p13 = scmp.lt.u32.totalorder %s5913_s6, %s5908_s5 }
 0x1d7   : > { %p5911_p0 = pnand %p5909_p6, %p7872_p11  ;;  %p5917_p5 = scmp.lt.u32.totalorder %s5908_s5, %s6727_s30 }
 0x1d8   : > { %s7884_s23 = smov %s7883_s19  ;;  %s6753_s28 = scalar_lea.hbm %s7883_s19, %s6440_s12 }
 0x1d9   : > { %p5912_p3 = pneg %p5911_p0  ;;  %p5916_p2 = por %p5915_p13, %p5914_p7 }
 0x1db   : > { %p5918_p12 = por %p5917_p5, %p5916_p2 }
 0x1dd   : > { %p5919_p1 = pnand %p5918_p12, %p5912_p3 }
 0x1df   : > { %5922 = shalt.err (!%p5919_p1)
}
 0x1e0   : > { %s5923_s15 = scalar_lea.vmem %s763_s9, 16  ;;  %s6137_s2 = smov [#allocation17]  }
 0x1e1   : > { %p5924_p8 = scmp.ne.s32.totalorder %s763_s9, %s5923_s15  ;;  %s5928_s7 = sshll.u32 %s6137_s2, 4  ;;  %s5929_s7 = int_to_ptr.vmem [resolvable:$false] %s5928_s7 }
 0x1e2   : > { %s5930_s22 = scalar_lea.vmem %s5929_s7, 32  ;;  %p5931_p6 = scmp.lt.s32.totalorder %s763_s9, %s5929_s7 }
 0x1e3   : > { %p5926_p4 = pnand %p5924_p8, %p7872_p11  ;;  %p5932_p0 = scmp.lt.s32.totalorder %s5930_s22, %s5923_s15 }
 0x1e5   : > { %p5927_p9 = pneg %p5926_p4  ;;  %p5933_p10 = por %p5932_p0, %p5931_p6 }
 0x1e7   : > { %p5934_p7 = pnand %p5933_p10, %p5927_p9 }
 0x1e9   : > { %5937 = shalt.err (!%p5934_p7)
}
 0x1ea   : > { %p7885_p13 = scmp.ne.s32.totalorder %s7841_s26, 0  ;;  %s7886_s11 = scalar_lea.sflag [#allocation16], %s6359_s1 }
 0x1eb   : > { %s793_s14 = scalar_lea.vmem [#allocation20], %s6363_s27  ;;  %s7887_s5 = sld [smem:[#allocation63_spill]] }
 0x1ec   : > { %5197 = dma.hbm_to_vmem [thread:$0]  (!%p7885_p13), %s6727_s30, 16, %s763_s9, %s7886_s11  }
 0x1ed   : > { %s800_s3 = sshll.u32 %s793_s14, 4  ;;  %s5938_s8 = scalar_lea.hbm %s6753_s28, 16  ;;  %s801_s3 = int_to_ptr.vmem [resolvable:$true] %s800_s3 }
 0x1ee   : > { %p5939_p10 = scmp.ne.s32.totalorder %s6753_s28, %s5938_s8  ;;  %s5943_s2 = scalar_lea.hbm %s7884_s23, 32 }
 0x1ef   : > { %p5944_p5 = scmp.lt.u32.totalorder %s6753_s28, %s7884_s23  ;;  %p5945_p12 = scmp.lt.u32.totalorder %s5943_s2, %s5938_s8 }
 0x1f0   : > { %p5941_p3 = pnand %p5939_p10, %p7872_p11  ;;  %p5947_p8 = scmp.lt.u32.totalorder %s5938_s8, %s6753_s28 }
 0x1f1   : > { %s6779_s25 = scalar_lea.hbm %s7887_s5, %s6440_s12  ;;  %p5946_p1 = por %p5945_p12, %p5944_p5 }
 0x1f2   : > { %p5942_p2 = pneg %p5941_p3 }
 0x1f3   : > { %p5948_p4 = por %p5947_p8, %p5946_p1 }
 0x1f5   : > { %p5949_p9 = pnand %p5948_p4, %p5942_p2 }
 0x1f7   : > { %5952 = shalt.err (!%p5949_p9)
}
 0x1f8   : > { %s5953_s12 = scalar_lea.vmem %s801_s3, 16  ;;  %s6138_s30 = smov [#allocation20]  }
 0x1f9   : > { %p5954_p6 = scmp.ne.s32.totalorder %s801_s3, %s5953_s12  ;;  %s5958_s9 = sshll.u32 %s6138_s30, 4  ;;  %s5959_s9 = int_to_ptr.vmem [resolvable:$false] %s5958_s9 }
 0x1fa   : > { %s5960_s11 = scalar_lea.vmem %s5959_s9, 32  ;;  %p5961_p10 = scmp.lt.s32.totalorder %s801_s3, %s5959_s9 }
 0x1fb   : > { %p5956_p0 = pnand %p5954_p6, %p7872_p11  ;;  %p5962_p3 = scmp.lt.s32.totalorder %s5960_s11, %s5953_s12 }
 0x1fd   : > { %p5957_p7 = pneg %p5956_p0  ;;  %p5963_p13 = por %p5962_p3, %p5961_p10 }
 0x1ff   : > { %p5964_p5 = pnand %p5963_p13, %p5957_p7 }
 0x201   : > { %5967 = shalt.err (!%p5964_p5)
}
 0x202   : > { %p7888_p12 = scmp.ne.s32.totalorder %s7841_s26, 0  ;;  %s7889_s14 = scalar_lea.sflag [#allocation19], %s6359_s1 }
 0x203   : > { %s831_s4 = scalar_lea.vmem [#allocation23], %s6363_s27  ;;  %s5968_s8 = scalar_lea.hbm %s6779_s25, 16 }
 0x204   : > { %5203 = dma.hbm_to_vmem [thread:$0]  (!%p7888_p12), %s6753_s28, 16, %s801_s3, %s7889_s14  }
 0x205   : > { %s838_s19 = sshll.u32 %s831_s4, 4  ;;  %p5969_p2 = scmp.ne.s32.totalorder %s6779_s25, %s5968_s8  ;;  %s839_s19 = int_to_ptr.vmem [resolvable:$true] %s838_s19 }
 0x206   : > { %s5973_s2 = scalar_lea.hbm %s7887_s5, 32  ;;  %p5974_p8 = scmp.lt.u32.totalorder %s6779_s25, %s7887_s5 }
 0x207   : > { %p5971_p13 = pnand %p5969_p2, %p7872_p11  ;;  %p5975_p4 = scmp.lt.u32.totalorder %s5973_s2, %s5968_s8 }
 0x208   : > { %p5977_p6 = scmp.lt.u32.totalorder %s5968_s8, %s6779_s25 }
 0x209   : > { %p5972_p1 = pneg %p5971_p13  ;;  %p5976_p9 = por %p5975_p4, %p5974_p8 }
 0x20b   : > { %p5978_p0 = por %p5977_p6, %p5976_p9 }
 0x20d   : > { %p5979_p7 = pnand %p5978_p0, %p5972_p1 }
 0x20f   : > { %5982 = shalt.err (!%p5979_p7)
}
 0x210   : > { %s5983_s27 = scalar_lea.vmem %s839_s19, 16  ;;  %s6139_s28 = smov [#allocation23]  }
 0x211   : > { %p5984_p10 = scmp.ne.s32.totalorder %s839_s19, %s5983_s27  ;;  %s5988_s3 = sshll.u32 %s6139_s28, 4  ;;  %s5989_s3 = int_to_ptr.vmem [resolvable:$false] %s5988_s3 }
 0x212   : > { %s5990_s12 = scalar_lea.vmem %s5989_s3, 32  ;;  %p5991_p2 = scmp.lt.s32.totalorder %s839_s19, %s5989_s3 }
 0x213   : > { %p5986_p3 = pnand %p5984_p10, %p7872_p11  ;;  %p5992_p13 = scmp.lt.s32.totalorder %s5990_s12, %s5983_s27 }
 0x215   : > { %p5987_p5 = pneg %p5986_p3  ;;  %p5993_p12 = por %p5992_p13, %p5991_p2 }
 0x217   : > { %p5994_p4 = pnand %p5993_p12, %p5987_p5 }
 0x219   : > { %5997 = shalt.err (!%p5994_p4)
}
 0x21a   : > { %p7890_p8 = scmp.ne.s32.totalorder %s7841_s26, 0  ;;  %s7891_s30 = scalar_lea.sflag [#allocation22], %s6359_s1 }
 0x21b   : > { %s7892_s9 = sld [smem:[#allocation49_spill]] }
 0x21c   : > { %5209 = dma.hbm_to_vmem [thread:$0]  (!%p7890_p8), %s6779_s25, 16, %s839_s19, %s7891_s30  }
 0x221   : > { %p7893_p1 = scmp.ne.s32.totalorder %s7892_s9, 0 }
 0x222   : > { %s7894_s10 = sld [smem:[#allocation47_spill]] (!%p7893_p1) }
 0x223   : > { %847 = sbr.rel (%p7893_p1) target bundleno = 3909 (0xf45), region = 92 }
 0x228   : > { %p7895_p11 = scmp.eq.s32.totalorder (!%p7893_p1), %s7894_s10, 0 }
 0x22a   : > { %6049 = dma.done.wait (%p7895_p11), [#allocation4], 256   ;;  %p7896_p9 = pmov %p7895_p11 }
 0x22b   : > { %s7897_s11 = sld [smem:[#allocation44_spill]]  ;;  %s7898_s14 = sld [smem:[#allocation48_spill]] }
 0x22c   : > { %6051 = vsyncadd (%p7896_p9), [#allocation4], 4294967040  ;;  %s6827_s4 = sand.u32 1, %s7894_s10  }
 0x22d   : > { %s854_s25 = scalar_lea.sflag [#allocation7], %s6827_s4 }
 0x231   : > { %s6830_s26 = sand.u32 1, %s7897_s11   ;;  %p7899_p12 = scmp.ne.s32.totalorder %s7898_s14, 0 }
 0x232   : > { %s4639_s1 = sshll.u32 %s6830_s26, 6 }
 0x233   : > { %s6834_s19 = scalar_lea.vmem [#allocation6], %s4639_s1 }
 0x234   : > { %6053 = dma.done.wait (%p7899_p12), %s854_s25, 1056  }
 0x235   : > { %6055 = vsyncadd (%p7899_p12), %s854_s25, 4294966240  ;;  %s4640_s8 = sshll.u32 %s6830_s26, 1  ;;  %s4641_s6 = sshll.u32 %s6830_s26, 5 }
 0x236   : > { %s6842_s15 = scalar_lea.vmem [#allocation8], %s4640_s8  ;;  %s872_s2 = scalar_lea.sflag [#allocation10], %s6827_s4 }
 0x237   : > { %s6845_s7 = scalar_lea.vmem [#allocation9], %s4641_s6 }
 0x238   : > { %6057 = dma.done.wait (%p7899_p12), %s872_s2, 528  }
 0x239   : > { %6059 = vsyncadd (%p7899_p12), %s872_s2, 4294966768  ;;  %s883_s22 = scalar_lea.vmem [#allocation11], %s6830_s26  ;;  %s889_s27 = scalar_lea.sflag [#allocation13], %s6827_s4 }
 0x23a   : > { %s891_s28 = scalar_lea.vmem [#allocation12], %s6830_s26 }
 0x23b   : > { %6061 = dma.done.wait (%p7899_p12), %s889_s27, 32  }
 0x23c   : > { %6063 = vsyncadd (%p7899_p12), %s889_s27, 4294967264  ;;  %s899_s3 = scalar_lea.vmem [#allocation14], %s6830_s26  ;;  %s905_s12 = scalar_lea.sflag [#allocation16], %s6827_s4 }
 0x23d   : > { %s907_s30 = scalar_lea.vmem [#allocation15], %s6830_s26 }
 0x23e   : > { %6065 = dma.done.wait (%p7899_p12), %s905_s12, 32  }
 0x23f   : > { %6067 = vsyncadd (%p7899_p12), %s905_s12, 4294967264  ;;  %s915_s9 = scalar_lea.vmem [#allocation17], %s6830_s26  ;;  %s921_s11 = scalar_lea.sflag [#allocation19], %s6827_s4 }
 0x240   : > { %s6867_s25 = scalar_lea.vmem [#allocation18], %s4641_s6 }
 0x241   : > { %6069 = dma.done.wait (%p7899_p12), %s921_s11, 528  }
 0x242   : > { %6071 = vsyncadd (%p7899_p12), %s921_s11, 4294966768  ;;  %s932_s8 = scalar_lea.vmem [#allocation20], %s6830_s26  ;;  %s938_s2 = scalar_lea.sflag [#allocation22], %s6827_s4 }
 0x243   : > { %s6875_s27 = scalar_lea.vmem [#allocation21], %s4639_s1 }
 0x244   : > { %6073 = dma.done.wait (%p7899_p12), %s938_s2, 1040  }
 0x245   : > { %6075 = vsyncadd (%p7899_p12), %s938_s2, 4294966256  ;;  %s949_s6 = scalar_lea.vmem [#allocation23], %s6830_s26  ;;  %p7900_p6 = pmov %p7896_p9 }
 0x247   : > { %6077 = dma.done.wait (%p7900_p6), [#allocation25], 32   ;;  %p7901_p0 = pmov %p7900_p6 }
 0x249   : > { %6079 = vsyncadd (%p7901_p0), [#allocation25], 4294967264  ;;  %p7902_p7 = pmov %p7901_p0 }
 0x24a   : > { %p7903_p10 = pmov %p7901_p0 }
 0x24b   : > { %6081 = dma.done.wait (%p7902_p7), [#allocation28], 1040  }
 0x24c   : > { %6083 = vsyncadd (%p7903_p10), [#allocation28], 4294966256  ;;  %p7904_p3 = pmov %p7901_p0 }
 0x24d   : > { %p7905_p5 = pmov %p7901_p0 }
 0x24e   : > { %6085 = dma.done.wait (%p7904_p3), [#allocation31], 16  }
 0x24f   : > { %6087 = vsyncadd (%p7905_p5), [#allocation31], 4294967280  ;;  %s7906_s14 = sld [smem:[#allocation45_spill]] }
 0x255   : > { %p4649_p2 = scmp.ne.s32.totalorder %s7906_s14, 0 }
 0x256   : > { %v1072_v0 = vld [vmem:[#allocation3] sm:$0x3] (!%p4649_p2)  ;;  %vm1080_vm0 = vcmask (!%p4649_p2), 517120   ;;  %v1073_v1 = vld [vmem:[#allocation3 + $0x2] sm:$0x3] (!%p4649_p2) }
 0x257   : > { %1071 = sbr.rel (%p4649_p2) target bundleno = 606 (0x25e), region = 168  ;;  %1081 = vst.msk [vmem:[#allocation2] sm:$0x3] (!%p4649_p2), %vm1080_vm0, %v1072_v0  ;;  %1082 = vst.msk [vmem:[#allocation2 + $0x2] sm:$0x3] (!%p4649_p2), %vm1080_vm0, %v1073_v1 }
 0x258   : > { %v1074_v2 = vld [vmem:[#allocation3 + $0x4] sm:$0x3] (!%p4649_p2)  ;;  %v1075_v3 = vld [vmem:[#allocation3 + $0x6] sm:$0x3] (!%p4649_p2)  ;;  %v1076_v4 = vld [vmem:[#allocation3 + $0x8] sm:$0x3] (!%p4649_p2) }
 0x259   : > { %1083 = vst.msk [vmem:[#allocation2 + $0x4] sm:$0x3] (!%p4649_p2), %vm1080_vm0, %v1074_v2  ;;  %1084 = vst.msk [vmem:[#allocation2 + $0x6] sm:$0x3] (!%p4649_p2), %vm1080_vm0, %v1075_v3  ;;  %v1077_v5 = vld [vmem:[#allocation3 + $0xa] sm:$0x3] (!%p4649_p2) }
 0x25a   : > { %1085 = vst.msk [vmem:[#allocation2 + $0x8] sm:$0x3] (!%p4649_p2), %vm1080_vm0, %v1076_v4  ;;  %v1078_v6 = vld [vmem:[#allocation3 + $0xc] sm:$0x3] (!%p4649_p2)  ;;  %v1079_v7 = vld [vmem:[#allocation3 + $0xe] sm:$0x3] (!%p4649_p2) }
 0x25b   : > { %1086 = vst.msk [vmem:[#allocation2 + $0xa] sm:$0x3] (!%p4649_p2), %vm1080_vm0, %v1077_v5  ;;  %1087 = vst.msk [vmem:[#allocation2 + $0xc] sm:$0x3] (!%p4649_p2), %vm1080_vm0, %v1078_v6 }
 0x25c   : > { %1088 = vst.msk [vmem:[#allocation2 + $0xe] sm:$0x3] (!%p4649_p2), %vm1080_vm0, %v1079_v7 }
 0x25e PF: > { %v5314_v8 = vld [vmem:[%s6834_s19 + $0x4] ss:$8 sps:$4 sm:$0xff]   ;;  %v1128_v9 = vlaneseq  ;;  %v5316_v10 = vld [vmem:[%s6834_s19] ss:$8 sps:$4 sm:$0xff]   ;;  %v6140_v11 = vmov 0   ;;  %vm1211_vm1 = vcmask 523264  }
 0x25f   : > { %1247 = vmatprep.mubr.bf16.mxu1 %v6140_v11  ;;  %1215 = vmatprep.subr.bf16.mxu1 %v5314_v8  ;;  %v5317_v12 = vld [vmem:[%s6834_s19 + $0x14] ss:$8 sps:$4 sm:$0xff]   ;;  %v6141_v13 = vmov 1983009808   ;;  %v5319_v16 = vld [vmem:[%s6834_s19 + $0x10] ss:$8 sps:$4 sm:$0xff]  }
 0x260   : > { %v1126_v14 = vunpack.c.l.s4 %v6141_v13  ;;  %v1129_v15 = vshrl.u32 %v1128_v9, 7  ;;  %1216 = vmatpush1.bf16.msra.mxu1 %v5316_v10  ;;  %v5320_v17 = vld [vmem:[%s6834_s19 + $0x24] ss:$8 sps:$4 sm:$0xff]   ;;  %v5322_v19 = vld [vmem:[%s6834_s19 + $0x20] ss:$8 sps:$4 sm:$0xff]   ;;  %v6142_v61 = vmov 0.0  }
 0x261   : > { %1217 = vmatprep.subr.bf16.mxu1 %v5317_v12  ;;  %v1089_v20 = vld [vmem:[#allocation2] sm:$0x3]  ;;  %v1090_v21 = vld [vmem:[#allocation2 + $0x2] sm:$0x3]  ;;  %v1091_v22 = vld [vmem:[#allocation2 + $0x4] sm:$0x3]  ;;  %4843 = vmatprep.subr.bf16.mxu0 %v6142_v61 }
 0x262   : > { %v1127_v18 = vunpack.c.0.s8 %v1126_v14  ;;  %v1092_v23 = vld [vmem:[#allocation2 + $0x6] sm:$0x3]  ;;  %v1093_v24 = vld [vmem:[#allocation2 + $0x8] sm:$0x3]  ;;  %v1123_v25 = vcombine.low %v1089_v20, %v1090_v21  ;;  %v1094_v27 = vld [vmem:[#allocation2 + $0xa] sm:$0x3] }
 0x263   : > { %v1095_v28 = vld [vmem:[#allocation2 + $0xc] sm:$0x3]  ;;  %v1096_v29 = vld [vmem:[#allocation2 + $0xe] sm:$0x3]  ;;  %v1124_v30 = vcombine.low %v1091_v22, %v1092_v23  ;;  %v5323_v31 = vld [vmem:[%s6834_s19 + $0x34] ss:$8 sps:$4 sm:$0xff]   ;;  %v1140_v33 = vcombine.low %v1093_v24, %v1094_v27 }
 0x264   : > { %v6901_v26 = vsub.s32 %v1127_v18, %v1129_v15  ;;  %1218 = vmatpush1.bf16.msra.mxu1 %v5319_v16  ;;  %v1141_v34 = vcombine.low %v1095_v28, %v1096_v29  ;;  %v5325_v35 = vld [vmem:[%s6834_s19 + $0x30] ss:$8 sps:$4 sm:$0xff]   ;;  %v1163_v42 = vsub.s32 0, %v1129_v15  ;;  %v1105_v43 = vld [vmem:[%s6842_s15] sm:$0x3]  ;;  %v1167_v44 = vsub.s32 1, %v1129_v15 }
 0x265   : > { %1219 = vmatprep.subr.bf16.mxu1 %v5320_v17  ;;  %s6143_s10 = smov 96   ;;  %vm6144_vm2 = vmmov 0   ;;  %s6145_s4 = smov 64   ;;  %vm1381_vm3 = vcmask 261120   ;;  %vm2392_vm4 = vcmask 1040384   ;;  %vm2163_vm5 = vcmask 9216  }
 0x266   : > { %v1131_v32 = vrot.slane %v1123_v25, %v6901_v26  ;;  %v1138_v36 = vrot.slane %v1124_v30, %v6901_v26  ;;  %v1148_v37 = vrot.slane %v1140_v33, %v6901_v26  ;;  %v1155_v38 = vrot.slane %v1141_v34, %v6901_v26  ;;  %4845 = vmatprep.mubr.msk.bf16.mxu0 %vm6144_vm2, %v6142_v61  ;;  %s6146_s1 = smov 32   ;;  %s7907_s26 = sld [smem:[#allocation45_spill]] }
 0x267   : > { %v1164_v45 = vrot.slane %v1105_v43, %v1163_v42  ;;  %v1168_v46 = vrot.slane %v1105_v43, %v1167_v44  ;;  %vm2388_vm6 = vcmask 15360   ;;  %vm3339_vm7 = vcmask 517120  }
 0x268   : > { %1220 = vmatpush1.bf16.msra.mxu1 %v5322_v19  ;;  %v1139_v39 = vcombine.low %v1131_v32, %v1138_v36  ;;  %v1156_v40 = vcombine.low %v1148_v37, %v1155_v38 }
 0x269   : > { %1221 = vmatprep.subr.bf16.mxu1 %v5323_v31 }
 0x26a   : > { %v1159_v41 = vpack.c.bf16 %v1156_v40, %v1139_v39 }
 0x26c   : > { %1222 = vmatpush1.bf16.msra.mxu1 %v5325_v35  ;;  %p4716_p13 = scmp.ne.s32.totalorder %s7907_s26, 1 }
 0x26d   : > { %4831 = vmatprep.subr.bf16.mxu1 %v6142_v61 }
 0x26f   : > { %4658 = vmatmul.mubr.msk.bf16.vlgmr.msra.gmra.mrb[0].mxu1 %vm1211_vm1, %v1159_v41 }
 0x270   : > { %4833 = vmatprep.mubr.msk.bf16.mxu1 %vm6144_vm2, %v6142_v61 }
 0x342   : > { %v1249_v47 = vpop.f32.mrb[0].mxu1 }
 0x343   : > { %v1250_v48 = vadd.f32 %v1249_v47, %v1164_v45  ;;  %v1251_v49 = vpop.f32.mrb[1].mxu1 }
 0x344   : > { %v1252_v50 = vadd.f32 %v1251_v49, %v1168_v46  ;;  %v1253_v51 = vpop.f32.mrb[2].mxu1 }
 0x345   : > { %v1254_v52 = vadd.f32 %v1253_v51, %v1164_v45  ;;  %v1255_v53 = vpop.f32.mrb[3].mxu1 }
 0x346   : > { %v1262_v54 = vcombine.low %v1250_v48, %v1252_v50  ;;  %v1263_v55 = vcombine.high %v1250_v48, %v1252_v50  ;;  %v1256_v56 = vadd.f32 %v1255_v53, %v1168_v46 }
 0x348   : > { %v6912_v57 = vrot.slane %v1262_v54, %v6901_v26  ;;  %v6915_v58 = vrot.slane %v1263_v55, %v6901_v26  ;;  %v1280_v59 = vcombine.low %v1254_v52, %v1256_v56  ;;  %v1281_v60 = vcombine.high %v1254_v52, %v1256_v56 }
 0x34a   : > { %v6920_v62 = vrot.slane %v1280_v59, %v6901_v26  ;;  %v6924_v63 = vcombine.high %v6912_v57, %v6912_v57  ;;  %v6927_v0 = vrot.slane %v1281_v60, %v6901_v26  ;;  %v6937_v3 = vcombine.high %v6915_v58, %v6915_v58 }
 0x34b   : > { %v1362_v7 = vpack.c.bf16 %v6912_v57, %v6912_v57  ;;  %v1364_v10 = vpack.c.bf16 %v6915_v58, %v6915_v58 }
 0x34c   : > { %v5294_v1 = vpack.i.bf16 %v6924_v63, %v6912_v57  ;;  %v6933_v2 = vcombine.high %v6920_v62, %v6920_v62  ;;  %v5299_v5 = vpack.i.bf16 %v6937_v3, %v6915_v58  ;;  %v6945_v6 = vcombine.high %v6927_v0, %v6927_v0 }
 0x34d   : > { %v6958_v9 = vpack.c.bf16 %v6924_v63, %v6924_v63  ;;  %v6967_v11 = vpack.c.bf16 %v6937_v3, %v6937_v3  ;;  %v6973_v12 = vpack.c.bf16 %v6920_v62, %v6920_v62  ;;  %v6985_v14 = vpack.c.bf16 %v6927_v0, %v6927_v0 }
 0x34e   : > { %5295 = vrot.lane.b32.xlu0 %v5294_v1, %s6143_s10  ;;  %v5304_v4 = vpack.i.bf16 %v6933_v2, %v6920_v62  ;;  %v5309_v8 = vpack.i.bf16 %v6945_v6, %v6927_v0  ;;  %v6979_v13 = vpack.c.bf16 %v6933_v2, %v6933_v2  ;;  %v6991_v15 = vpack.c.bf16 %v6945_v6, %v6945_v6 }
 0x350   : > { %5305 = vrot.lane.b32.xlu1 %v5304_v4, %s6143_s10 }
 0x352   : > { %5300 = vrot.lane.b32.xlu0 %v5299_v5, %s6143_s10 }
 0x354   : > { %1379 = vrot.lane.b32.xlu1 %v1362_v7, %s6145_s4 }
 0x356   : > { %5310 = vrot.lane.b32.xlu0 %v5309_v8, %s6143_s10 }
 0x358   : > { %1429 = vrot.lane.b32.xlu1 %v6958_v9, %s6145_s4 }
 0x35a   : > { %1478 = vrot.lane.b32.xlu0 %v1364_v10, %s6145_s4 }
 0x35c   : > { %1527 = vrot.lane.b32.xlu1 %v6967_v11, %s6145_s4 }
 0x35e   : > { %1576 = vrot.lane.b32.xlu0 %v6973_v12, %s6145_s4 }
 0x360   : > { %1625 = vrot.lane.b32.xlu1 %v6979_v13, %s6145_s4 }
 0x362   : > { %1674 = vrot.lane.b32.xlu0 %v6985_v14, %s6145_s4 }
 0x364   : > { %1723 = vrot.lane.b32.xlu1 %v6991_v15, %s6145_s4 }
 0x3c0   : > { %v5296_v16 = vpop.permute.xlu0 %5295 }
 0x3c1   : > { %v6995_v17 = vunpack.i.h.bf16 %v5296_v16  ;;  %v6997_v18 = vunpack.i.l.bf16 %v5296_v16 }
 0x3c2   : > { %v5306_v19 = vpop.permute.xlu1 %5305 }
 0x3c3   : > { %v7001_v20 = vpack.c.bf16 %v6995_v17, %v6995_v17  ;;  %v7005_v21 = vpack.c.bf16 %v6997_v18, %v6997_v18  ;;  %v7015_v27 = vunpack.i.l.bf16 %v5306_v19  ;;  %v7025_v30 = vunpack.i.h.bf16 %v5306_v19 }
 0x3c4   : > { %v5301_v22 = vpop.permute.xlu0 %5300 }
 0x3c5   : > { %v7007_v23 = vunpack.i.h.bf16 %v5301_v22  ;;  %v7009_v24 = vunpack.i.l.bf16 %v5301_v22  ;;  %1772 = vrot.lane.b32.xlu0 %v7005_v21, %s6145_s4  ;;  %1821 = vrot.lane.b32.xlu1 %v7001_v20, %s6145_s4  ;;  %v7035_v33 = vpack.c.bf16 %v7015_v27, %v7015_v27  ;;  %v7041_v35 = vpack.c.bf16 %v7025_v30, %v7025_v30 }
 0x3c6   : > { %v1380_v25 = vpop.permute.xlu1 %1379 }
 0x3c7   : > { %v7019_v28 = vpack.c.bf16 %v7007_v23, %v7007_v23  ;;  %v7023_v29 = vpack.c.bf16 %v7009_v24, %v7009_v24  ;;  %v1386_v31 = vsel %vm1381_vm3, %v1380_v25, 0 }
 0x3c8   : > { %v5311_v32 = vpop.permute.xlu0 %5310  ;;  %4832 = vmatpush3.bf16.xpose.msra.mxu1 %v1386_v31 }
 0x3c9   : > { %1870 = vrot.lane.b32.xlu0 %v7023_v29, %s6145_s4  ;;  %1919 = vrot.lane.b32.xlu1 %v7019_v28, %s6145_s4  ;;  %v7037_v34 = vunpack.i.l.bf16 %v5311_v32  ;;  %v7043_v36 = vunpack.i.h.bf16 %v5311_v32 }
 0x3ca   : > { %4837 = vmatprep.subr.bf16.mxu1 %v6142_v61  ;;  %v1430_v38 = vpop.permute.xlu1 %1429 }
 0x3cb   : > { %v7052_v40 = vpack.c.bf16 %v7037_v34, %v7037_v34  ;;  %v7057_v41 = vpack.c.bf16 %v7043_v36, %v7043_v36  ;;  %v1435_v42 = vsel %vm1381_vm3, %v1430_v38, 0 }
 0x3cc   : > { %v1479_v37 = vpop.permute.xlu0 %1478 }
 0x3cd   : > { %1968 = vrot.lane.b32.xlu0 %v7035_v33, %s6145_s4  ;;  %v1484_v39 = vsel %vm1381_vm3, %v1479_v37, 0  ;;  %2017 = vrot.lane.b32.xlu1 %v7041_v35, %s6145_s4 }
 0x3ce   : > { %4844 = vmatpush3.bf16.xpose.msra.mxu0 %v1484_v39  ;;  %v1528_v44 = vpop.permute.xlu1 %1527 }
 0x3cf   : > { %4855 = vmatprep.subr.bf16.mxu0 %v6142_v61  ;;  %4834 = vmatmul.mubr.msk.bf16.vlgmr.msra.gmra.mrb[4].mxu1 %vm1381_vm3, %v1362_v7  ;;  %v1533_v46 = vsel %vm1381_vm3, %v1528_v44, 0 }
 0x3d0   : > { %4838 = vmatpush3.bf16.xpose.msra.mxu1 %v1435_v42  ;;  %v1577_v43 = vpop.permute.xlu0 %1576  ;;  %4839 = vmatprep.mubr.msk.bf16.mxu1 %vm6144_vm2, %v6142_v61 }
 0x3d1   : > { %2066 = vrot.lane.b32.xlu0 %v7052_v40, %s6145_s4  ;;  %2115 = vrot.lane.b32.xlu1 %v7057_v41, %s6145_s4  ;;  %v1582_v45 = vsel %vm1381_vm3, %v1577_v43, 0 }
 0x3d2   : > { %4849 = vmatprep.subr.bf16.mxu1 %v6142_v61  ;;  %v1626_v48 = vpop.permute.xlu1 %1625 }
 0x3d3   : > { %v1631_v50 = vsel %vm1381_vm3, %v1626_v48, 0 }
 0x3d4   : > { %v1675_v47 = vpop.permute.xlu0 %1674 }
 0x3d5   : > { %4846 = vmatmul.mubr.msk.bf16.vlgmr.msra.gmra.mrb[0].mxu0 %vm1381_vm3, %v1364_v10  ;;  %v1680_v49 = vsel %vm1381_vm3, %v1675_v47, 0 }
 0x3d6   : > { %4856 = vmatpush3.bf16.xpose.msra.mxu0 %v1582_v45  ;;  %4857 = vmatprep.mubr.msk.bf16.mxu0 %vm6144_vm2, %v6142_v61  ;;  %v1724_v51 = vpop.permute.xlu1 %1723 }
 0x3d7   : > { %4867 = vmatprep.subr.bf16.mxu0 %v6142_v61  ;;  %4840 = vmatmul.mubr.msk.bf16.vlgmr.msra.gmra.mrb[8].mxu1 %vm1381_vm3, %v6958_v9  ;;  %v1729_v52 = vsel %vm1381_vm3, %v1724_v51, 0 }
 0x3d8   : > { %4850 = vmatpush3.bf16.xpose.msra.mxu1 %v1533_v46  ;;  %4851 = vmatprep.mubr.msk.bf16.mxu1 %vm6144_vm2, %v6142_v61 }
 0x3d9   : > { %4861 = vmatprep.subr.bf16.mxu1 %v6142_v61 }
 0x3dd   : > { %4858 = vmatmul.mubr.msk.bf16.vlgmr.msra.gmra.mrb[4].mxu0 %vm1381_vm3, %v6973_v12 }
 0x3de   : > { %4868 = vmatpush3.bf16.xpose.msra.mxu0 %v1680_v49  ;;  %4869 = vmatprep.mubr.msk.bf16.mxu0 %vm6144_vm2, %v6142_v61 }
 0x3df   : > { %4879 = vmatprep.subr.bf16.mxu0 %v6142_v61  ;;  %4852 = vmatmul.mubr.msk.bf16.vlgmr.msra.gmra.mrb[12].mxu1 %vm1381_vm3, %v6967_v11 }
 0x3e0   : > { %4862 = vmatpush3.bf16.xpose.msra.mxu1 %v1631_v50  ;;  %4863 = vmatprep.mubr.msk.bf16.mxu1 %vm6144_vm2, %v6142_v61 }
 0x3e1   : > { %4873 = vmatprep.subr.bf16.mxu1 %v6142_v61 }
 0x3e5   : > { %4870 = vmatmul.mubr.msk.bf16.vlgmr.msra.gmra.mrb[8].mxu0 %vm1381_vm3, %v6985_v14  ;;  %v1330_v14 = vrot.slane %v6912_v57, 2 }
 0x3e6   : > { %4881 = vmatprep.mubr.msk.bf16.mxu0 %vm6144_vm2, %v6142_v61 }
 0x3e7   : > { %4864 = vmatmul.mubr.msk.bf16.vlgmr.msra.gmra.mrb[16].mxu1 %vm1381_vm3, %v6979_v13  ;;  %v2372_v16 = vpack.c.bf16 %v1330_v14, %v1330_v14 }
 0x3e8   : > { %4874 = vmatpush3.bf16.xpose.msra.mxu1 %v1729_v52  ;;  %4875 = vmatprep.mubr.msk.bf16.mxu1 %vm6144_vm2, %v6142_v61 }
 0x3e9   : > { %4885 = vmatprep.subr.bf16.mxu1 %v6142_v61  ;;  %v2394_v57 = vsel %vm2392_vm4, %v2372_v16, 0 }
 0x3ef   : > { %4876 = vmatmul.mubr.msk.bf16.vlgmr.msra.gmra.mrb[20].mxu1 %vm1381_vm3, %v6991_v15  ;;  %v1331_v15 = vrot.slane %v6924_v63, 2 }
 0x3f0   : > { %4887 = vmatprep.mubr.msk.bf16.mxu1 %vm6144_vm2, %v6142_v61 }
 0x3f1   : > { %v2373_v19 = vpack.c.bf16 %v1331_v15, %v1331_v15 }
 0x3f3   : > { %v2440_v63 = vsel %vm2392_vm4, %v2373_v19, 0 }
 0x437   : > { %v1773_v53 = vpop.permute.xlu0 %1772  ;;  %v1822_v54 = vpop.permute.xlu1 %1821 }
 0x438   : > { %v1778_v55 = vsel %vm1381_vm3, %v1773_v53, 0  ;;  %v1827_v56 = vsel %vm1381_vm3, %v1822_v54, 0 }
 0x439   : > { %4880 = vmatpush3.bf16.xpose.msra.mxu0 %v1778_v55  ;;  %4886 = vmatpush3.bf16.xpose.msra.mxu1 %v1827_v56 }
 0x43a   : > { %4891 = vmatprep.subr.bf16.mxu0 %v6142_v61  ;;  %4897 = vmatprep.subr.bf16.mxu1 %v6142_v61 }
 0x43b   : > { %v1871_v59 = vpop.permute.xlu0 %1870  ;;  %v1920_v60 = vpop.permute.xlu1 %1919 }
 0x43c   : > { %v1876_v1 = vsel %vm1381_vm3, %v1871_v59, 0  ;;  %v1925_v4 = vsel %vm1381_vm3, %v1920_v60, 0 }
 0x43f   : > { %v1969_v5 = vpop.permute.xlu0 %1968  ;;  %v2018_v7 = vpop.permute.xlu1 %2017 }
 0x440   : > { %4882 = vmatmul.mubr.msk.bf16.vlgmr.msra.gmra.mrb[12].mxu0 %vm1381_vm3, %v7005_v21  ;;  %4888 = vmatmul.mubr.msk.bf16.vlgmr.msra.gmra.mrb[24].mxu1 %vm1381_vm3, %v7001_v20  ;;  %v1974_v8 = vsel %vm1381_vm3, %v1969_v5, 0  ;;  %v2023_v9 = vsel %vm1381_vm3, %v2018_v7, 0 }
 0x441   : > { %4892 = vmatpush3.bf16.xpose.msra.mxu0 %v1876_v1  ;;  %4898 = vmatpush3.bf16.xpose.msra.mxu1 %v1925_v4 }
 0x442   : > { %4893 = vmatprep.mubr.msk.bf16.mxu0 %vm6144_vm2, %v6142_v61  ;;  %4899 = vmatprep.mubr.msk.bf16.mxu1 %vm6144_vm2, %v6142_v61 }
 0x443   : > { %4903 = vmatprep.subr.bf16.mxu0 %v6142_v61  ;;  %4909 = vmatprep.subr.bf16.mxu1 %v6142_v61  ;;  %v2067_v10 = vpop.permute.xlu0 %2066  ;;  %v2116_v11 = vpop.permute.xlu1 %2115 }
 0x444   : > { %v2072_v12 = vsel %vm1381_vm3, %v2067_v10, 0  ;;  %v2121_v13 = vsel %vm1381_vm3, %v2116_v11, 0 }
 0x448   : > { %4894 = vmatmul.mubr.msk.bf16.vlgmr.msra.gmra.mrb[16].mxu0 %vm1381_vm3, %v7023_v29  ;;  %4900 = vmatmul.mubr.msk.bf16.vlgmr.msra.gmra.mrb[28].mxu1 %vm1381_vm3, %v7019_v28 }
 0x449   : > { %4904 = vmatpush3.bf16.xpose.msra.mxu0 %v1974_v8  ;;  %4910 = vmatpush3.bf16.xpose.msra.mxu1 %v2023_v9 }
 0x44a   : > { %4905 = vmatprep.mubr.msk.bf16.mxu0 %vm6144_vm2, %v6142_v61  ;;  %4911 = vmatprep.mubr.msk.bf16.mxu1 %vm6144_vm2, %v6142_v61 }
 0x44b   : > { %4915 = vmatprep.subr.bf16.mxu0 %v6142_v61  ;;  %4921 = vmatprep.subr.bf16.mxu1 %v6142_v61 }
 0x450   : > { %4906 = vmatmul.mubr.msk.bf16.vlgmr.msra.gmra.mrb[20].mxu0 %vm1381_vm3, %v7035_v33  ;;  %4912 = vmatmul.mubr.msk.bf16.vlgmr.msra.gmra.mrb[32].mxu1 %vm1381_vm3, %v7041_v35 }
 0x451   : > { %4916 = vmatpush3.bf16.xpose.msra.mxu0 %v2072_v12  ;;  %4922 = vmatpush3.bf16.xpose.msra.mxu1 %v2121_v13 }
 0x452   : > { %4917 = vmatprep.mubr.msk.bf16.mxu0 %vm6144_vm2, %v6142_v61  ;;  %4923 = vmatprep.mubr.msk.bf16.mxu1 %vm6144_vm2, %v6142_v61 }
 0x453   : > { %4927 = vmatprep.subr.bf16.mxu0 %v6142_v61  ;;  %4933 = vmatprep.subr.bf16.mxu1 %v6142_v61 }
 0x458   : > { %4918 = vmatmul.mubr.msk.bf16.vlgmr.msra.gmra.mrb[24].mxu0 %vm1381_vm3, %v7052_v40  ;;  %4924 = vmatmul.mubr.msk.bf16.vlgmr.msra.gmra.mrb[36].mxu1 %vm1381_vm3, %v7057_v41 }
 0x459   : > { %4928 = vmatpush3.bf16.msra.mxu0 %v2394_v57  ;;  %4934 = vmatpush3.bf16.msra.mxu1 %v2440_v63 }
 0x45a   : > { %4929 = vmatprep.mubr.msk.bf16.mxu0 %vm6144_vm2, %v6142_v61  ;;  %4939 = vmatprep.subr.bf16.mxu0 %v6142_v61 }
 0x45b   : > { %4935 = vmatprep.mubr.msk.bf16.mxu1 %vm6144_vm2, %v6142_v61  ;;  %4945 = vmatprep.subr.bf16.mxu1 %v6142_v61 }
 0x4a2   : > { %v7159_v20 = vpop.f32.mrb[4].mxu1 }
 0x4a3   : > { %v4835_v21 = vpop.f32.mrb[5].mxu1  ;;  %v2164_v22 = vsel %vm2163_vm5, %v7159_v20, -inf }
 0x4a4   : > { %v1425_v25 = vpop.f32.mrb[6].mxu1  ;;  %2165 = vmax.xlane.f32.xlu0 %v2164_v22 }
 0x4a5   : > { %v4836_v28 = vpop.f32.mrb[7].mxu1 }
 0x4a8   : > { %v7163_v29 = vpop.f32.mrb[0].mxu0 }
 0x4a9   : > { %v4847_v31 = vpop.f32.mrb[1].mxu0  ;;  %v2170_v32 = vsel %vm2163_vm5, %v7163_v29, -inf }
 0x4aa   : > { %v1523_v33 = vpop.f32.mrb[2].mxu0  ;;  %2171 = vmax.xlane.f32.xlu0 %v2170_v32  ;;  %v7167_v35 = vpop.f32.mrb[8].mxu1 }
 0x4ab   : > { %v4848_v37 = vpop.f32.mrb[3].mxu0  ;;  %v4841_v38 = vpop.f32.mrb[9].mxu1  ;;  %v2167_v39 = vsel %vm2163_vm5, %v7167_v35, -inf }
 0x4ac   : > { %2168 = vmax.xlane.f32.xlu1 %v2167_v39  ;;  %v1474_v40 = vpop.f32.mrb[10].mxu1 }
 0x4ad   : > { %v4842_v41 = vpop.f32.mrb[11].mxu1 }
 0x4b0   : > { %v7171_v42 = vpop.f32.mrb[4].mxu0 }
 0x4b1   : > { %v4859_v43 = vpop.f32.mrb[5].mxu0  ;;  %v2176_v44 = vsel %vm2163_vm5, %v7171_v42, -inf }
 0x4b2   : > { %v1621_v45 = vpop.f32.mrb[6].mxu0  ;;  %2177 = vmax.xlane.f32.xlu1 %v2176_v44  ;;  %v7175_v46 = vpop.f32.mrb[12].mxu1 }
 0x4b3   : > { %v4860_v47 = vpop.f32.mrb[7].mxu0  ;;  %v4853_v48 = vpop.f32.mrb[13].mxu1  ;;  %v2173_v49 = vsel %vm2163_vm5, %v7175_v46, -inf }
 0x4b4   : > { %2174 = vmax.xlane.f32.xlu0 %v2173_v49  ;;  %v1572_v50 = vpop.f32.mrb[14].mxu1 }
 0x4b5   : > { %v4854_v51 = vpop.f32.mrb[15].mxu1 }
 0x4b8   : > { %v7179_v52 = vpop.f32.mrb[8].mxu0 }
 0x4b9   : > { %v4871_v53 = vpop.f32.mrb[9].mxu0  ;;  %v2182_v54 = vsel %vm2163_vm5, %v7179_v52, -inf }
 0x4ba   : > { %v1719_v55 = vpop.f32.mrb[10].mxu0  ;;  %2183 = vmax.xlane.f32.xlu1 %v2182_v54  ;;  %v7183_v56 = vpop.f32.mrb[16].mxu1 }
 0x4bb   : > { %v4872_v59 = vpop.f32.mrb[11].mxu0  ;;  %v4865_v60 = vpop.f32.mrb[17].mxu1  ;;  %v2179_v1 = vsel %vm2163_vm5, %v7183_v56, -inf }
 0x4bc   : > { %2180 = vmax.xlane.f32.xlu0 %v2179_v1  ;;  %v1670_v4 = vpop.f32.mrb[18].mxu1 }
 0x4bd   : > { %v4866_v5 = vpop.f32.mrb[19].mxu1 }
 0x4c2   : > { %v7187_v7 = vpop.f32.mrb[20].mxu1 }
 0x4c3   : > { %v4877_v8 = vpop.f32.mrb[21].mxu1  ;;  %v2185_v9 = vsel %vm2163_vm5, %v7187_v7, -inf }
 0x4c4   : > { %2186 = vmax.xlane.f32.xlu0 %v2185_v9  ;;  %v1768_v10 = vpop.f32.mrb[22].mxu1 }
 0x4c5   : > { %v4878_v11 = vpop.f32.mrb[23].mxu1 }
 0x513   : > { %v7191_v12 = vpop.f32.mrb[12].mxu0  ;;  %v7193_v13 = vpop.f32.mrb[24].mxu1 }
 0x514   : > { %v4883_v14 = vpop.f32.mrb[13].mxu0  ;;  %v4889_v15 = vpop.f32.mrb[25].mxu1  ;;  %v2188_v16 = vsel %vm2163_vm5, %v7191_v12, -inf  ;;  %v2191_v19 = vsel %vm2163_vm5, %v7193_v13, -inf }
 0x515   : > { %v1817_v57 = vpop.f32.mrb[14].mxu0  ;;  %2189 = vmax.xlane.f32.xlu1 %v2188_v16  ;;  %2192 = vmax.xlane.f32.xlu0 %v2191_v19  ;;  %v1866_v63 = vpop.f32.mrb[26].mxu1 }
 0x516   : > { %v4884_v21 = vpop.f32.mrb[15].mxu0  ;;  %v4890_v22 = vpop.f32.mrb[27].mxu1 }
 0x51b   : > { %v7199_v25 = vpop.f32.mrb[16].mxu0  ;;  %v7201_v28 = vpop.f32.mrb[28].mxu1 }
 0x51c   : > { %v4895_v31 = vpop.f32.mrb[17].mxu0  ;;  %v4901_v32 = vpop.f32.mrb[29].mxu1  ;;  %v2194_v33 = vsel %vm2163_vm5, %v7199_v25, -inf  ;;  %v2197_v37 = vsel %vm2163_vm5, %v7201_v28, -inf }
 0x51d   : > { %v1915_v38 = vpop.f32.mrb[18].mxu0  ;;  %2195 = vmax.xlane.f32.xlu1 %v2194_v33  ;;  %2198 = vmax.xlane.f32.xlu0 %v2197_v37  ;;  %v1964_v39 = vpop.f32.mrb[30].mxu1 }
 0x51e   : > { %v4896_v40 = vpop.f32.mrb[19].mxu0  ;;  %v4902_v41 = vpop.f32.mrb[31].mxu1 }
 0x523   : > { %v7207_v43 = vpop.f32.mrb[20].mxu0  ;;  %v7209_v44 = vpop.f32.mrb[32].mxu1 }
 0x524   : > { %v4907_v45 = vpop.f32.mrb[21].mxu0  ;;  %v4913_v47 = vpop.f32.mrb[33].mxu1  ;;  %v2200_v48 = vsel %vm2163_vm5, %v7207_v43, -inf  ;;  %v2203_v49 = vsel %vm2163_vm5, %v7209_v44, -inf }
 0x525   : > { %v2013_v50 = vpop.f32.mrb[22].mxu0  ;;  %2201 = vmax.xlane.f32.xlu1 %v2200_v48  ;;  %2204 = vmax.xlane.f32.xlu0 %v2203_v49  ;;  %v2062_v51 = vpop.f32.mrb[34].mxu1 }
 0x526   : > { %v4908_v53 = vpop.f32.mrb[23].mxu0  ;;  %v4914_v54 = vpop.f32.mrb[35].mxu1 }
 0x52b   : > { %v7215_v55 = vpop.f32.mrb[24].mxu0  ;;  %v7217_v59 = vpop.f32.mrb[36].mxu1 }
 0x52c   : > { %v4919_v60 = vpop.f32.mrb[25].mxu0  ;;  %v4925_v1 = vpop.f32.mrb[37].mxu1  ;;  %v2206_v4 = vsel %vm2163_vm5, %v7215_v55, -inf  ;;  %v2209_v5 = vsel %vm2163_vm5, %v7217_v59, -inf }
 0x52d   : > { %v2111_v8 = vpop.f32.mrb[26].mxu0  ;;  %2207 = vmax.xlane.f32.xlu1 %v2206_v4  ;;  %2210 = vmax.xlane.f32.xlu0 %v2209_v5  ;;  %v2160_v9 = vpop.f32.mrb[38].mxu1 }
 0x52e   : > { %v4920_v10 = vpop.f32.mrb[27].mxu0  ;;  %v4926_v11 = vpop.f32.mrb[39].mxu1 }
 0x531   : > { %v2166_v14 = vpop.xlane.xlu0 %2165 }
 0x532   : > { %v2212_v15 = vsub.f32 %v7159_v20, %v2166_v14 }
 0x534   : > { %v2228_v16 = vmul.f32 1.442695, %v2212_v15 }
 0x536   : > { %5342 = vpow2.f32 %v2228_v16 }
 0x537   : > { %v2172_v19 = vpop.xlane.xlu0 %2171 }
 0x538   : > { %v2214_v57 = vsub.f32 %v7163_v29, %v2172_v19 }
 0x539   : > { %v2169_v21 = vpop.xlane.xlu1 %2168 }
 0x53a   : > { %v2232_v63 = vmul.f32 1.442695, %v2214_v57  ;;  %v2213_v22 = vsub.f32 %v7167_v35, %v2169_v21 }
 0x53c   : > { %5344 = vpow2.f32 %v2232_v63  ;;  %v2230_v31 = vmul.f32 1.442695, %v2213_v22 }
 0x53e   : > { %5346 = vpow2.f32 %v2230_v31 }
 0x53f   : > { %v2178_v32 = vpop.xlane.xlu1 %2177 }
 0x540   : > { %v2216_v33 = vsub.f32 %v7171_v42, %v2178_v32  ;;  %v7227_v37 = vpop.eup %5342 }
 0x541   : > { %v2175_v39 = vpop.xlane.xlu0 %2174  ;;  %v2260_v20 = vsel %vm2163_vm5, %v7227_v37, 0.0 }
 0x542   : > { %v2236_v38 = vmul.f32 1.442695, %v2216_v33  ;;  %v2215_v40 = vsub.f32 %v7175_v46, %v2175_v39  ;;  %2261 = vadd.xlane.f32.xlu1 %v2260_v20 }
 0x544   : > { %5348 = vpow2.f32 %v2236_v38  ;;  %v2234_v29 = vmul.f32 1.442695, %v2215_v40 }
 0x546   : > { %v7232_v41 = vpop.eup %5344  ;;  %5350 = vpow2.f32 %v2234_v29 }
 0x547   : > { %v2184_v35 = vpop.xlane.xlu1 %2183  ;;  %v2266_v45 = vsel %vm2163_vm5, %v7232_v41, 0.0 }
 0x548   : > { %v2218_v42 = vsub.f32 %v7179_v52, %v2184_v35  ;;  %2267 = vadd.xlane.f32.xlu1 %v2266_v45  ;;  %v7237_v47 = vpop.eup %5346 }
 0x549   : > { %v2181_v49 = vpop.xlane.xlu0 %2180  ;;  %v2263_v46 = vsel %vm2163_vm5, %v7237_v47, 0.0 }
 0x54a   : > { %v2240_v48 = vmul.f32 1.442695, %v2218_v42  ;;  %v2217_v50 = vsub.f32 %v7183_v56, %v2181_v49  ;;  %2264 = vadd.xlane.f32.xlu0 %v2263_v46 }
 0x54c   : > { %5352 = vpow2.f32 %v2240_v48  ;;  %v2238_v51 = vmul.f32 1.442695, %v2217_v50 }
 0x54e   : > { %v7242_v53 = vpop.eup %5348  ;;  %5354 = vpow2.f32 %v2238_v51 }
 0x54f   : > { %v2272_v54 = vsel %vm2163_vm5, %v7242_v53, 0.0 }
 0x550   : > { %2273 = vadd.xlane.f32.xlu1 %v2272_v54  ;;  %v7246_v52 = vpop.eup %5350 }
 0x551   : > { %v2187_v60 = vpop.xlane.xlu0 %2186  ;;  %v2269_v1 = vsel %vm2163_vm5, %v7246_v52, 0.0 }
 0x552   : > { %v2219_v4 = vsub.f32 %v7187_v7, %v2187_v60  ;;  %2270 = vadd.xlane.f32.xlu0 %v2269_v1 }
 0x554   : > { %v2242_v56 = vmul.f32 1.442695, %v2219_v4 }
 0x556   : > { %v7251_v5 = vpop.eup %5352  ;;  %5356 = vpow2.f32 %v2242_v56 }
 0x557   : > { %v2278_v8 = vsel %vm2163_vm5, %v7251_v5, 0.0 }
 0x558   : > { %2279 = vadd.xlane.f32.xlu1 %v2278_v8  ;;  %v7255_v9 = vpop.eup %5354 }
 0x559   : > { %v2275_v10 = vsel %vm2163_vm5, %v7255_v9, 0.0 }
 0x55a   : > { %2276 = vadd.xlane.f32.xlu0 %v2275_v10 }
 0x560   : > { %v7259_v11 = vpop.eup %5356 }
 0x561   : > { %v2281_v7 = vsel %vm2163_vm5, %v7259_v11, 0.0 }
 0x562   : > { %2282 = vadd.xlane.f32.xlu0 %v2281_v7 }
 0x5a2   : > { %v2193_v14 = vpop.xlane.xlu0 %2192  ;;  %v2190_v15 = vpop.xlane.xlu1 %2189 }
 0x5a3   : > { %v2221_v16 = vsub.f32 %v7193_v13, %v2193_v14  ;;  %v2220_v19 = vsub.f32 %v7191_v12, %v2190_v15 }
 0x5a5   : > { %v2246_v57 = vmul.f32 1.442695, %v2221_v16  ;;  %v2244_v63 = vmul.f32 1.442695, %v2220_v19  ;;  %v1332_v19 = vrot.slane %v6915_v58, 2 }
 0x5a7   : > { %5358 = vpow2.f32 %v2246_v57 }
 0x5a8   : > { %5360 = vpow2.f32 %v2244_v63 }
 0x5aa   : > { %v2199_v21 = vpop.xlane.xlu0 %2198  ;;  %v2196_v22 = vpop.xlane.xlu1 %2195 }
 0x5ab   : > { %v2223_v31 = vsub.f32 %v7201_v28, %v2199_v21  ;;  %v2222_v32 = vsub.f32 %v7199_v25, %v2196_v22  ;;  %v2374_v21 = vpack.c.bf16 %v1332_v19, %v1332_v19 }
 0x5ad   : > { %v2250_v33 = vmul.f32 1.442695, %v2223_v31  ;;  %v2248_v38 = vmul.f32 1.442695, %v2222_v32 }
 0x5af   : > { %5362 = vpow2.f32 %v2250_v33 }
 0x5b0   : > { %5364 = vpow2.f32 %v2248_v38  ;;  %v2486_v38 = vsel %vm2392_vm4, %v2374_v21, 0 }
 0x5b1   : > { %v7267_v39 = vpop.eup %5358 }
 0x5b2   : > { %v7269_v20 = vpop.eup %5360  ;;  %v2205_v13 = vpop.xlane.xlu0 %2204  ;;  %v2287_v40 = vsel %vm2163_vm5, %v7267_v39, 0.0 }
 0x5b3   : > { %v2202_v12 = vpop.xlane.xlu1 %2201  ;;  %v2225_v29 = vsub.f32 %v7209_v44, %v2205_v13  ;;  %2288 = vadd.xlane.f32.xlu0 %v2287_v40  ;;  %v2284_v25 = vsel %vm2163_vm5, %v7269_v20, 0.0  ;;  %v1333_v13 = vrot.slane %v6937_v3, 2 }
 0x5b4   : > { %v2224_v35 = vsub.f32 %v7207_v43, %v2202_v12  ;;  %2285 = vadd.xlane.f32.xlu1 %v2284_v25  ;;  %v1334_v12 = vrot.slane %v6920_v62, 2 }
 0x5b5   : > { %v2254_v28 = vmul.f32 1.442695, %v2225_v29  ;;  %v2375_v29 = vpack.c.bf16 %v1333_v13, %v1333_v13 }
 0x5b6   : > { %v2252_v45 = vmul.f32 1.442695, %v2224_v35  ;;  %v2376_v35 = vpack.c.bf16 %v1334_v12, %v1334_v12 }
 0x5b7   : > { %5366 = vpow2.f32 %v2254_v28 }
 0x5b8   : > { %5368 = vpow2.f32 %v2252_v45 }
 0x5b9   : > { %v7277_v42 = vpop.eup %5362 }
 0x5ba   : > { %v7279_v48 = vpop.eup %5364  ;;  %v2211_v49 = vpop.xlane.xlu0 %2210  ;;  %v2293_v44 = vsel %vm2163_vm5, %v7277_v42, 0.0 }
 0x5bb   : > { %v2208_v46 = vpop.xlane.xlu1 %2207  ;;  %v2227_v43 = vsub.f32 %v7217_v59, %v2211_v49  ;;  %2294 = vadd.xlane.f32.xlu0 %v2293_v44  ;;  %v2290_v51 = vsel %vm2163_vm5, %v7279_v48, 0.0  ;;  %v2532_v49 = vsel %vm2392_vm4, %v2375_v29, 0 }
 0x5bc   : > { %v2226_v50 = vsub.f32 %v7215_v55, %v2208_v46  ;;  %2291 = vadd.xlane.f32.xlu1 %v2290_v51  ;;  %v1335_v46 = vrot.slane %v6933_v2, 2 }
 0x5bd   : > { %v2258_v54 = vmul.f32 1.442695, %v2227_v43 }
 0x5be   : > { %v2256_v60 = vmul.f32 1.442695, %v2226_v50  ;;  %v2377_v50 = vpack.c.bf16 %v1335_v46, %v1335_v46 }
 0x5bf   : > { %5370 = vpow2.f32 %v2258_v54 }
 0x5c0   : > { %5372 = vpow2.f32 %v2256_v60 }
 0x5c1   : > { %v7287_v1 = vpop.eup %5366 }
 0x5c2   : > { %v7289_v4 = vpop.eup %5368  ;;  %v2299_v56 = vsel %vm2163_vm5, %v7287_v1, 0.0 }
 0x5c3   : > { %2300 = vadd.xlane.f32.xlu0 %v2299_v56  ;;  %v2296_v55 = vsel %vm2163_vm5, %v7289_v4, 0.0 }
 0x5c4   : > { %2297 = vadd.xlane.f32.xlu1 %v2296_v55  ;;  %v2624_v55 = vsel %vm2392_vm4, %v2377_v50, 0 }
 0x5c9   : > { %v7295_v59 = vpop.eup %5370 }
 0x5ca   : > { %v7297_v8 = vpop.eup %5372  ;;  %v2305_v10 = vsel %vm2163_vm5, %v7295_v59, 0.0 }
 0x5cb   : > { %2306 = vadd.xlane.f32.xlu0 %v2305_v10  ;;  %v2302_v7 = vsel %vm2163_vm5, %v7297_v8, 0.0 }
 0x5cc   : > { %2303 = vadd.xlane.f32.xlu1 %v2302_v7  ;;  %v1337_v7 = vrot.slane %v6945_v6, 2 }
 0x5ce   : > { %v2379_v6 = vpack.c.bf16 %v1337_v7, %v1337_v7 }
 0x5cf   : > { %v2262_v14 = vpop.xlane.xlu1 %2261 }
 0x5d0   : > { %5374 = vrcp.f32 %v2262_v14 }
 0x5d5   : > { %v2268_v15 = vpop.xlane.xlu1 %2267 }
 0x5d6   : > { %5376 = vrcp.f32 %v2268_v15 }
 0x5d7   : > { %v2265_v16 = vpop.xlane.xlu0 %2264 }
 0x5d8   : > { %5378 = vrcp.f32 %v2265_v16 }
 0x5da   : > { %v5375_v57 = vpop.eup %5374 }
 0x5db   : > { %v2340_v63 = vmul.f32 %v5375_v57, %v7227_v37  ;;  %v1347_v57 = vrot.slane %v6995_v17, 2 }
 0x5dd   : > { %v2274_v22 = vpop.xlane.xlu1 %2273  ;;  %v2356_v31 = vpack.c.bf16 %v2340_v63, %v2340_v63  ;;  %v2381_v17 = vpack.c.bf16 %v1347_v57, %v1347_v57 }
 0x5de   : > { %5380 = vrcp.f32 %v2274_v22 }
 0x5df   : > { %v2271_v33 = vpop.xlane.xlu0 %2270  ;;  %4930 = vmatmul.mubr.msk.bf16.vlgmr.msra.gmra.mrb[28].mxu0 %vm2388_vm6, %v2356_v31  ;;  %v2808_v31 = vsel %vm2392_vm4, %v2381_v17, 0 }
 0x5e0   : > { %v5377_v32 = vpop.eup %5376  ;;  %5382 = vrcp.f32 %v2271_v33  ;;  %4940 = vmatpush3.bf16.msra.mxu0 %v2486_v38  ;;  %4941 = vmatprep.mubr.msk.bf16.mxu0 %vm6144_vm2, %v6142_v61  ;;  %v1349_v38 = vrot.slane %v7007_v23, 2 }
 0x5e1   : > { %v2342_v58 = vmul.f32 %v5377_v32, %v7232_v41  ;;  %4951 = vmatprep.subr.bf16.mxu0 %v6142_v61  ;;  %v2578_v41 = vsel %vm2392_vm4, %v2376_v35, 0 }
 0x5e2   : > { %v5379_v37 = vpop.eup %5378 }
 0x5e3   : > { %v2341_v40 = vmul.f32 %v5379_v37, %v7237_v47  ;;  %v2358_v3 = vpack.c.bf16 %v2342_v58, %v2342_v58  ;;  %v1336_v47 = vrot.slane %v6927_v0, 2 }
 0x5e5   : > { %v2280_v25 = vpop.xlane.xlu1 %2279  ;;  %v2357_v28 = vpack.c.bf16 %v2341_v40, %v2341_v40  ;;  %v2378_v0 = vpack.c.bf16 %v1336_v47, %v1336_v47  ;;  %v2383_v40 = vpack.c.bf16 %v1349_v38, %v1349_v38 }
 0x5e6   : > { %5384 = vrcp.f32 %v2280_v25 }
 0x5e7   : > { %v2277_v62 = vpop.xlane.xlu0 %2276  ;;  %4936 = vmatmul.mubr.msk.bf16.vlgmr.msra.gmra.mrb[40].mxu1 %vm2388_vm6, %v2357_v28  ;;  %4942 = vmatmul.mubr.msk.bf16.vlgmr.msra.gmra.mrb[32].mxu0 %vm2388_vm6, %v2358_v3  ;;  %v2670_v10 = vsel %vm2392_vm4, %v2378_v0, 0  ;;  %v2900_v23 = vsel %vm2392_vm4, %v2383_v40, 0 }
 0x5e8   : > { %v5381_v45 = vpop.eup %5380  ;;  %5386 = vrcp.f32 %v2277_v62  ;;  %4946 = vmatpush3.bf16.msra.mxu1 %v2532_v49  ;;  %4952 = vmatpush3.bf16.msra.mxu0 %v2578_v41 }
 0x5e9   : > { %v2344_v44 = vmul.f32 %v5381_v45, %v7242_v53  ;;  %4947 = vmatprep.mubr.msk.bf16.mxu1 %vm6144_vm2, %v6142_v61  ;;  %4953 = vmatprep.mubr.msk.bf16.mxu0 %vm6144_vm2, %v6142_v61  ;;  %v1346_v53 = vrot.slane %v6997_v18, 2  ;;  %v1351_v45 = vrot.slane %v7025_v30, 2 }
 0x5ea   : > { %v5383_v43 = vpop.eup %5382  ;;  %4957 = vmatprep.subr.bf16.mxu1 %v6142_v61  ;;  %4963 = vmatprep.subr.bf16.mxu0 %v6142_v61 }
 0x5eb   : > { %v2343_v2 = vmul.f32 %v5383_v43, %v7246_v52  ;;  %v2360_v54 = vpack.c.bf16 %v2344_v44, %v2344_v44  ;;  %v2380_v14 = vpack.c.bf16 %v1346_v53, %v1346_v53 }
 0x5ed   : > { %v2359_v51 = vpack.c.bf16 %v2343_v2, %v2343_v2  ;;  %v2762_v63 = vsel %vm2392_vm4, %v2380_v14, 0  ;;  %v1353_v2 = vrot.slane %v7043_v36, 2 }
 0x5ef   : > { %v2283_v56 = vpop.xlane.xlu0 %2282  ;;  %4948 = vmatmul.mubr.msk.bf16.vlgmr.msra.gmra.mrb[44].mxu1 %vm2388_vm6, %v2359_v51  ;;  %4954 = vmatmul.mubr.msk.bf16.vlgmr.msra.gmra.mrb[36].mxu0 %vm2388_vm6, %v2360_v54  ;;  %v1352_v51 = vrot.slane %v7037_v34, 2  ;;  %v2387_v34 = vpack.c.bf16 %v1353_v2, %v1353_v2 }
 0x5f0   : > { %v5385_v60 = vpop.eup %5384  ;;  %5388 = vrcp.f32 %v2283_v56  ;;  %4958 = vmatpush3.bf16.msra.mxu1 %v2624_v55  ;;  %4964 = vmatpush3.bf16.msra.mxu0 %v2670_v10 }
 0x5f1   : > { %v2346_v52 = vmul.f32 %v5385_v60, %v7251_v5  ;;  %4959 = vmatprep.mubr.msk.bf16.mxu1 %vm6144_vm2, %v6142_v61  ;;  %4965 = vmatprep.mubr.msk.bf16.mxu0 %vm6144_vm2, %v6142_v61  ;;  %v2716_v5 = vsel %vm2392_vm4, %v2379_v6, 0  ;;  %v2386_v53 = vpack.c.bf16 %v1352_v51, %v1352_v51  ;;  %v3084_v7 = vsel %vm2392_vm4, %v2387_v34, 0 }
 0x5f2   : > { %v5387_v18 = vpop.eup %5386  ;;  %4969 = vmatprep.subr.bf16.mxu1 %v6142_v61  ;;  %4975 = vmatprep.subr.bf16.mxu0 %v6142_v61 }
 0x5f3   : > { %v2345_v15 = vmul.f32 %v5387_v18, %v7255_v9  ;;  %v2362_v19 = vpack.c.bf16 %v2346_v52, %v2346_v52  ;;  %v3038_v52 = vsel %vm2392_vm4, %v2386_v53, 0 }
 0x5f5   : > { %v2361_v16 = vpack.c.bf16 %v2345_v15, %v2345_v15 }
 0x5f7   : > { %4960 = vmatmul.mubr.msk.bf16.vlgmr.msra.gmra.mrb[48].mxu1 %vm2388_vm6, %v2361_v16  ;;  %4966 = vmatmul.mubr.msk.bf16.vlgmr.msra.gmra.mrb[40].mxu0 %vm2388_vm6, %v2362_v19 }
 0x5f8   : > { %4970 = vmatpush3.bf16.msra.mxu1 %v2716_v5  ;;  %4976 = vmatpush3.bf16.msra.mxu0 %v2762_v63 }
 0x5f9   : > { %4971 = vmatprep.mubr.msk.bf16.mxu1 %vm6144_vm2, %v6142_v61  ;;  %4981 = vmatprep.subr.bf16.mxu1 %v6142_v61 }
 0x5fa   : > { %v5389_v9 = vpop.eup %5388  ;;  %4977 = vmatprep.mubr.msk.bf16.mxu0 %vm6144_vm2, %v6142_v61  ;;  %4987 = vmatprep.subr.bf16.mxu0 %v6142_v61 }
 0x5fb   : > { %v2347_v21 = vmul.f32 %v5389_v9, %v7259_v11  ;;  %v1348_v11 = vrot.slane %v7009_v24, 2  ;;  %v1350_v24 = vrot.slane %v7015_v27, 2  ;;  %v2385_v27 = vpack.c.bf16 %v1351_v45, %v1351_v45 }
 0x5fd   : > { %v2363_v22 = vpack.c.bf16 %v2347_v21, %v2347_v21  ;;  %v2382_v35 = vpack.c.bf16 %v1348_v11, %v1348_v11  ;;  %v2384_v46 = vpack.c.bf16 %v1350_v24, %v1350_v24  ;;  %v2992_v0 = vsel %vm2392_vm4, %v2385_v27, 0 }
 0x5ff   : > { %4972 = vmatmul.mubr.msk.bf16.vlgmr.msra.gmra.mrb[52].mxu1 %vm2388_vm6, %v2363_v22  ;;  %v2854_v49 = vsel %vm2392_vm4, %v2382_v35, 0 }
 0x600   : > { %4982 = vmatpush3.bf16.msra.mxu1 %v2808_v31  ;;  %4983 = vmatprep.mubr.msk.bf16.mxu1 %vm6144_vm2, %v6142_v61 }
 0x601   : > { %4993 = vmatprep.subr.bf16.mxu1 %v6142_v61 }
 0x640   : > { %v2289_v32 = vpop.xlane.xlu0 %2288 }
 0x641   : > { %5390 = vrcp.f32 %v2289_v32  ;;  %v2286_v33 = vpop.xlane.xlu1 %2285 }
 0x642   : > { %5392 = vrcp.f32 %v2286_v33 }
 0x648   : > { %v2295_v13 = vpop.xlane.xlu0 %2294 }
 0x649   : > { %5394 = vrcp.f32 %v2295_v13  ;;  %v2292_v12 = vpop.xlane.xlu1 %2291 }
 0x64a   : > { %5396 = vrcp.f32 %v2292_v12 }
 0x64b   : > { %v5391_v58 = vpop.eup %5390 }
 0x64c   : > { %v5393_v37 = vpop.eup %5392  ;;  %v2349_v29 = vmul.f32 %v5391_v58, %v7267_v39 }
 0x64d   : > { %v2348_v25 = vmul.f32 %v5393_v37, %v7269_v20 }
 0x64e   : > { %v2365_v28 = vpack.c.bf16 %v2349_v29, %v2349_v29 }
 0x64f   : > { %v2364_v3 = vpack.c.bf16 %v2348_v25, %v2348_v25 }
 0x650   : > { %v2301_v62 = vpop.xlane.xlu0 %2300  ;;  %4984 = vmatmul.mubr.msk.bf16.vlgmr.msra.gmra.mrb[56].mxu1 %vm2388_vm6, %v2365_v28 }
 0x651   : > { %5398 = vrcp.f32 %v2301_v62  ;;  %4978 = vmatmul.mubr.msk.bf16.vlgmr.msra.gmra.mrb[44].mxu0 %vm2388_vm6, %v2364_v3  ;;  %v2298_v39 = vpop.xlane.xlu1 %2297  ;;  %4994 = vmatpush3.bf16.msra.mxu1 %v2900_v23 }
 0x652   : > { %4988 = vmatpush3.bf16.msra.mxu0 %v2854_v49  ;;  %5400 = vrcp.f32 %v2298_v39  ;;  %4989 = vmatprep.mubr.msk.bf16.mxu0 %vm6144_vm2, %v6142_v61 }
 0x653   : > { %v5395_v30 = vpop.eup %5394  ;;  %4995 = vmatprep.mubr.msk.bf16.mxu1 %vm6144_vm2, %v6142_v61  ;;  %4999 = vmatprep.subr.bf16.mxu0 %v6142_v61 }
 0x654   : > { %v5397_v20 = vpop.eup %5396  ;;  %v2351_v41 = vmul.f32 %v5395_v30, %v7277_v42  ;;  %5005 = vmatprep.subr.bf16.mxu1 %v6142_v61  ;;  %v2946_v42 = vsel %vm2392_vm4, %v2384_v46, 0 }
 0x655   : > { %v2350_v47 = vmul.f32 %v5397_v20, %v7279_v48 }
 0x656   : > { %v2367_v44 = vpack.c.bf16 %v2351_v41, %v2351_v41 }
 0x657   : > { %v2366_v43 = vpack.c.bf16 %v2350_v47, %v2350_v47 }
 0x658   : > { %v2307_v50 = vpop.xlane.xlu0 %2306  ;;  %4996 = vmatmul.mubr.msk.bf16.vlgmr.msra.gmra.mrb[60].mxu1 %vm2388_vm6, %v2367_v44 }
 0x659   : > { %5402 = vrcp.f32 %v2307_v50  ;;  %4990 = vmatmul.mubr.msk.bf16.vlgmr.msra.gmra.mrb[48].mxu0 %vm2388_vm6, %v2366_v43  ;;  %v2304_v54 = vpop.xlane.xlu1 %2303  ;;  %5006 = vmatpush3.bf16.msra.mxu1 %v2992_v0  ;;  %v5326_v50 = vld [vmem:[%s6845_s7] sm:$0xff]  }
 0x65a   : > { %5000 = vmatpush3.bf16.msra.mxu0 %v2946_v42  ;;  %5404 = vrcp.f32 %v2304_v54  ;;  %5001 = vmatprep.mubr.msk.bf16.mxu0 %vm6144_vm2, %v6142_v61 }
 0x65b   : > { %v5399_v36 = vpop.eup %5398  ;;  %5007 = vmatprep.mubr.msk.bf16.mxu1 %vm6144_vm2, %v6142_v61  ;;  %5011 = vmatprep.subr.bf16.mxu0 %v6142_v61 }
 0x65c   : > { %v5401_v48 = vpop.eup %5400  ;;  %v2353_v60 = vmul.f32 %v5399_v36, %v7287_v1  ;;  %5017 = vmatprep.subr.bf16.mxu1 %v6142_v61  ;;  %v5327_v36 = vld [vmem:[%s6845_s7 + $0x8] sm:$0xff]  }
 0x65d   : > { %v2352_v56 = vmul.f32 %v5401_v48, %v7289_v4 }
 0x65e   : > { %v2369_v55 = vpack.c.bf16 %v2353_v60, %v2353_v60 }
 0x65f   : > { %v2368_v10 = vpack.c.bf16 %v2352_v56, %v2352_v56  ;;  %v5328_v56 = vld [vmem:[%s6845_s7 + $0x10] sm:$0xff]  }
 0x660   : > { %5008 = vmatmul.mubr.msk.bf16.vlgmr.msra.gmra.mrb[64].mxu1 %vm2388_vm6, %v2369_v55 }
 0x661   : > { %5002 = vmatmul.mubr.msk.bf16.vlgmr.msra.gmra.mrb[52].mxu0 %vm2388_vm6, %v2368_v10  ;;  %5018 = vmatpush3.bf16.msra.mxu1 %v3084_v7 }
 0x662   : > { %5012 = vmatpush3.bf16.msra.mxu0 %v3038_v52  ;;  %5013 = vmatprep.mubr.msk.bf16.mxu0 %vm6144_vm2, %v6142_v61 }
 0x663   : > { %v5403_v1 = vpop.eup %5402  ;;  %5019 = vmatprep.mubr.msk.bf16.mxu1 %vm6144_vm2, %v6142_v61  ;;  %5023 = vmatprep.subr.bf16.mxu0 %v6142_v61 }
 0x664   : > { %v5405_v4 = vpop.eup %5404  ;;  %v2355_v18 = vmul.f32 %v5403_v1, %v7295_v59  ;;  %5035 = vmatprep.subr.bf16.mxu1 %v6142_v61 }
 0x665   : > { %v2354_v14 = vmul.f32 %v5405_v4, %v7297_v8 }
 0x666   : > { %v2371_v15 = vpack.c.bf16 %v2355_v18, %v2355_v18 }
 0x667   : > { %v2370_v6 = vpack.c.bf16 %v2354_v14, %v2354_v14  ;;  %v5329_v14 = vld [vmem:[%s6845_s7 + $0x18] sm:$0xff]  }
 0x668   : > { %5020 = vmatmul.mubr.msk.bf16.vlgmr.msra.gmra.mrb[68].mxu1 %vm2388_vm6, %v2371_v15 }
 0x669   : > { %5014 = vmatmul.mubr.msk.bf16.vlgmr.msra.gmra.mrb[56].mxu0 %vm2388_vm6, %v2370_v6  ;;  %5043 = vmatprep.mubr.msk.bf16.mxu1 %vm6144_vm2, %v6142_v61 }
 0x66a   : > { %5031 = vmatprep.mubr.msk.bf16.mxu0 %vm6144_vm2, %v6142_v61  ;;  %5024 = vmatpush3.bf16.msra.mxu0 %v5326_v50 }
 0x66b   : > { %5025 = vmatprep.subr.bf16.mxu0 %v6142_v61 }
 0x66e   : > { %5026 = vmatpush3.bf16.msra.mxu0 %v5327_v36 }
 0x66f   : > { %5027 = vmatprep.subr.bf16.mxu0 %v6142_v61 }
 0x672   : > { %5028 = vmatpush3.bf16.msra.mxu0 %v5328_v56  ;;  %v5440_v56 = vld [vmem:[#allocation2 + $0x4] sm:$0x3] }
 0x673   : > { %5029 = vmatprep.subr.bf16.mxu0 %v6142_v61 }
 0x676   : > { %5030 = vmatpush3.bf16.msra.mxu0 %v5329_v14  ;;  %v5442_v14 = vld [vmem:[#allocation2 + $0x6] sm:$0x3] }
 0x677   : > { %5047 = vmatprep.subr.bf16.mxu0 %v6142_v61 }
 0x6b2   : > { %v7409_v16 = vpop.f32.mrb[28].mxu0 }
 0x6b3   : > { %v4931_v19 = vpop.f32.mrb[29].mxu0 }
 0x6b4   : > { %v2433_v59 = vpop.f32.mrb[30].mxu0 }
 0x6b5   : > { %v4932_v57 = vpop.f32.mrb[31].mxu0 }
 0x6ba   : > { %v7411_v5 = vpop.f32.mrb[40].mxu1  ;;  %v7413_v8 = vpop.f32.mrb[32].mxu0 }
 0x6bb   : > { %v4937_v63 = vpop.f32.mrb[41].mxu1  ;;  %v4943_v9 = vpop.f32.mrb[33].mxu0 }
 0x6bc   : > { %v2479_v17 = vpop.f32.mrb[42].mxu1  ;;  %v2525_v21 = vpop.f32.mrb[34].mxu0 }
 0x6bd   : > { %v4938_v22 = vpop.f32.mrb[43].mxu1  ;;  %v4944_v31 = vpop.f32.mrb[35].mxu0 }
 0x6c2   : > { %v7415_v32 = vpop.f32.mrb[44].mxu1  ;;  %v7417_v33 = vpop.f32.mrb[36].mxu0 }
 0x6c3   : > { %v4949_v38 = vpop.f32.mrb[45].mxu1  ;;  %v4955_v13 = vpop.f32.mrb[37].mxu0 }
 0x6c4   : > { %v2571_v11 = vpop.f32.mrb[46].mxu1  ;;  %v2617_v12 = vpop.f32.mrb[38].mxu0 }
 0x6c5   : > { %v4950_v58 = vpop.f32.mrb[47].mxu1  ;;  %v4956_v37 = vpop.f32.mrb[39].mxu0 }
 0x6ca   : > { %v7419_v40 = vpop.f32.mrb[48].mxu1  ;;  %v7421_v29 = vpop.f32.mrb[40].mxu0 }
 0x6cb   : > { %v4961_v35 = vpop.f32.mrb[49].mxu1  ;;  %v4967_v25 = vpop.f32.mrb[41].mxu0 }
 0x6cc   : > { %v2663_v28 = vpop.f32.mrb[50].mxu1  ;;  %v2709_v3 = vpop.f32.mrb[42].mxu0 }
 0x6cd   : > { %v4962_v45 = vpop.f32.mrb[51].mxu1  ;;  %v4968_v62 = vpop.f32.mrb[43].mxu0 }
 0x6d2   : > { %v7423_v23 = vpop.f32.mrb[52].mxu1 }
 0x6d3   : > { %v4973_v24 = vpop.f32.mrb[53].mxu1 }
 0x6d4   : > { %v2755_v49 = vpop.f32.mrb[54].mxu1 }
 0x6d5   : > { %v4974_v39 = vpop.f32.mrb[55].mxu1 }
 0x723   : > { %v2844_v30 = vpop.f32.mrb[56].mxu1 }
 0x724   : > { %v2798_v20 = vpop.f32.mrb[44].mxu0  ;;  %3136 = vrot.lane.b32.xlu0 %v2844_v30, %s6146_s1  ;;  %v4985_v27 = vpop.f32.mrb[57].mxu1 }
 0x725   : > { %3134 = vrot.lane.b32.xlu1 %v2798_v20, %s6146_s1  ;;  %v4979_v41 = vpop.f32.mrb[45].mxu0  ;;  %v2847_v46 = vpop.f32.mrb[58].mxu1 }
 0x726   : > { %v2801_v47 = vpop.f32.mrb[46].mxu0  ;;  %v4986_v44 = vpop.f32.mrb[59].mxu1 }
 0x727   : > { %v4980_v43 = vpop.f32.mrb[47].mxu0 }
 0x72b   : > { %v2936_v2 = vpop.f32.mrb[60].mxu1 }
 0x72c   : > { %v2890_v0 = vpop.f32.mrb[48].mxu0  ;;  %v4997_v51 = vpop.f32.mrb[61].mxu1 }
 0x72d   : > { %3138 = vrot.lane.b32.xlu1 %v2890_v0, %s6146_s1  ;;  %v4991_v42 = vpop.f32.mrb[49].mxu0  ;;  %v2939_v54 = vpop.f32.mrb[62].mxu1 }
 0x72e   : > { %v2893_v48 = vpop.f32.mrb[50].mxu0  ;;  %v4998_v34 = vpop.f32.mrb[63].mxu1  ;;  %v5438_v42 = vld [vmem:[#allocation2] sm:$0x3] }
 0x72f   : > { %v4992_v60 = vpop.f32.mrb[51].mxu0 }
 0x730   : > { %v5439_v60 = vld [vmem:[#allocation2 + $0x2] sm:$0x3] }
 0x731   : > { %3140 = vrot.lane.b32.xlu1 %v2936_v2, %s6146_s1 }
 0x733   : > { %v3028_v53 = vpop.f32.mrb[64].mxu1 }
 0x734   : > { %v2982_v55 = vpop.f32.mrb[52].mxu0  ;;  %v5009_v10 = vpop.f32.mrb[65].mxu1 }
 0x735   : > { %v5003_v7 = vpop.f32.mrb[53].mxu0  ;;  %3142 = vrot.lane.b32.xlu0 %v2982_v55, %s6146_s1  ;;  %3144 = vrot.lane.b32.xlu1 %v3028_v53, %s6146_s1  ;;  %v3031_v52 = vpop.f32.mrb[66].mxu1 }
 0x736   : > { %v2985_v1 = vpop.f32.mrb[54].mxu0  ;;  %v5010_v4 = vpop.f32.mrb[67].mxu1  ;;  %v5441_v52 = vld [vmem:[#allocation2 + $0x8] sm:$0x3] }
 0x737   : > { %v5004_v18 = vpop.f32.mrb[55].mxu0 }
 0x73b   : > { %v3120_v15 = vpop.f32.mrb[68].mxu1 }
 0x73c   : > { %v3074_v6 = vpop.f32.mrb[56].mxu0  ;;  %3148 = vrot.lane.b32.xlu1 %v3120_v15, %s6146_s1  ;;  %v5021_v19 = vpop.f32.mrb[69].mxu1 }
 0x73d   : > { %v5015_v59 = vpop.f32.mrb[57].mxu0  ;;  %3146 = vrot.lane.b32.xlu0 %v3074_v6, %s6146_s1  ;;  %v3123_v57 = vpop.f32.mrb[70].mxu1 }
 0x73e   : > { %v3077_v63 = vpop.f32.mrb[58].mxu0  ;;  %v5022_v9 = vpop.f32.mrb[71].mxu1  ;;  %v5443_v59 = vld [vmem:[#allocation2 + $0xc] sm:$0x3] }
 0x73f   : > { %v5016_v17 = vpop.f32.mrb[59].mxu0  ;;  %v5444_v9 = vld [vmem:[#allocation2 + $0xa] sm:$0x3] }
 0x796   : > { %v3137_v21 = vpop.permute.xlu0 %3136 }
 0x797   : > { %v3135_v22 = vpop.permute.xlu1 %3134  ;;  %v3159_v31 = vsel %vm1381_vm3, %v7411_v5, %v3137_v21 }
 0x798   : > { %v3158_v38 = vsel %vm1381_vm3, %v7409_v16, %v3135_v22 }
 0x799   : > { %v3174_v13 = vcombine.low %v3158_v38, %v3159_v31  ;;  %v5445_v38 = vld [vmem:[#allocation2 + $0xe] sm:$0x3] }
 0x79b   : > { %v3182_v25 = vrot.slane %v3174_v13, %v6901_v26 }
 0x79f   : > { %v3139_v11 = vpop.permute.xlu1 %3138 }
 0x7a0   : > { %v3160_v58 = vsel %vm1381_vm3, %v7413_v8, %v3139_v11 }
 0x7a3   : > { %v3141_v12 = vpop.permute.xlu1 %3140 }
 0x7a4   : > { %v3161_v37 = vsel %vm1381_vm3, %v7415_v32, %v3141_v12 }
 0x7a5   : > { %v3175_v35 = vcombine.low %v3160_v58, %v3161_v37 }
 0x7a7   : > { %v3189_v28 = vrot.slane %v3175_v35, %v6901_v26  ;;  %v3143_v3 = vpop.permute.xlu0 %3142  ;;  %v3145_v45 = vpop.permute.xlu1 %3144 }
 0x7a8   : > { %v3162_v16 = vsel %vm1381_vm3, %v7417_v33, %v3143_v3  ;;  %v3163_v5 = vsel %vm1381_vm3, %v7419_v40, %v3145_v45  ;;  %v4691_v40 = vld [vmem:[%s883_s22] ss:$0 sm:$0xff] }
 0x7a9   : > { %v3190_v62 = vcombine.low %v3182_v25, %v3189_v28  ;;  %v3191_v24 = vcombine.low %v3162_v16, %v3163_v5 }
 0x7ab   : > { %v3199_v20 = vrot.slane %v3191_v24, %v6901_v26 }
 0x7ae   : > { %v3149_v8 = vpop.permute.xlu1 %3148 }
 0x7af   : > { %v3147_v49 = vpop.permute.xlu0 %3146  ;;  %v3165_v32 = vsel %vm1381_vm3, %v7423_v23, %v3149_v8 }
 0x7b0   : > { %v3164_v39 = vsel %vm1381_vm3, %v7421_v29, %v3147_v49 }
 0x7b1   : > { %v3192_v30 = vcombine.low %v3164_v39, %v3165_v32 }
 0x7b3   : > { %v3206_v27 = vrot.slane %v3192_v30, %v6901_v26 }
 0x7b5   : > { %v3207_v41 = vcombine.low %v3199_v20, %v3206_v27 }
 0x7b7   : > { %v3210_v33 = vpack.c.bf16 %v3207_v41, %v3190_v62 }
 0x7b9   : > { %5032 = vmatmul.mubr.msk.bf16.vlgmr.msra.gmra.mrb[60].mxu0 %vm1211_vm1, %v3210_v33 }
 0x7ba   : > { %5063 = vmatprep.mubr.msk.bf16.mxu0 %vm6144_vm2, %v6142_v61 }
 0x88c   : > { %v3278_v46 = vpop.f32.mrb[60].mxu0 }
 0x88d   : > { %v3279_v47 = vadd.f32 %v4691_v40, %v3278_v46  ;;  %v5033_v23 = vpop.f32.mrb[61].mxu0 }
 0x88e   : > { %v3281_v44 = vpop.f32.mrb[62].mxu0 }
 0x88f   : > { %v3287_v43 = vcombine.high %v3279_v47, %v3279_v47  ;;  %v3294_v29 = vrot.slane %v3279_v47, %v6901_v26  ;;  %v3282_v2 = vadd.f32 %v4691_v40, %v3281_v44  ;;  %v5034_v50 = vpop.f32.mrb[63].mxu0 }
 0x891   : > { %v3304_v0 = vcombine.high %v3282_v2, %v3282_v2  ;;  %v3311_v51 = vrot.slane %v3282_v2, %v6901_v26  ;;  %v3329_v54 = vadd.f32 %v5438_v42, %v3294_v29  ;;  %v3302_v36 = vcombine.high %v3294_v29, %v3294_v29 }
 0x892   : > { %v3301_v48 = vrot.slane %v3287_v43, %v6901_v26 }
 0x893   : > { %v3340_v34 = vsel %vm3339_vm7, %v3329_v54, 0.0  ;;  %v3330_v53 = vadd.f32 %v5439_v60, %v3302_v36  ;;  %v3333_v1 = vadd.f32 %v5441_v52, %v3311_v51  ;;  %v3318_v4 = vrot.slane %v3304_v0, %v6901_v26  ;;  %v5333_v52 = vld [vmem:[%s6867_s25 + $0x18] sm:$0xff]  }
 0x894   : > { %3341 = vadd.xlane.f32.xlu0 %v3340_v34  ;;  %v3331_v55 = vadd.f32 %v5440_v56, %v3301_v48  ;;  %v3303_v10 = vcombine.high %v3301_v48, %v3301_v48  ;;  %v3319_v6 = vcombine.high %v3311_v51, %v3311_v51 }
 0x895   : > { %v3343_v7 = vsel %vm3339_vm7, %v3330_v53, 0.0  ;;  %v3352_v19 = vsel %vm3339_vm7, %v3333_v1, 0.0  ;;  %v3335_v57 = vadd.f32 %v5443_v59, %v3318_v4  ;;  %v3320_v21 = vcombine.high %v3318_v4, %v3318_v4  ;;  %v5335_v4 = vld [vmem:[%s6875_s27 + $0x8] sm:$0xff]  }
 0x896   : > { %3344 = vadd.xlane.f32.xlu1 %v3343_v7  ;;  %v3346_v18 = vsel %vm3339_vm7, %v3331_v55, 0.0  ;;  %v3332_v15 = vadd.f32 %v5442_v14, %v3303_v10  ;;  %v3334_v17 = vadd.f32 %v5444_v9, %v3319_v6  ;;  %v5331_v10 = vld [vmem:[%s6867_s25 + $0x8] sm:$0xff]   ;;  %v5332_v7 = vld [vmem:[%s6867_s25 + $0x10] sm:$0xff]   ;;  %v5337_v14 = vld [vmem:[%s6875_s27 + $0x18] sm:$0xff]  }
 0x897   : > { %v3358_v22 = vsel %vm3339_vm7, %v3335_v57, 0.0  ;;  %v3336_v13 = vadd.f32 %v5445_v38, %v3320_v21  ;;  %v5339_v6 = vld [vmem:[%s6875_s27 + $0x28] sm:$0xff]  }
 0x898   : > { %3347 = vadd.xlane.f32.xlu0 %v3346_v18  ;;  %v3349_v63 = vsel %vm3339_vm7, %v3332_v15, 0.0  ;;  %v3355_v31 = vsel %vm3339_vm7, %v3334_v17, 0.0  ;;  %v5336_v18 = vld [vmem:[%s6875_s27 + $0x10] sm:$0xff]  }
 0x899   : > { %v3361_v11 = vsel %vm3339_vm7, %v3336_v13, 0.0 }
 0x89a   : > { %3353 = vadd.xlane.f32.xlu1 %v3352_v19 }
 0x89c   : > { %3350 = vadd.xlane.f32.xlu0 %v3349_v63 }
 0x89e   : > { %3359 = vadd.xlane.f32.xlu1 %v3358_v22 }
 0x8a0   : > { %3356 = vadd.xlane.f32.xlu0 %v3355_v31 }
 0x8a4   : > { %3362 = vadd.xlane.f32.xlu0 %v3361_v11 }
 0x921   : > { %v3342_v12 = vpop.xlane.xlu0 %3341 }
 0x922   : > { %v3365_v58 = vmul.f32 0.015625, %v3342_v12 }
 0x923   : > { %v3345_v37 = vpop.xlane.xlu1 %3344 }
 0x924   : > { %v7478_v35 = vsub.f32 %v3329_v54, %v3365_v58  ;;  %v3366_v25 = vmul.f32 0.015625, %v3345_v37 }
 0x925   : > { %v3348_v28 = vpop.xlane.xlu0 %3347 }
 0x926   : > { %v7480_v3 = vsub.f32 %v3330_v53, %v3366_v25  ;;  %v3367_v45 = vmul.f32 0.015625, %v3348_v28  ;;  %v3381_v16 = vmul.f32 %v7478_v35, %v7478_v35 }
 0x927   : > { %v3354_v5 = vpop.xlane.xlu1 %3353 }
 0x928   : > { %v7484_v62 = vsub.f32 %v3331_v55, %v3367_v45  ;;  %v3369_v24 = vmul.f32 0.015625, %v3354_v5  ;;  %v3389_v8 = vsel %vm3339_vm7, %v3381_v16, 0.0  ;;  %v3382_v49 = vmul.f32 %v7480_v3, %v7480_v3  ;;  %v5330_v55 = vld [vmem:[%s6867_s25] sm:$0xff]  }
 0x929   : > { %v3351_v32 = vpop.xlane.xlu0 %3350  ;;  %3390 = vadd.xlane.f32.xlu1 %v3389_v8  ;;  %5036 = vmatpush3.bf16.msra.mxu1 %v5330_v55 }
 0x92a   : > { %v7489_v39 = vsub.f32 %v3333_v1, %v3369_v24  ;;  %v3368_v30 = vmul.f32 0.015625, %v3351_v32  ;;  %v3392_v20 = vsel %vm3339_vm7, %v3382_v49, 0.0  ;;  %v3383_v27 = vmul.f32 %v7484_v62, %v7484_v62  ;;  %5037 = vmatprep.subr.bf16.mxu1 %v6142_v61  ;;  %v5334_v1 = vld [vmem:[%s6875_s27] sm:$0xff]  }
 0x92b   : > { %v3360_v41 = vpop.xlane.xlu1 %3359  ;;  %3393 = vadd.xlane.f32.xlu0 %v3392_v20  ;;  %5048 = vmatpush3.bf16.msra.mxu0 %v5334_v1 }
 0x92c   : > { %v7494_v33 = vsub.f32 %v3332_v15, %v3368_v30  ;;  %v3371_v40 = vmul.f32 0.015625, %v3360_v41  ;;  %v3395_v46 = vsel %vm3339_vm7, %v3383_v27, 0.0  ;;  %v3385_v47 = vmul.f32 %v7489_v39, %v7489_v39  ;;  %5049 = vmatprep.subr.bf16.mxu0 %v6142_v61  ;;  %v5338_v15 = vld [vmem:[%s6875_s27 + $0x20] sm:$0xff]  }
 0x92d   : > { %v3357_v23 = vpop.xlane.xlu0 %3356  ;;  %3396 = vadd.xlane.f32.xlu1 %v3395_v46  ;;  %5038 = vmatpush3.bf16.msra.mxu1 %v5331_v10 }
 0x92e   : > { %v7499_v44 = vsub.f32 %v3335_v57, %v3371_v40  ;;  %v3370_v43 = vmul.f32 0.015625, %v3357_v23  ;;  %v3384_v29 = vmul.f32 %v7494_v33, %v7494_v33  ;;  %v3401_v50 = vsel %vm3339_vm7, %v3385_v47, 0.0  ;;  %5039 = vmatprep.subr.bf16.mxu1 %v6142_v61 }
 0x92f   : > { %5050 = vmatpush3.bf16.msra.mxu0 %v5335_v4 }
 0x930   : > { %v7503_v2 = vsub.f32 %v3334_v17, %v3370_v43  ;;  %v3398_v0 = vsel %vm3339_vm7, %v3384_v29, 0.0  ;;  %v3387_v51 = vmul.f32 %v7499_v44, %v7499_v44  ;;  %5051 = vmatprep.subr.bf16.mxu0 %v6142_v61  ;;  %v4697_v43 = vld [vmem:[%s891_s28] ss:$0 sm:$0xff] }
 0x931   : > { %3402 = vadd.xlane.f32.xlu1 %v3401_v50  ;;  %3399 = vadd.xlane.f32.xlu0 %v3398_v0  ;;  %v3363_v42 = vpop.xlane.xlu0 %3362 }
 0x932   : > { %v3372_v54 = vmul.f32 0.015625, %v3363_v42  ;;  %v3386_v36 = vmul.f32 %v7503_v2, %v7503_v2  ;;  %v3407_v34 = vsel %vm3339_vm7, %v3387_v51, 0.0  ;;  %5040 = vmatpush3.bf16.msra.mxu1 %v5332_v7 }
 0x933   : > { %5041 = vmatprep.subr.bf16.mxu1 %v6142_v61  ;;  %5052 = vmatpush3.bf16.msra.mxu0 %v5336_v18 }
 0x934   : > { %v7511_v48 = vsub.f32 %v3336_v13, %v3372_v54  ;;  %v3404_v60 = vsel %vm3339_vm7, %v3386_v36, 0.0  ;;  %5053 = vmatprep.subr.bf16.mxu0 %v6142_v61 }
 0x935   : > { %3408 = vadd.xlane.f32.xlu1 %v3407_v34  ;;  %3405 = vadd.xlane.f32.xlu0 %v3404_v60  ;;  %v4698_v60 = vld [vmem:[%s899_s3] ss:$0 sm:$0xff] }
 0x936   : > { %v3388_v53 = vmul.f32 %v7511_v48, %v7511_v48  ;;  %5042 = vmatpush3.bf16.msra.mxu1 %v5333_v52 }
 0x937   : > { %5054 = vmatpush3.bf16.msra.mxu0 %v5337_v14 }
 0x938   : > { %v3410_v56 = vsel %vm3339_vm7, %v3388_v53, 0.0  ;;  %5055 = vmatprep.subr.bf16.mxu0 %v6142_v61 }
 0x939   : > { %3411 = vadd.xlane.f32.xlu0 %v3410_v56 }
 0x93b   : > { %5056 = vmatpush3.bf16.msra.mxu0 %v5338_v15 }
 0x93c   : > { %5057 = vmatprep.subr.bf16.mxu0 %v6142_v61 }
 0x93f   : > { %5058 = vmatpush3.bf16.msra.mxu0 %v5339_v6 }
 0x940   : > { %5059 = vmatprep.subr.bf16.mxu0 %v6142_v61 }
 0x9b6   : > { %v3391_v19 = vpop.xlane.xlu1 %3390 }
 0x9b7   : > { %v3413_v63 = vmul.f32 0.015625, %v3391_v19 }
 0x9b8   : > { %v3394_v59 = vpop.xlane.xlu0 %3393 }
 0x9b9   : > { %v3414_v57 = vmul.f32 0.015625, %v3394_v59  ;;  %v3421_v31 = vadd.f32 1e-05, %v3413_v63 }
 0x9ba   : > { %v3397_v9 = vpop.xlane.xlu1 %3396 }
 0x9bb   : > { %v3415_v17 = vmul.f32 0.015625, %v3397_v9  ;;  %v3422_v21 = vadd.f32 1e-05, %v3414_v57 }
 0x9bd   : > { %v3423_v22 = vadd.f32 1e-05, %v3415_v17  ;;  %5406 = vrsqrt.f32 %v3422_v21 }
 0x9be   : > { %v3403_v38 = vpop.xlane.xlu1 %3402  ;;  %v3400_v13 = vpop.xlane.xlu0 %3399 }
 0x9bf   : > { %v3417_v11 = vmul.f32 0.015625, %v3403_v38  ;;  %v3416_v12 = vmul.f32 0.015625, %v3400_v13  ;;  %5408 = vrsqrt.f32 %v3423_v22  ;;  %v5340_v22 = vld [vmem:[%s6875_s27 + $0x30] sm:$0xff]  }
 0x9c0   : > { %5410 = vrsqrt.f32 %v3421_v31  ;;  %5060 = vmatpush3.bf16.msra.mxu0 %v5340_v22  ;;  %v5341_v31 = vld [vmem:[%s6875_s27 + $0x38] sm:$0xff]   ;;  %v4699_v38 = vld [vmem:[%s932_s8] ss:$0 sm:$0xff] }
 0x9c1   : > { %v3425_v58 = vadd.f32 1e-05, %v3417_v11  ;;  %v3424_v37 = vadd.f32 1e-05, %v3416_v12  ;;  %5061 = vmatprep.subr.bf16.mxu0 %v6142_v61 }
 0x9c2   : > { %v3409_v25 = vpop.xlane.xlu1 %3408  ;;  %v3406_v28 = vpop.xlane.xlu0 %3405 }
 0x9c3   : > { %5412 = vrsqrt.f32 %v3425_v58  ;;  %v3419_v45 = vmul.f32 0.015625, %v3409_v25  ;;  %v3418_v16 = vmul.f32 0.015625, %v3406_v28 }
 0x9c4   : > { %5414 = vrsqrt.f32 %v3424_v37  ;;  %5062 = vmatpush3.bf16.msra.mxu0 %v5341_v31 }
 0x9c5   : > { %v3427_v5 = vadd.f32 1e-05, %v3419_v45  ;;  %v3426_v24 = vadd.f32 1e-05, %v3418_v16 }
 0x9c6   : > { %v3412_v8 = vpop.xlane.xlu0 %3411 }
 0x9c7   : > { %5416 = vrsqrt.f32 %v3427_v5  ;;  %v3420_v49 = vmul.f32 0.015625, %v3412_v8  ;;  %v5407_v30 = vpop.eup %5406  ;;  %v4705_v5 = vld [vmem:[%s949_s6] ss:$0 sm:$0xff] }
 0x9c8   : > { %5418 = vrsqrt.f32 %v3426_v24  ;;  %v3438_v46 = vmul.f32 %v5407_v30, %v7480_v3 }
 0x9c9   : > { %v3428_v32 = vadd.f32 1e-05, %v3420_v49  ;;  %v5409_v20 = vpop.eup %5408 }
 0x9ca   : > { %v5411_v27 = vpop.eup %5410  ;;  %v3439_v47 = vmul.f32 %v5409_v20, %v7484_v62  ;;  %v3452_v54 = vmul.f32 %v4697_v43, %v3438_v46 }
 0x9cb   : > { %5420 = vrsqrt.f32 %v3428_v32  ;;  %v3437_v29 = vmul.f32 %v5411_v27, %v7478_v35 }
 0x9cc   : > { %v3453_v36 = vmul.f32 %v4697_v43, %v3439_v47  ;;  %v3466_v35 = vadd.f32 %v4698_v60, %v3452_v54 }
 0x9cd   : > { %v5413_v41 = vpop.eup %5412  ;;  %v3451_v62 = vmul.f32 %v4697_v43, %v3437_v29 }
 0x9ce   : > { %v5415_v40 = vpop.eup %5414  ;;  %v3441_v50 = vmul.f32 %v5413_v41, %v7489_v39  ;;  %v3467_v10 = vadd.f32 %v4698_v60, %v3453_v36 }
 0x9cf   : > { %v3440_v23 = vmul.f32 %v5415_v40, %v7494_v33  ;;  %v3465_v1 = vadd.f32 %v4698_v60, %v3451_v62 }
 0x9d0   : > { %v3455_v53 = vmul.f32 %v4697_v43, %v3441_v50 }
 0x9d1   : > { %v5417_v0 = vpop.eup %5416  ;;  %v3454_v51 = vmul.f32 %v4697_v43, %v3440_v23  ;;  %v3507_v15 = vcombine.low %v3465_v1, %v3466_v35 }
 0x9d2   : > { %v5419_v42 = vpop.eup %5418  ;;  %v3443_v34 = vmul.f32 %v5417_v0, %v7499_v44  ;;  %v3469_v4 = vadd.f32 %v4698_v60, %v3455_v53 }
 0x9d3   : > { %v3442_v3 = vmul.f32 %v5419_v42, %v7503_v2  ;;  %v7548_v33 = vadd.f32 %v4698_v60, %v3454_v51 }
 0x9d4   : > { %v3457_v39 = vmul.f32 %v4697_v43, %v3443_v34 }
 0x9d5   : > { %v5421_v56 = vpop.eup %5420  ;;  %v3456_v55 = vmul.f32 %v4697_v43, %v3442_v3  ;;  %v3508_v18 = vcombine.low %v3467_v10, %v7548_v33 }
 0x9d6   : > { %v3444_v7 = vmul.f32 %v5421_v56, %v7511_v48  ;;  %v3471_v14 = vadd.f32 %v4698_v60, %v3457_v39  ;;  %v3515_v48 = vrot.slane %v3507_v15, %v6901_v26 }
 0x9d7   : > { %v3470_v52 = vadd.f32 %v4698_v60, %v3456_v55  ;;  %v3522_v19 = vrot.slane %v3508_v18, %v6901_v26 }
 0x9d8   : > { %v3458_v44 = vmul.f32 %v4697_v43, %v3444_v7 }
 0x9d9   : > { %v3524_v6 = vcombine.low %v3469_v4, %v3470_v52  ;;  %v3523_v9 = vcombine.low %v3515_v48, %v3522_v19 }
 0x9da   : > { %v7552_v2 = vadd.f32 %v4698_v60, %v3458_v44 }
 0x9db   : > { %v3532_v57 = vrot.slane %v3524_v6, %v6901_v26 }
 0x9dc   : > { %v3525_v59 = vcombine.low %v3471_v14, %v7552_v2 }
 0x9de   : > { %v3539_v63 = vrot.slane %v3525_v59, %v6901_v26 }
 0x9e0   : > { %v3540_v17 = vcombine.low %v3532_v57, %v3539_v63 }
 0x9e2   : > { %v3543_v21 = vpack.c.bf16 %v3540_v17, %v3523_v9 }
 0x9e4   : > { %5044 = vmatmul.mubr.msk.bf16.vlgmr.msra.gmra.mrb[72].mxu1 %vm1211_vm1, %v3543_v21 }
 0xab7   : > { %v3611_v13 = vpop.f32.mrb[72].mxu1 }
 0xab8   : > { %v3612_v11 = vadd.f32 %v4699_v38, %v3611_v13  ;;  %v5045_v12 = vpop.f32.mrb[73].mxu1 }
 0xab9   : > { %v3614_v58 = vpop.f32.mrb[74].mxu1 }
 0xaba   : > { %v3615_v37 = vadd.f32 %v4699_v38, %v3614_v58  ;;  %v5046_v25 = vpop.f32.mrb[75].mxu1  ;;  %v3618_v28 = vmax.f32 %v3612_v11, 0.0 }
 0xabc   : > { %v3619_v45 = vmax.f32 %v3615_v37, 0.0 }
 0xabe   : > { %v3620_v16 = vpack.c.bf16 %v3619_v45, %v3618_v28 }
 0xac0   : > { %5064 = vmatmul.mubr.bf16.vlgmr.msra.gmra.mrb[64].mxu0 %v3620_v16 }
 0xb93   : > { %v3709_v24 = vpop.f32.mrb[64].mxu0 }
 0xb94   : > { %v3710_v8 = vadd.f32 %v4705_v5, %v3709_v24  ;;  %v5065_v49 = vpop.f32.mrb[65].mxu0 }
 0xb95   : > { %v3712_v61 = vpop.f32.mrb[66].mxu0 }
 0xb96   : > { %v3718_v32 = vcombine.high %v3710_v8, %v3710_v8  ;;  %v3725_v30 = vrot.slane %v3710_v8, %v6901_v26  ;;  %v3713_v20 = vadd.f32 %v4705_v5, %v3712_v61  ;;  %v5066_v27 = vpop.f32.mrb[67].mxu0 }
 0xb98   : > { %v3735_v41 = vcombine.high %v3713_v20, %v3713_v20  ;;  %v3742_v40 = vrot.slane %v3713_v20, %v6901_v26  ;;  %v3760_v46 = vadd.f32 %v3725_v30, %v3465_v1  ;;  %v3733_v47 = vcombine.high %v3725_v30, %v3725_v30 }
 0xb99   : > { %v3732_v23 = vrot.slane %v3718_v32, %v6901_v26 }
 0xb9a   : > { %v3770_v43 = vsel %vm3339_vm7, %v3760_v46, 0.0  ;;  %v3761_v29 = vadd.f32 %v3733_v47, %v3466_v35  ;;  %v3750_v42 = vcombine.high %v3742_v40, %v3742_v40  ;;  %v3749_v54 = vrot.slane %v3735_v41, %v6901_v26 }
 0xb9b   : > { %3771 = vadd.xlane.f32.xlu1 %v3770_v43  ;;  %v3762_v50 = vadd.f32 %v3732_v23, %v3467_v10  ;;  %v3734_v0 = vcombine.high %v3732_v23, %v3732_v23  ;;  %v3764_v60 = vadd.f32 %v3742_v40, %v3469_v4 }
 0xb9c   : > { %v3773_v51 = vsel %vm3339_vm7, %v3761_v29, 0.0  ;;  %v3765_v62 = vadd.f32 %v3750_v42, %v3470_v52  ;;  %v3751_v53 = vcombine.high %v3749_v54, %v3749_v54  ;;  %v3766_v55 = vadd.f32 %v3749_v54, %v3471_v14 }
 0xb9d   : > { %3774 = vadd.xlane.f32.xlu0 %v3773_v51  ;;  %v3763_v36 = vadd.f32 %v3734_v0, %v7548_v33  ;;  %v3776_v34 = vsel %vm3339_vm7, %v3762_v50, 0.0  ;;  %v3782_v56 = vsel %vm3339_vm7, %v3764_v60, 0.0 }
 0xb9e   : > { %v3785_v35 = vsel %vm3339_vm7, %v3765_v62, 0.0  ;;  %v3767_v10 = vadd.f32 %v3751_v53, %v7552_v2  ;;  %v3788_v33 = vsel %vm3339_vm7, %v3766_v55, 0.0 }
 0xb9f   : > { %3777 = vadd.xlane.f32.xlu1 %v3776_v34  ;;  %v3779_v3 = vsel %vm3339_vm7, %v3763_v36, 0.0 }
 0xba0   : > { %v3791_v39 = vsel %vm3339_vm7, %v3767_v10, 0.0 }
 0xba1   : > { %3780 = vadd.xlane.f32.xlu0 %v3779_v3 }
 0xba3   : > { %3783 = vadd.xlane.f32.xlu1 %v3782_v56 }
 0xba5   : > { %3786 = vadd.xlane.f32.xlu0 %v3785_v35 }
 0xba7   : > { %3789 = vadd.xlane.f32.xlu1 %v3788_v33 }
 0xba9   : > { %3792 = vadd.xlane.f32.xlu0 %v3791_v39  ;;  %v4714_v39 = vld [vmem:[%s907_s30] ss:$0 sm:$0xff] }
 0xc28   : > { %v3772_v7 = vpop.xlane.xlu1 %3771 }
 0xc29   : > { %v3794_v1 = vmul.f32 0.015625, %v3772_v7 }
 0xc2a   : > { %v3775_v52 = vpop.xlane.xlu0 %3774 }
 0xc2b   : > { %v7581_v4 = vsub.f32 %v3760_v46, %v3794_v1  ;;  %v3795_v44 = vmul.f32 0.015625, %v3775_v52 }
 0xc2c   : > { %v3778_v18 = vpop.xlane.xlu1 %3777 }
 0xc2d   : > { %v7583_v14 = vsub.f32 %v3761_v29, %v3795_v44  ;;  %v3796_v15 = vmul.f32 0.015625, %v3778_v18  ;;  %v3810_v2 = vmul.f32 %v7581_v4, %v7581_v4  ;;  %v4715_v18 = vld [vmem:[%s915_s9] ss:$0 sm:$0xff] }
 0xc2e   : > { %v3781_v6 = vpop.xlane.xlu0 %3780 }
 0xc2f   : > { %v7587_v19 = vsub.f32 %v3762_v50, %v3796_v15  ;;  %v3797_v59 = vmul.f32 0.015625, %v3781_v6  ;;  %v3818_v48 = vsel %vm3339_vm7, %v3810_v2, 0.0  ;;  %v3811_v57 = vmul.f32 %v7583_v14, %v7583_v14 }
 0xc30   : > { %v3784_v63 = vpop.xlane.xlu1 %3783  ;;  %3819 = vadd.xlane.f32.xlu1 %v3818_v48 }
 0xc31   : > { %v7592_v9 = vsub.f32 %v3763_v36, %v3797_v59  ;;  %v3798_v17 = vmul.f32 0.015625, %v3784_v63  ;;  %v3821_v21 = vsel %vm3339_vm7, %v3811_v57, 0.0  ;;  %v3812_v22 = vmul.f32 %v7587_v19, %v7587_v19 }
 0xc32   : > { %v3787_v31 = vpop.xlane.xlu0 %3786  ;;  %3822 = vadd.xlane.f32.xlu0 %v3821_v21 }
 0xc33   : > { %v7597_v38 = vsub.f32 %v3764_v60, %v3798_v17  ;;  %v3799_v13 = vmul.f32 0.015625, %v3787_v31  ;;  %v3824_v11 = vsel %vm3339_vm7, %v3812_v22, 0.0  ;;  %v3813_v12 = vmul.f32 %v7592_v9, %v7592_v9 }
 0xc34   : > { %3825 = vadd.xlane.f32.xlu1 %v3824_v11  ;;  %v3790_v58 = vpop.xlane.xlu1 %3789 }
 0xc35   : > { %v7602_v37 = vsub.f32 %v3765_v62, %v3799_v13  ;;  %v3800_v25 = vmul.f32 0.015625, %v3790_v58  ;;  %v3827_v28 = vsel %vm3339_vm7, %v3813_v12, 0.0  ;;  %v3814_v45 = vmul.f32 %v7597_v38, %v7597_v38 }
 0xc36   : > { %3828 = vadd.xlane.f32.xlu0 %v3827_v28  ;;  %v3793_v16 = vpop.xlane.xlu0 %3792 }
 0xc37   : > { %v7607_v5 = vsub.f32 %v3766_v55, %v3800_v25  ;;  %v3801_v24 = vmul.f32 0.015625, %v3793_v16  ;;  %v3830_v8 = vsel %vm3339_vm7, %v3814_v45, 0.0  ;;  %v3815_v49 = vmul.f32 %v7602_v37, %v7602_v37 }
 0xc38   : > { %3831 = vadd.xlane.f32.xlu1 %v3830_v8 }
 0xc39   : > { %v7612_v61 = vsub.f32 %v3767_v10, %v3801_v24  ;;  %v3833_v32 = vsel %vm3339_vm7, %v3815_v49, 0.0  ;;  %v3816_v30 = vmul.f32 %v7607_v5, %v7607_v5 }
 0xc3a   : > { %3834 = vadd.xlane.f32.xlu0 %v3833_v32 }
 0xc3b   : > { %v3836_v20 = vsel %vm3339_vm7, %v3816_v30, 0.0  ;;  %v3817_v27 = vmul.f32 %v7612_v61, %v7612_v61 }
 0xc3c   : > { %3837 = vadd.xlane.f32.xlu1 %v3836_v20 }
 0xc3d   : > { %v3839_v41 = vsel %vm3339_vm7, %v3817_v27, 0.0 }
 0xc3e   : > { %3840 = vadd.xlane.f32.xlu0 %v3839_v41 }
 0xcbd   : > { %v3820_v40 = vpop.xlane.xlu1 %3819 }
 0xcbe   : > { %v3842_v46 = vmul.f32 0.015625, %v3820_v40 }
 0xcbf   : > { %v3823_v47 = vpop.xlane.xlu0 %3822 }
 0xcc0   : > { %v3850_v23 = vadd.f32 1e-05, %v3842_v46  ;;  %v3843_v43 = vmul.f32 0.015625, %v3823_v47 }
 0xcc1   : > { %v3826_v29 = vpop.xlane.xlu1 %3825 }
 0xcc2   : > { %5422 = vrsqrt.f32 %v3850_v23  ;;  %v3851_v50 = vadd.f32 1e-05, %v3843_v43  ;;  %v3844_v0 = vmul.f32 0.015625, %v3826_v29 }
 0xcc3   : > { %v3829_v51 = vpop.xlane.xlu0 %3828 }
 0xcc4   : > { %5424 = vrsqrt.f32 %v3851_v50  ;;  %v3852_v42 = vadd.f32 1e-05, %v3844_v0  ;;  %v3845_v54 = vmul.f32 0.015625, %v3829_v51 }
 0xcc5   : > { %v3832_v36 = vpop.xlane.xlu1 %3831 }
 0xcc6   : > { %5426 = vrsqrt.f32 %v3852_v42  ;;  %v3853_v34 = vadd.f32 1e-05, %v3845_v54  ;;  %v3846_v60 = vmul.f32 0.015625, %v3832_v36 }
 0xcc7   : > { %v3835_v3 = vpop.xlane.xlu0 %3834 }
 0xcc8   : > { %5428 = vrsqrt.f32 %v3853_v34  ;;  %v3854_v62 = vadd.f32 1e-05, %v3846_v60  ;;  %v3847_v53 = vmul.f32 0.015625, %v3835_v3 }
 0xcc9   : > { %v3838_v56 = vpop.xlane.xlu1 %3837 }
 0xcca   : > { %5430 = vrsqrt.f32 %v3854_v62  ;;  %v3855_v55 = vadd.f32 1e-05, %v3847_v53  ;;  %v3848_v35 = vmul.f32 0.015625, %v3838_v56 }
 0xccb   : > { %v3841_v10 = vpop.xlane.xlu0 %3840 }
 0xccc   : > { %v5423_v33 = vpop.eup %5422  ;;  %5432 = vrsqrt.f32 %v3855_v55  ;;  %v3856_v7 = vadd.f32 1e-05, %v3848_v35  ;;  %v3849_v1 = vmul.f32 0.015625, %v3841_v10 }
 0xccd   : > { %v3866_v52 = vmul.f32 %v5423_v33, %v7581_v4 }
 0xcce   : > { %v5425_v44 = vpop.eup %5424  ;;  %5434 = vrsqrt.f32 %v3856_v7  ;;  %v3857_v15 = vadd.f32 1e-05, %v3849_v1 }
 0xccf   : > { %v3880_v2 = vmul.f32 %v4714_v39, %v3866_v52  ;;  %v3867_v6 = vmul.f32 %v5425_v44, %v7583_v14 }
 0xcd0   : > { %v5427_v59 = vpop.eup %5426  ;;  %5436 = vrsqrt.f32 %v3857_v15 }
 0xcd1   : > { %v3894_v48 = vadd.f32 %v4715_v18, %v3880_v2  ;;  %v3881_v57 = vmul.f32 %v4714_v39, %v3867_v6  ;;  %v3868_v63 = vmul.f32 %v5427_v59, %v7587_v19 }
 0xcd2   : > { %v5429_v17 = vpop.eup %5428 }
 0xcd3   : > { %3902 = vst.msk [vmem:[#allocation2] sm:$0x3] %vm3339_vm7, %v3894_v48  ;;  %v3895_v21 = vadd.f32 %v4715_v18, %v3881_v57  ;;  %v3882_v22 = vmul.f32 %v4714_v39, %v3868_v63  ;;  %v3869_v4 = vmul.f32 %v5429_v17, %v7592_v9 }
 0xcd4   : > { %v5431_v31 = vpop.eup %5430 }
 0xcd5   : > { %3903 = vst.msk [vmem:[#allocation2 + $0x2] sm:$0x3] %vm3339_vm7, %v3895_v21  ;;  %v3896_v13 = vadd.f32 %v4715_v18, %v3882_v22  ;;  %v3883_v11 = vmul.f32 %v4714_v39, %v3869_v4  ;;  %v3870_v14 = vmul.f32 %v5431_v31, %v7597_v38 }
 0xcd6   : > { %v5433_v12 = vpop.eup %5432 }
 0xcd7   : > { %3904 = vst.msk [vmem:[#allocation2 + $0x4] sm:$0x3] %vm3339_vm7, %v3896_v13  ;;  %v3897_v58 = vadd.f32 %v4715_v18, %v3883_v11  ;;  %v3884_v25 = vmul.f32 %v4714_v39, %v3870_v14  ;;  %v3871_v19 = vmul.f32 %v5433_v12, %v7602_v37  ;;  %v3922_v20 = vsel (!%p4716_p13), %vm3339_vm7, %v3896_v13, 0.0  ;;  %v4048_v12 = vld [vmem:[#allocation27] sm:$0xff] (!%p4716_p13) }
 0xcd8   : > { %v5435_v28 = vpop.eup %5434  ;;  %3923 = vadd.xlane.f32.xlu1 (!%p4716_p13), %v3922_v20 }
 0xcd9   : > { %3905 = vst.msk [vmem:[#allocation2 + $0x6] sm:$0x3] %vm3339_vm7, %v3897_v58  ;;  %v3898_v45 = vadd.f32 %v4715_v18, %v3884_v25  ;;  %v3885_v16 = vmul.f32 %v4714_v39, %v3871_v19  ;;  %v3872_v9 = vmul.f32 %v5435_v28, %v7607_v5  ;;  %v3916_v5 = vsel (!%p4716_p13), %vm3339_vm7, %v3894_v48, 0.0  ;;  %v4050_v19 = vld [vmem:[#allocation27 + $0x10] sm:$0xff] (!%p4716_p13)  ;;  %v4051_v28 = vld [vmem:[#allocation27 + $0x18] sm:$0xff] (!%p4716_p13) }
 0xcda   : > { %v5437_v24 = vpop.eup %5436  ;;  %3917 = vadd.xlane.f32.xlu0 (!%p4716_p13), %v3916_v5  ;;  %v3925_v27 = vsel (!%p4716_p13), %vm3339_vm7, %v3897_v58, 0.0 }
 0xcdb   : > { %3906 = vst.msk [vmem:[#allocation2 + $0x8] sm:$0x3] %vm3339_vm7, %v3898_v45  ;;  %v3899_v8 = vadd.f32 %v4715_v18, %v3885_v16  ;;  %v3886_v49 = vmul.f32 %v4714_v39, %v3872_v9  ;;  %v3873_v38 = vmul.f32 %v5437_v24, %v7612_v61  ;;  %3913 = sbr.rel (%p4716_p13) target bundleno = 3874 (0xf22), region = 172  ;;  %v3919_v61 = vsel (!%p4716_p13), %vm3339_vm7, %v3895_v21, 0.0  ;;  %v4052_v16 = vld [vmem:[#allocation27 + $0x20] sm:$0xff] (!%p4716_p13)  ;;  %v4053_v9 = vld [vmem:[#allocation27 + $0x28] sm:$0xff] (!%p4716_p13) }
 0xcdc   : > { %3926 = vadd.xlane.f32.xlu1 (!%p4716_p13), %v3925_v27  ;;  %v3928_v41 = vsel (!%p4716_p13), %vm3339_vm7, %v3898_v45, 0.0  ;;  %v5094_v24 = vpack.c.bf16 (!%p4716_p13), %v4053_v9, %v4052_v16 }
 0xcdd   : > { %3907 = vst.msk [vmem:[#allocation2 + $0xa] sm:$0x3] %vm3339_vm7, %v3899_v8  ;;  %v3900_v32 = vadd.f32 %v4715_v18, %v3886_v49  ;;  %v3887_v30 = vmul.f32 %v4714_v39, %v3873_v38  ;;  %v3931_v40 = vsel (!%p4716_p13), %vm3339_vm7, %v3899_v8, 0.0  ;;  %v4055_v49 = vld [vmem:[#allocation27 + $0x38] sm:$0xff] (!%p4716_p13) }
 0xcde   : > { %3920 = vadd.xlane.f32.xlu0 (!%p4716_p13), %v3919_v61 }
 0xcdf   : > { %3908 = vst.msk [vmem:[#allocation2 + $0xc] sm:$0x3] %vm3339_vm7, %v3900_v32  ;;  %v3901_v37 = vadd.f32 %v4715_v18, %v3887_v30  ;;  %v3934_v46 = vsel (!%p4716_p13), %vm3339_vm7, %v3900_v32, 0.0 }
 0xce0   : > { %3932 = vadd.xlane.f32.xlu1 (!%p4716_p13), %v3931_v40 }
 0xce1   : > { %3909 = vst.msk [vmem:[#allocation2 + $0xe] sm:$0x3] %vm3339_vm7, %v3901_v37  ;;  %v3937_v47 = vsel (!%p4716_p13), %vm3339_vm7, %v3901_v37, 0.0 }
 0xce2   : > { %3929 = vadd.xlane.f32.xlu0 %v3928_v41 }
 0xce4   : > { %3938 = vadd.xlane.f32.xlu1 %v3937_v47 }
 0xce6   : > { %3935 = vadd.xlane.f32.xlu0 %v3934_v46 }
 0xd65   : > { %v3924_v43 = vpop.xlane.xlu1 %3923 }
 0xd66   : > { %v3942_v50 = vmul.f32 0.015625, %v3924_v43 }
 0xd67   : > { %v3918_v23 = vpop.xlane.xlu0 %3917 }
 0xd68   : > { %v3940_v29 = vmul.f32 0.015625, %v3918_v23  ;;  %v7652_v51 = vsub.f32 %v3896_v13, %v3942_v50 }
 0xd69   : > { %v3927_v54 = vpop.xlane.xlu1 %3926 }
 0xd6a   : > { %v7650_v0 = vsub.f32 %v3894_v48, %v3940_v29  ;;  %v3943_v34 = vmul.f32 0.015625, %v3927_v54  ;;  %v3958_v3 = vmul.f32 %v7652_v51, %v7652_v51 }
 0xd6b   : > { %v3921_v42 = vpop.xlane.xlu0 %3920 }
 0xd6c   : > { %v3941_v36 = vmul.f32 0.015625, %v3921_v42  ;;  %v3956_v60 = vmul.f32 %v7650_v0, %v7650_v0  ;;  %v7660_v53 = vsub.f32 %v3897_v58, %v3943_v34  ;;  %v3970_v10 = vsel %vm3339_vm7, %v3958_v3, 0.0  ;;  %v4049_v58 = vld [vmem:[#allocation27 + $0x8] sm:$0xff] }
 0xd6d   : > { %v3933_v35 = vpop.xlane.xlu1 %3932  ;;  %v5086_v25 = vpack.c.bf16 %v4049_v58, %v4048_v12 }
 0xd6e   : > { %v7658_v62 = vsub.f32 %v3895_v21, %v3941_v36  ;;  %v3964_v56 = vsel %vm3339_vm7, %v3956_v60, 0.0  ;;  %v3945_v39 = vmul.f32 0.015625, %v3933_v35  ;;  %v3959_v1 = vmul.f32 %v7660_v53, %v7660_v53 }
 0xd6f   : > { %3965 = vadd.xlane.f32.xlu0 %v3964_v56  ;;  %v3930_v55 = vpop.xlane.xlu0 %3929  ;;  %5087 = vmatprep.subr.bf16.mxu0 %v5086_v25 }
 0xd70   : > { %v3944_v33 = vmul.f32 0.015625, %v3930_v55  ;;  %v3957_v7 = vmul.f32 %v7658_v62, %v7658_v62  ;;  %v7670_v44 = vsub.f32 %v3899_v8, %v3945_v39  ;;  %v3973_v6 = vsel %vm3339_vm7, %v3959_v1, 0.0  ;;  %5089 = vmatpush3.bf16.msra.mxu0 %v5086_v25  ;;  %v4054_v8 = vld [vmem:[#allocation27 + $0x30] sm:$0xff] }
 0xd71   : > { %v3939_v2 = vpop.xlane.xlu1 %3938  ;;  %v5098_v38 = vpack.c.bf16 %v4055_v49, %v4054_v8 }
 0xd72   : > { %v7668_v52 = vsub.f32 %v3898_v45, %v3944_v33  ;;  %v3967_v18 = vsel %vm3339_vm7, %v3957_v7, 0.0  ;;  %v3947_v48 = vmul.f32 0.015625, %v3939_v2  ;;  %v3961_v63 = vmul.f32 %v7670_v44, %v7670_v44  ;;  %v4717_v33 = vld [vmem:[#allocation24] ss:$0 sm:$0xff] }
 0xd73   : > { %3971 = vadd.xlane.f32.xlu0 %v3970_v10  ;;  %3968 = vadd.xlane.f32.xlu1 %v3967_v18  ;;  %v3936_v15 = vpop.xlane.xlu0 %3935  ;;  %v5090_v45 = vpack.c.bf16 %v4051_v28, %v4050_v19 }
 0xd74   : > { %v3946_v59 = vmul.f32 0.015625, %v3936_v15  ;;  %v3960_v57 = vmul.f32 %v7668_v52, %v7668_v52  ;;  %v7680_v21 = vsub.f32 %v3901_v37, %v3947_v48  ;;  %v3979_v4 = vsel %vm3339_vm7, %v3961_v63, 0.0 }
 0xd75   : > { %5091 = vmatprep.subr.bf16.mxu0 %v5090_v45 }
 0xd76   : > { %v7678_v17 = vsub.f32 %v3900_v32, %v3946_v59  ;;  %v3976_v22 = vsel %vm3339_vm7, %v3960_v57, 0.0  ;;  %v3963_v13 = vmul.f32 %v7680_v21, %v7680_v21  ;;  %5093 = vmatpush3.bf16.msra.mxu0 %v5090_v45 }
 0xd77   : > { %3974 = vadd.xlane.f32.xlu1 %v3973_v6  ;;  %3977 = vadd.xlane.f32.xlu0 %v3976_v22  ;;  %v4718_v6 = vld [vmem:[#allocation26] ss:$0 sm:$0xff] }
 0xd78   : > { %v3962_v31 = vmul.f32 %v7678_v17, %v7678_v17  ;;  %v3985_v14 = vsel %vm3339_vm7, %v3963_v13, 0.0  ;;  %5095 = vmatprep.subr.bf16.mxu0 %v5094_v24 }
 0xd7a   : > { %v3982_v11 = vsel %vm3339_vm7, %v3962_v31, 0.0  ;;  %5097 = vmatpush3.bf16.msra.mxu0 %v5094_v24 }
 0xd7b   : > { %3980 = vadd.xlane.f32.xlu1 %v3979_v4  ;;  %3983 = vadd.xlane.f32.xlu0 %v3982_v11 }
 0xd7c   : > { %5099 = vmatprep.subr.bf16.mxu0 %v5098_v38 }
 0xd7e   : > { %5101 = vmatpush3.bf16.msra.mxu0 %v5098_v38 }
 0xd7f   : > { %3986 = vadd.xlane.f32.xlu1 %v3985_v14 }
 0xdfc   : > { %v3966_v32 = vpop.xlane.xlu0 %3965 }
 0xdfd   : > { %v3988_v30 = vmul.f32 0.015625, %v3966_v32 }
 0xdff   : > { %v3996_v37 = vadd.f32 1e-08, %v3988_v30 }
 0xe00   : > { %v3969_v5 = vpop.xlane.xlu1 %3968  ;;  %v3972_v20 = vpop.xlane.xlu0 %3971 }
 0xe01   : > { %5446 = vrsqrt.f32 %v3996_v37  ;;  %v3989_v61 = vmul.f32 0.015625, %v3969_v5  ;;  %v3990_v27 = vmul.f32 0.015625, %v3972_v20 }
 0xe03   : > { %v3997_v41 = vadd.f32 1e-08, %v3989_v61  ;;  %v3998_v40 = vadd.f32 1e-08, %v3990_v27 }
 0xe04   : > { %v3975_v46 = vpop.xlane.xlu1 %3974  ;;  %v3978_v47 = vpop.xlane.xlu0 %3977 }
 0xe05   : > { %5448 = vrsqrt.f32 %v3997_v41  ;;  %v3991_v23 = vmul.f32 0.015625, %v3975_v46  ;;  %v3992_v43 = vmul.f32 0.015625, %v3978_v47 }
 0xe06   : > { %5450 = vrsqrt.f32 %v3998_v40 }
 0xe07   : > { %v3999_v29 = vadd.f32 1e-08, %v3991_v23  ;;  %v4000_v50 = vadd.f32 1e-08, %v3992_v43 }
 0xe08   : > { %v3981_v42 = vpop.xlane.xlu1 %3980  ;;  %v3984_v54 = vpop.xlane.xlu0 %3983 }
 0xe09   : > { %5452 = vrsqrt.f32 %v3999_v29  ;;  %v3993_v36 = vmul.f32 0.015625, %v3981_v42  ;;  %v3994_v34 = vmul.f32 0.015625, %v3984_v54  ;;  %v4724_v54 = vld [vmem:[#allocation30] ss:$0 sm:$0xff] }
 0xe0a   : > { %5454 = vrsqrt.f32 %v4000_v50 }
 0xe0b   : > { %v5447_v60 = vpop.eup %5446  ;;  %v4001_v3 = vadd.f32 1e-08, %v3993_v36  ;;  %v4002_v56 = vadd.f32 1e-08, %v3994_v34 }
 0xe0c   : > { %v3987_v55 = vpop.xlane.xlu1 %3986  ;;  %v4012_v10 = vmul.f32 %v5447_v60, %v7650_v0 }
 0xe0d   : > { %5456 = vrsqrt.f32 %v4001_v3  ;;  %v3995_v35 = vmul.f32 0.015625, %v3987_v55 }
 0xe0e   : > { %5458 = vrsqrt.f32 %v4002_v56  ;;  %v4026_v2 = vmul.f32 %v4717_v33, %v4012_v10 }
 0xe0f   : > { %v5449_v39 = vpop.eup %5448  ;;  %v4003_v7 = vadd.f32 1e-08, %v3995_v35 }
 0xe10   : > { %v5451_v1 = vpop.eup %5450  ;;  %v4013_v18 = vmul.f32 %v5449_v39, %v7658_v62  ;;  %v4040_v0 = vadd.f32 %v4718_v6, %v4026_v2 }
 0xe11   : > { %5460 = vrsqrt.f32 %v4003_v7  ;;  %v4014_v15 = vmul.f32 %v5451_v1, %v7652_v51 }
 0xe12   : > { %v4027_v59 = vmul.f32 %v4717_v33, %v4013_v18 }
 0xe13   : > { %v5453_v48 = vpop.eup %5452  ;;  %v4028_v22 = vmul.f32 %v4717_v33, %v4014_v15 }
 0xe14   : > { %v5455_v57 = vpop.eup %5454  ;;  %v4015_v63 = vmul.f32 %v5453_v48, %v7660_v53  ;;  %v4041_v4 = vadd.f32 %v4718_v6, %v4027_v59 }
 0xe15   : > { %v4016_v13 = vmul.f32 %v5455_v57, %v7668_v52  ;;  %v4042_v62 = vadd.f32 %v4718_v6, %v4028_v22 }
 0xe16   : > { %v4029_v31 = vmul.f32 %v4717_v33, %v4015_v63  ;;  %v4071_v14 = vcombine.low %v4040_v0, %v4041_v4 }
 0xe17   : > { %v5457_v11 = vpop.eup %5456  ;;  %v4030_v28 = vmul.f32 %v4717_v33, %v4016_v13 }
 0xe18   : > { %v5459_v12 = vpop.eup %5458  ;;  %v4043_v58 = vadd.f32 %v4718_v6, %v4029_v31  ;;  %v4017_v51 = vmul.f32 %v5457_v11, %v7670_v44  ;;  %v4079_v53 = vrot.slane %v4071_v14, %v6901_v26 }
 0xe19   : > { %v4018_v25 = vmul.f32 %v5459_v12, %v7678_v17  ;;  %v4044_v32 = vadd.f32 %v4718_v6, %v4030_v28 }
 0xe1a   : > { %v4072_v19 = vcombine.low %v4042_v62, %v4043_v58  ;;  %v4031_v45 = vmul.f32 %v4717_v33, %v4017_v51 }
 0xe1b   : > { %v5461_v16 = vpop.eup %5460  ;;  %v4032_v52 = vmul.f32 %v4717_v33, %v4018_v25 }
 0xe1c   : > { %v4019_v9 = vmul.f32 %v5461_v16, %v7680_v21  ;;  %v4086_v24 = vrot.slane %v4072_v19, %v6901_v26  ;;  %v4045_v8 = vadd.f32 %v4718_v6, %v4031_v45  ;;  %v4719_v21 = vld [vmem:[#allocation29] ss:$0 sm:$0xff] }
 0xe1d   : > { %v4046_v44 = vadd.f32 %v4718_v6, %v4032_v52 }
 0xe1e   : > { %v4087_v49 = vcombine.low %v4079_v53, %v4086_v24  ;;  %v4033_v38 = vmul.f32 %v4717_v33, %v4019_v9  ;;  %v4088_v17 = vcombine.low %v4044_v32, %v4045_v8 }
 0xe20   : > { %5083 = vmatprep.mubr.msk.f32.mxu0 %vm1211_vm1, %v4087_v49  ;;  %v4047_v30 = vadd.f32 %v4718_v6, %v4033_v38  ;;  %v4096_v5 = vrot.slane %v4088_v17, %v6901_v26 }
 0xe22   : > { %v4089_v37 = vcombine.low %v4046_v44, %v4047_v30 }
 0xe24   : > { %v4103_v20 = vrot.slane %v4089_v37, %v6901_v26 }
 0xe26   : > { %v4104_v61 = vcombine.low %v4096_v5, %v4103_v20 }
 0xe28   : > { %5084 = vmatmul.mubr.msk.f32.vlgmr.msra.gmra.mrb[0].mxu0 %vm1211_vm1, %v4104_v61 }
 0xefb   : > { %v5085_v27 = vpop.f32.mrb[0].mxu0 }
 0xefc   : > { %v4181_v41 = vadd.f32 %v5085_v27, %v4719_v21  ;;  %v4175_v40 = vpop.f32.mrb[1].mxu0 }
 0xefd   : > { %v4176_v46 = vadd.f32 %v4719_v21, %v4175_v40 }
 0xefe   : > { %v4723_v47 = vmul.f32 -1.442695, %v4181_v41 }
 0xeff   : > { %v4722_v23 = vmul.f32 -1.442695, %v4176_v46 }
 0xf00   : > { %5462 = vpow2.f32 %v4723_v47 }
 0xf01   : > { %5464 = vpow2.f32 %v4722_v23 }
 0xf0a   : > { %v5463_v43 = vpop.eup %5462 }
 0xf0b   : > { %v5465_v29 = vpop.eup %5464  ;;  %v4191_v50 = vadd.f32 1.0, %v5463_v43 }
 0xf0c   : > { %v4190_v42 = vadd.f32 1.0, %v5465_v29 }
 0xf0d   : > { %5466 = vrcp.f32 %v4191_v50 }
 0xf0e   : > { %5468 = vrcp.f32 %v4190_v42 }
 0xf17   : > { %v5467_v36 = vpop.eup %5466 }
 0xf18   : > { %v5469_v34 = vpop.eup %5468  ;;  %v4204_v60 = vmul.f32 %v5467_v36, %v4724_v54 }
 0xf19   : > { %v4203_v3 = vmul.f32 %v5469_v34, %v4724_v54 }
 0xf1a   : > { %v4224_v56 = vcombine.high %v4204_v60, %v4204_v60  ;;  %v4231_v55 = vrot.slane %v4204_v60, %v6901_v26  ;;  %4727 = vst.sshfl [vmem:[#allocation32 + $0x8] sm:$0x3 pattern:$0x76325410] %v4204_v60 }
 0xf1b   : > { %v4207_v35 = vcombine.high %v4203_v3, %v4203_v3  ;;  %v4214_v10 = vrot.slane %v4203_v3, %v6901_v26  ;;  %4725 = vst.sshfl [vmem:[#allocation32] sm:$0x3 pattern:$0x76325410] %v4203_v3 }
 0xf1c   : > { %v4238_v33 = vrot.slane %v4224_v56, %v6901_v26  ;;  %v4239_v39 = vcombine.high %v4231_v55, %v4231_v55  ;;  %4728 = vst.sshfl [vmem:[#allocation32 + $0xc] sm:$0x3 pattern:$0x76325410] %v4224_v56 }
 0xf1d   : > { %v4221_v7 = vrot.slane %v4207_v35, %v6901_v26  ;;  %v4222_v1 = vcombine.high %v4214_v10, %v4214_v10  ;;  %4726 = vst.sshfl [vmem:[#allocation32 + $0x4] sm:$0x3 pattern:$0x76325410] %v4207_v35 }
 0xf1e   : > { %v4240_v18 = vcombine.high %v4238_v33, %v4238_v33  ;;  %4254 = vst [vmem:[#allocation32 + $0xa] sm:$0x3] %v4239_v39 }
 0xf1f   : > { %v4223_v15 = vcombine.high %v4221_v7, %v4221_v7  ;;  %4250 = vst [vmem:[#allocation32 + $0x2] sm:$0x3] %v4222_v1 }
 0xf20   : > { %4256 = vst [vmem:[#allocation32 + $0xe] sm:$0x3] %v4240_v18 }
 0xf21   : > { %4252 = vst [vmem:[#allocation32 + $0x6] sm:$0x3] %v4223_v15 }
 0xf22 PF: > { %s7908_s19 = sld [smem:[#allocation47_spill]]  ;;  %s6147_s15 = smov [#allocation32]  }
 0xf23   : > { %s4266_s7 = sshll.u32 %s6147_s15, 4  ;;  %s4267_s7 = int_to_ptr.vmem [resolvable:$true] %s4266_s7 }
 0xf24   : > { %s5998_s22 = scalar_lea.vmem %s4267_s7, 256  ;;  %p6005_p9 = scmp.lt.s32.totalorder %s4267_s7, %s4267_s7 }
 0xf25   : > { %p5999_p8 = scmp.ne.s32.totalorder %s4267_s7, %s5998_s22  ;;  %p6006_p12 = scmp.lt.s32.totalorder %s5998_s22, %s5998_s22 }
 0xf27   : > { %p6007_p6 = por %p6006_p12, %p6005_p9 }
 0xf28   : > { %p5223_p4 = scmp.eq.s32.totalorder %s7908_s19, 1 }
 0xf2a   : > { %p6000_p1 = pnand %p5999_p8, %p5223_p4 }
 0xf2c   : > { %p6001_p11 = pneg %p6000_p1 }
 0xf2e   : > { %p6008_p0 = pnand %p6007_p6, %p6001_p11 }
 0xf30   : > { %6011 = shalt.err (!%p6008_p0)
}
 0xf31   : > { %s7909_s12 = sld [smem:[#allocation67_spill]] }
 0xf37   : > { %s6012_s30 = scalar_lea.hbm %s7909_s12, 256 }
 0xf38   : > { %p6013_p7 = scmp.ne.s32.totalorder %s7909_s12, %s6012_s30  ;;  %p6018_p5 = scmp.lt.u32.totalorder %s6012_s30, %s7909_s12 }
 0xf3a   : > { %p6014_p10 = pnand %p6013_p7, %p5223_p4 }
 0xf3c   : > { %p6015_p3 = pneg %p6014_p10 }
 0xf3e   : > { %p6020_p2 = pnand %p6018_p5, %p6015_p3 }
 0xf40   : > { %6023 = shalt.err (!%p6020_p2)
}
 0xf41   : > { %s6148_s2 = smov 2  }
 0xf42   : > { %5151 = dma.vmem_to_hbm [thread:$0]  (%p5223_p4), %s4267_s7, 256, %s7909_s12, [#allocation5], %s6146_s1, %s6146_s1, %s6148_s2  }
 0xf43   : > { %6089 = dma.done.wait (%p5223_p4), [#allocation5], 256  }
 0xf44   : > { %6091 = vsyncadd (%p5223_p4), [#allocation5], 4294967040 }
 0xf45 PF: > { %s7910_s14 = sld [smem:[#allocation46_spill]]  ;;  %s7911_s27 = sld [smem:[#allocation44_spill]] }
 0xf46   : > { %s7912_s10 = sld [smem:[#allocation50_spill]]  ;;  %s7913_s28 = smov %s6102_s29 }
 0xf47   : > { %s7914_s29 = smov %s6424_s13  ;;  %s7915_s30 = smov %s6110_s0 }
 0xf4b   : > { %s51_s19 = sadd.s32 1, %s7910_s14  }
 0xf4c   : > { %p48_p13 = scmp.ge.s32.totalorder %s51_s19, 4   ;;  %s7916_s0 = smov %s7912_s10 }
 0xf4e   :  { %50 = sbr.rel (!%p48_p13) target bundleno = 37 (0x25), region = 295 }
 0xf55   :  { %4282 = vsyncpa [#allocation4], 1 }
 0xf56   :  { %4284 = vsyncpa [#allocation4 + $0x1], 1 }
 0xf57   :  { %4285 = vsyncpa [#allocation7], 1 }
 0xf58   :  { %4287 = vsyncpa [#allocation7 + $0x1], 1 }
 0xf59   :  { %4288 = vsyncpa [#allocation10], 1 }
 0xf5a   :  { %4290 = vsyncpa [#allocation10 + $0x1], 1 }
 0xf5b   :  { %4291 = vsyncpa [#allocation13], 1 }
 0xf5c   :  { %4293 = vsyncpa [#allocation13 + $0x1], 1 }
 0xf5d   :  { %4294 = vsyncpa [#allocation16], 1 }
 0xf5e   :  { %4296 = vsyncpa [#allocation16 + $0x1], 1 }
 0xf5f   :  { %4297 = vsyncpa [#allocation19], 1 }
 0xf60   :  { %4299 = vsyncpa [#allocation19 + $0x1], 1 }
 0xf61   :  { %4300 = vsyncpa [#allocation22], 1 }
 0xf62   :  { %4302 = vsyncpa [#allocation22 + $0x1], 1 }
 0xf63   :  { %4303 = vsyncpa [#allocation25], 1 }
 0xf64   :  { %4304 = vsyncpa [#allocation28], 1 }
 0xf65   :  { %4305 = vsyncpa [#allocation31], 1 }
 0xf66   :  { %4306 = vsyncpa [#allocation5], 1 }
 0xf67   :  { %4308 = vsyncpa [#allocation5 + $0x1], 1 }

</bundles_post_ra>
